<compile_context>
chip_gen: v7x
topology: tpu7x:2x2x1
jax: 0.10.0
libtpu: 0.0.40
codegen_flags: <defaults>
</compile_context>

<pallas_src>
import jax
import jax.numpy as jnp
from jax import lax
from jax.experimental import pallas as pl
from jax.experimental.pallas import tpu as pltpu


def residual_block_pallas(x_nchw, w1, b1, w2, b2, *, row_tile=None):
    """Fused ResidualBlock forward (stride=1, identity shortcut), eval BN.

    x_nchw: (N, C, H, W) f32; w*: (3,3,C,C) BN-folded HWIO; b*: (1,C) folded.
    """
    N, C, H, W = x_nchw.shape
    Cp = max(128, ((C + 127) // 128) * 128)            # lane-dense channels

    if row_tile is None:
        # Largest divisor of H that is <= 32 (full H when H <= 32).
        row_tile = next(t for t in range(min(H, 32), 0, -1) if H % t == 0)
    TH = row_tile
    assert H % TH == 0
    NH = H // TH
    CR = 2 if TH % 2 == 0 else 1                       # epilogue row chunk

    # NCHW -> NHWC; zero-pad rows +2/+2, cols +8/+8 (conv halo, kept aligned),
    # channels -> Cp; cast to bf16 (MXU operand).  Padded values stay 0.
    x = jnp.transpose(x_nchw, (0, 2, 3, 1))
    x = jnp.pad(x, ((0, 0), (2, 2), (8, 8), (0, Cp - C)))
    x = x.astype(jnp.bfloat16)
    Hp, Wp = H + 4, W + 16

    def prep_w(w):      # (3,3,C,C) -> (3, 3*Cp, Cp) bf16, K index = dx*Cp+cin
        wp = jnp.pad(w, ((0, 0), (0, 0), (0, Cp - C), (0, Cp - C)))
        return wp.reshape(3, 3 * Cp, Cp).astype(jnp.bfloat16)

    def prep_b(b):      # (1,C) -> (1,Cp) f32
        return jnp.pad(b, ((0, 0), (0, Cp - C))).astype(jnp.float32)

    w1p, w2p = prep_w(w1), prep_w(w2)
    b1p, b2p = prep_b(b1), prep_b(b2)

    def kernel(x_ref, w1_ref, b1_ref, w2_ref, b2_ref, o_ref,
               hp_ref, xcat_ref, acc_ref):
        # x_ref   : (1, Hp, Wp, Cp)   bf16  padded image (revisited over h)
        # w*_ref  : (3, 3*Cp, Cp)     bf16  folded weights
        # b*_ref  : (1, Cp)           f32   folded biases
        # o_ref   : (1, TH, W, Cp)    f32   output row tile
        # hp_ref  : (TH+2, W+16, Cp)  bf16  relu(conv1) with column halo
        # xcat_ref: (TH+4, W, 3*Cp)   bf16  dx-concatenated im2col taps
        # acc_ref : (TH+2, W, Cp)     f32   conv accumulator
        f32, bf16 = jnp.float32, jnp.bfloat16
        h0 = pl.multiple_of(pl.program_id(1) * TH, TH)
        dn = (((2,), (0,)), ((), ()))

        # Zero hp's column-halo bands once per step (scratch is per-core).
        zband = jnp.zeros((TH + 2, 8, Cp), bf16)
        hp_ref[:, 0:8, :] = zband
        hp_ref[:, W + 8:W + 16, :] = zband

        def dots(rows, w_ref):
            # acc[0:rows] = sum_dy xcat[dy:rows+dy] @ w[dy]   (bf16 x bf16 ->
            # f32; accumulation into VMEM, contiguous chain for v7x MRB).
            acc_ref[0:rows, :, :] = lax.dot_general(
                xcat_ref[0:rows, :, :], w_ref[0], dimension_numbers=dn,
                preferred_element_type=f32)
            acc_ref[0:rows, :, :] += lax.dot_general(
                xcat_ref[1:rows + 1, :, :], w_ref[1], dimension_numbers=dn,
                preferred_element_type=f32)
            acc_ref[0:rows, :, :] += lax.dot_general(
                xcat_ref[2:rows + 2, :, :], w_ref[2], dimension_numbers=dn,
                preferred_element_type=f32)

        # ---- conv1: source = padded x rows [h0, h0+TH+4); TH+2 output rows
        #      (1-row halo each side so conv2 stays exact).
        rp1 = TH + 4
        xcat_ref[0:rp1, :, 0:Cp] = x_ref[0, pl.ds(h0, rp1), 7:7 + W, :]
        xcat_ref[0:rp1, :, Cp:2 * Cp] = x_ref[0, pl.ds(h0, rp1), 8:8 + W, :]
        xcat_ref[0:rp1, :, 2 * Cp:3 * Cp] = x_ref[0, pl.ds(h0, rp1), 9:9 + W, :]
        dots(TH + 2, w1_ref)

        # Fused bias+ReLU epilogue, CR-row chunks -> hp interior (bf16).
        bias1 = b1_ref[0]

        def epi1(c, carry):
            r = pl.multiple_of(c * CR, CR)
            a = acc_ref[pl.ds(r, CR), :, :] + bias1
            hp_ref[pl.ds(r, CR), 8:8 + W, :] = jnp.maximum(a, 0.0).astype(bf16)
            return carry

        lax.fori_loop(0, (TH + 2) // CR, epi1, 0, unroll=True)

        # conv2's SAME padding zero-pads relu(conv1), not its out-of-image
        # extension: zero the hp halo rows on the image-boundary tiles.
        zrow = jnp.zeros((1, W, Cp), bf16)

        @pl.when(h0 == 0)
        def _():
            hp_ref[0:1, 8:8 + W, :] = zrow

        @pl.when(h0 + TH == H)
        def _():
            hp_ref[TH + 1:TH + 2, 8:8 + W, :] = zrow

        # ---- conv2: source = hp rows [0, TH+2); TH output rows.
        rp2 = TH + 2
        xcat_ref[0:rp2, :, 0:Cp] = hp_ref[0:rp2, 7:7 + W, :]
        xcat_ref[0:rp2, :, Cp:2 * Cp] = hp_ref[0:rp2, 8:8 + W, :]
        xcat_ref[0:rp2, :, 2 * Cp:3 * Cp] = hp_ref[0:rp2, 9:9 + W, :]
        dots(TH, w2_ref)

        # Fused bias + residual + ReLU epilogue, CR-row chunks -> output f32.
        bias2 = b2_ref[0]

        def epi2(c, carry):
            r = pl.multiple_of(c * CR, CR)
            a = acc_ref[pl.ds(r, CR), :, :] + bias2
            res = x_ref[0, pl.ds(h0 + 2 + r, CR), 8:8 + W, :].astype(f32)
            o_ref[0, pl.ds(r, CR), :, :] = jnp.maximum(a + res, 0.0).astype(
                o_ref.dtype)
            return carry

        lax.fori_loop(0, TH // CR, epi2, 0, unroll=True)

    # VMEM budget (pipelined blocks double-buffered, scratch single-buffered).
    in_block = Hp * Wp * Cp * 2
    w_block = 3 * (3 * Cp) * Cp * 2
    out_block = TH * W * Cp * 4
    scratch_bytes = ((TH + 2) * (W + 16) * Cp * 2
                     + (TH + 4) * W * (3 * Cp) * 2
                     + (TH + 2) * W * Cp * 4)
    need = 2 * in_block + 4 * w_block + 2 * out_block + scratch_bytes + (2 << 20)
    vmem_limit = int(min(max(32 << 20, 2 * need), 48 << 20))

    cost = pl.CostEstimate(
        flops=int(4 * N * H * W * 9 * Cp * Cp),
        transcendentals=0,
        bytes_accessed=int(x.size * 2 + N * H * W * Cp * 4
                           + 2 * 3 * 3 * Cp * Cp * 2))

    out = pl.pallas_call(
        kernel,
        out_shape=jax.ShapeDtypeStruct((N, H, W, Cp), jnp.float32),
        grid_spec=pltpu.PrefetchScalarGridSpec(
            num_scalar_prefetch=0,
            grid=(N, NH),
            in_specs=[
                pl.BlockSpec((1, Hp, Wp, Cp), lambda n, h: (n, 0, 0, 0)),
                pl.BlockSpec((3, 3 * Cp, Cp), lambda n, h: (0, 0, 0)),
                pl.BlockSpec((1, Cp), lambda n, h: (0, 0)),
                pl.BlockSpec((3, 3 * Cp, Cp), lambda n, h: (0, 0, 0)),
                pl.BlockSpec((1, Cp), lambda n, h: (0, 0)),
            ],
            out_specs=pl.BlockSpec((1, TH, W, Cp), lambda n, h: (n, h, 0, 0)),
            scratch_shapes=[
                pltpu.VMEM((TH + 2, W + 16, Cp), jnp.bfloat16),   # hp
                pltpu.VMEM((TH + 4, W, 3 * Cp), jnp.bfloat16),    # xcat
                pltpu.VMEM((TH + 2, W, Cp), jnp.float32),         # acc
            ],
        ),
        compiler_params=pltpu.CompilerParams(
            dimension_semantics=("parallel", "parallel"),
            vmem_limit_bytes=vmem_limit),
        cost_estimate=cost,
    )(x, w1p, b1p, w2p, b2p)

    # TODO(synk): in a full network keep activations NHWC / Cp channels across
    # consecutive blocks so this slice+transpose (and the pad above) happens
    # once per network, not once per block.
    return jnp.transpose(out[..., :C], (0, 3, 1, 2))      # -> NCHW f32


# ---------------- parameter construction (deterministic, in-script) -----------

def make_raw_params(key, C):
    k = jax.random.split(key, 12)

    def conv(kw, kb):
        w = 0.1 * jax.random.normal(kw, (3, 3, C, C), jnp.float32)
        b = 0.1 * jax.random.normal(kb, (C,), jnp.float32)
        return w, b

    def bn(kg, kb, km, kv):
        gamma = 1.0 + 0.1 * jax.random.normal(kg, (C,), jnp.float32)
        beta = 0.1 * jax.random.normal(kb, (C,), jnp.float32)
        mean = 0.1 * jax.random.normal(km, (C,), jnp.float32)
        var = jnp.abs(jax.random.normal(kv, (C,), jnp.float32)) + 0.5
        return gamma, beta, mean, var

    c1 = conv(k[0], k[1]); bn1 = bn(k[2], k[3], k[4], k[5])
    c2 = conv(k[6], k[7]); bn2 = bn(k[8], k[9], k[10], k[11])
    return (c1, bn1), (c2, bn2)


def fold_bn(conv_wb, bn_params, eps=1e-5):
    (w, cb), (gamma, beta, mean, var) = conv_wb, bn_params
    scale = gamma / jnp.sqrt(var + eps)                    # (Cout,)
    w_f = w * scale[None, None, None, :]
    b_f = (cb - mean) * scale + beta
    return w_f, b_f.reshape(1, -1)


def reference(x_nchw, raw_params, eps=1e-5):
    (c1, bn1), (c2, bn2) = raw_params
    x = jnp.transpose(x_nchw, (0, 2, 3, 1))

    def conv_bn(h, conv_wb, bn_params):
        w, cb = conv_wb
        y = lax.conv_general_dilated(
            h, w, window_strides=(1, 1), padding="SAME",
            dimension_numbers=("NHWC", "HWIO", "NHWC")) + cb
        gamma, beta, mean, var = bn_params
        return (y - mean) / jnp.sqrt(var + eps) * gamma + beta

    h = jax.nn.relu(conv_bn(x, c1, bn1))
    h = conv_bn(h, c2, bn2)
    out = jax.nn.relu(h + x)
    return jnp.transpose(out, (0, 3, 1, 2))


if __name__ == "__main__":
    key = jax.random.PRNGKey(0)
    kx, kp = jax.random.split(key)

    N, C, H, W = 2, 4, 16, 16                              # small NCHW input
    x = jax.random.normal(kx, (N, C, H, W), jnp.float32)

    raw_params = make_raw_params(kp, C)
    (c1, bn1), (c2, bn2) = raw_params
    w1, b1 = fold_bn(c1, bn1)
    w2, b2 = fold_bn(c2, bn2)

    out = residual_block_pallas(x, w1, b1, w2, b2)
    out = jax.block_until_ready(out)

    ref = jax.block_until_ready(reference(x, raw_params))
    assert out.shape == (N, C, H, W)
    # bf16 MXU operands (f32 accumulation) -> tolerance loosened vs the
    # original pure-f32 1e-4 check.
    err = float(jnp.max(jnp.abs(out - ref)))
    assert jnp.allclose(out, ref, atol=5e-2, rtol=5e-2), err

    print("KERNEL_OK")
</pallas_src>

<mosaic_0001>
module attributes {stable_mosaic.version = 11 : i64} {
  func.func @kernel(%arg0: i32, %arg1: i32, %arg2: memref<1x20x32x128xbf16, #tpu.memory_space<vmem>>, %arg3: memref<3x384x128xbf16, #tpu.memory_space<vmem>>, %arg4: memref<1x128xf32, #tpu.memory_space<vmem>>, %arg5: memref<3x384x128xbf16, #tpu.memory_space<vmem>>, %arg6: memref<1x128xf32, #tpu.memory_space<vmem>>, %arg7: memref<1x16x16x128xf32, #tpu.memory_space<vmem>>, %arg8: memref<18x32x128xbf16, #tpu.memory_space<vmem>>, %arg9: memref<20x16x384xbf16, #tpu.memory_space<vmem>>, %arg10: memref<18x16x128xf32, #tpu.memory_space<vmem>>) attributes {dimension_semantics = [#tpu.dimension_semantics<parallel>, #tpu.dimension_semantics<parallel>], iteration_bounds = array<i64: 2, 1>, scalar_prefetch = 0 : i64, scratch_operands = 3 : i64, tpu.core_type = #tpu.core_type<tc>, window_params = [{transform_indices = @transform_0, window_bounds = array<i64: 1, 20, 32, 128>}, {pipeline_mode = #tpu.pipeline_mode<synchronous>, transform_indices = @transform_1, window_bounds = array<i64: 3, 384, 128>}, {pipeline_mode = #tpu.pipeline_mode<synchronous>, transform_indices = @transform_2, window_bounds = array<i64: 1, 128>}, {pipeline_mode = #tpu.pipeline_mode<synchronous>, transform_indices = @transform_3, window_bounds = array<i64: 3, 384, 128>}, {pipeline_mode = #tpu.pipeline_mode<synchronous>, transform_indices = @transform_4, window_bounds = array<i64: 1, 128>}, {transform_indices = @transform_5, window_bounds = array<i64: 1, 16, 16, 128>}]} {
    %c16_i32 = arith.constant 16 : i32
    %0 = arith.muli %arg1, %c16_i32 : i32
    %1 = tpu.assume_multiple %0, 16 : i32
    %cst = arith.constant 0.000000e+00 : bf16
    %2 = vector.broadcast %cst : bf16 to vector<18x8x128xbf16>
    %c0 = arith.constant 0 : index
    %c0_0 = arith.constant 0 : index
    %c0_1 = arith.constant 0 : index
    %3 = vector.load %arg8[%c0, %c0_0, %c0_1] : memref<18x32x128xbf16, #tpu.memory_space<vmem>>, vector<18x8x128xbf16>
    tpu.vector_store %arg8[%c0, %c0_0, %c0_1], %2 {strides = array<i32>} : memref<18x32x128xbf16, #tpu.memory_space<vmem>>, vector<18x8x128xbf16>,
    %c0_2 = arith.constant 0 : index
    %c24 = arith.constant 24 : index
    %c0_3 = arith.constant 0 : index
    %4 = vector.load %arg8[%c0_2, %c24, %c0_3] : memref<18x32x128xbf16, #tpu.memory_space<vmem>>, vector<18x8x128xbf16>
    tpu.vector_store %arg8[%c0_2, %c24, %c0_3], %2 {strides = array<i32>} : memref<18x32x128xbf16, #tpu.memory_space<vmem>>, vector<18x8x128xbf16>,
    %c0_4 = arith.constant 0 : index
    %5 = arith.index_cast %1 : i32 to index
    %c7 = arith.constant 7 : index
    %c0_5 = arith.constant 0 : index
    %6 = vector.load %arg2[%c0_4, %5, %c7, %c0_5] : memref<1x20x32x128xbf16, #tpu.memory_space<vmem>>, vector<1x20x16x128xbf16>
    %7 = vector.shape_cast %6 : vector<1x20x16x128xbf16> to vector<20x16x128xbf16>
    %c0_6 = arith.constant 0 : index
    %c0_7 = arith.constant 0 : index
    %c0_8 = arith.constant 0 : index
    %8 = vector.load %arg9[%c0_6, %c0_7, %c0_8] : memref<20x16x384xbf16, #tpu.memory_space<vmem>>, vector<20x16x128xbf16>
    tpu.vector_store %arg9[%c0_6, %c0_7, %c0_8], %7 {strides = array<i32>} : memref<20x16x384xbf16, #tpu.memory_space<vmem>>, vector<20x16x128xbf16>,
    %c0_9 = arith.constant 0 : index
    %9 = arith.index_cast %1 : i32 to index
    %c8 = arith.constant 8 : index
    %c0_10 = arith.constant 0 : index
    %10 = vector.load %arg2[%c0_9, %9, %c8, %c0_10] : memref<1x20x32x128xbf16, #tpu.memory_space<vmem>>, vector<1x20x16x128xbf16>
    %11 = vector.shape_cast %10 : vector<1x20x16x128xbf16> to vector<20x16x128xbf16>
    %c0_11 = arith.constant 0 : index
    %c0_12 = arith.constant 0 : index
    %c128 = arith.constant 128 : index
    %12 = vector.load %arg9[%c0_11, %c0_12, %c128] : memref<20x16x384xbf16, #tpu.memory_space<vmem>>, vector<20x16x128xbf16>
    tpu.vector_store %arg9[%c0_11, %c0_12, %c128], %11 {strides = array<i32>} : memref<20x16x384xbf16, #tpu.memory_space<vmem>>, vector<20x16x128xbf16>,
    %c0_13 = arith.constant 0 : index
    %13 = arith.index_cast %1 : i32 to index
    %c9 = arith.constant 9 : index
    %c0_14 = arith.constant 0 : index
    %14 = vector.load %arg2[%c0_13, %13, %c9, %c0_14] : memref<1x20x32x128xbf16, #tpu.memory_space<vmem>>, vector<1x20x16x128xbf16>
    %15 = vector.shape_cast %14 : vector<1x20x16x128xbf16> to vector<20x16x128xbf16>
    %c0_15 = arith.constant 0 : index
    %c0_16 = arith.constant 0 : index
    %c256 = arith.constant 256 : index
    %16 = vector.load %arg9[%c0_15, %c0_16, %c256] : memref<20x16x384xbf16, #tpu.memory_space<vmem>>, vector<20x16x128xbf16>
    tpu.vector_store %arg9[%c0_15, %c0_16, %c256], %15 {strides = array<i32>} : memref<20x16x384xbf16, #tpu.memory_space<vmem>>, vector<20x16x128xbf16>,
    %c0_17 = arith.constant 0 : index
    %c0_18 = arith.constant 0 : index
    %c0_19 = arith.constant 0 : index
    %17 = vector.load %arg9[%c0_17, %c0_18, %c0_19] : memref<20x16x384xbf16, #tpu.memory_space<vmem>>, vector<18x16x384xbf16>
    %c0_20 = arith.constant 0 : index
    %c0_21 = arith.constant 0 : index
    %c0_22 = arith.constant 0 : index
    %18 = vector.load %arg3[%c0_20, %c0_21, %c0_22] : memref<3x384x128xbf16, #tpu.memory_space<vmem>>, vector<1x384x128xbf16>
    %19 = vector.shape_cast %18 : vector<1x384x128xbf16> to vector<384x128xbf16>
    %cst_23 = arith.constant dense<0.000000e+00> : vector<18x16x128xf32>
    %20 = tpu.matmul %17, %19, %cst_23 {dimension_numbers = #tpu.dot_dimension_numbers<[2], [0], [0, 1], [1], [0, 0, 0, 1, 1, 1], [], []>} : vector<18x16x384xbf16>, vector<384x128xbf16>, vector<18x16x128xf32> -> vector<18x16x128xf32>
    %c0_24 = arith.constant 0 : index
    %c0_25 = arith.constant 0 : index
    %c0_26 = arith.constant 0 : index
    %21 = vector.load %arg10[%c0_24, %c0_25, %c0_26] : memref<18x16x128xf32, #tpu.memory_space<vmem>>, vector<18x16x128xf32>
    tpu.vector_store %arg10[%c0_24, %c0_25, %c0_26], %20 {strides = array<i32>} : memref<18x16x128xf32, #tpu.memory_space<vmem>>, vector<18x16x128xf32>,
    %c0_27 = arith.constant 0 : index
    %c0_28 = arith.constant 0 : index
    %c0_29 = arith.constant 0 : index
    %22 = vector.load %arg10[%c0_27, %c0_28, %c0_29] : memref<18x16x128xf32, #tpu.memory_space<vmem>>, vector<18x16x128xf32>
    %c1 = arith.constant 1 : index
    %c0_30 = arith.constant 0 : index
    %c0_31 = arith.constant 0 : index
    %23 = vector.load %arg9[%c1, %c0_30, %c0_31] : memref<20x16x384xbf16, #tpu.memory_space<vmem>>, vector<18x16x384xbf16>
    %c1_32 = arith.constant 1 : index
    %c0_33 = arith.constant 0 : index
    %c0_34 = arith.constant 0 : index
    %24 = vector.load %arg3[%c1_32, %c0_33, %c0_34] : memref<3x384x128xbf16, #tpu.memory_space<vmem>>, vector<1x384x128xbf16>
    %25 = vector.shape_cast %24 : vector<1x384x128xbf16> to vector<384x128xbf16>
    %cst_35 = arith.constant dense<0.000000e+00> : vector<18x16x128xf32>
    %26 = tpu.matmul %23, %25, %cst_35 {dimension_numbers = #tpu.dot_dimension_numbers<[2], [0], [0, 1], [1], [0, 0, 0, 1, 1, 1], [], []>} : vector<18x16x384xbf16>, vector<384x128xbf16>, vector<18x16x128xf32> -> vector<18x16x128xf32>
    %27 = arith.addf %22, %26 : vector<18x16x128xf32>
    %c0_36 = arith.constant 0 : index
    %c0_37 = arith.constant 0 : index
    %c0_38 = arith.constant 0 : index
    %28 = vector.load %arg10[%c0_36, %c0_37, %c0_38] : memref<18x16x128xf32, #tpu.memory_space<vmem>>, vector<18x16x128xf32>
    tpu.vector_store %arg10[%c0_36, %c0_37, %c0_38], %27 {strides = array<i32>} : memref<18x16x128xf32, #tpu.memory_space<vmem>>, vector<18x16x128xf32>,
    %c0_39 = arith.constant 0 : index
    %c0_40 = arith.constant 0 : index
    %c0_41 = arith.constant 0 : index
    %29 = vector.load %arg10[%c0_39, %c0_40, %c0_41] : memref<18x16x128xf32, #tpu.memory_space<vmem>>, vector<18x16x128xf32>
    %c2 = arith.constant 2 : index
    %c0_42 = arith.constant 0 : index
    %c0_43 = arith.constant 0 : index
    %30 = vector.load %arg9[%c2, %c0_42, %c0_43] : memref<20x16x384xbf16, #tpu.memory_space<vmem>>, vector<18x16x384xbf16>
    %c2_44 = arith.constant 2 : index
    %c0_45 = arith.constant 0 : index
    %c0_46 = arith.constant 0 : index
    %31 = vector.load %arg3[%c2_44, %c0_45, %c0_46] : memref<3x384x128xbf16, #tpu.memory_space<vmem>>, vector<1x384x128xbf16>
    %32 = vector.shape_cast %31 : vector<1x384x128xbf16> to vector<384x128xbf16>
    %cst_47 = arith.constant dense<0.000000e+00> : vector<18x16x128xf32>
    %33 = tpu.matmul %30, %32, %cst_47 {dimension_numbers = #tpu.dot_dimension_numbers<[2], [0], [0, 1], [1], [0, 0, 0, 1, 1, 1], [], []>} : vector<18x16x384xbf16>, vector<384x128xbf16>, vector<18x16x128xf32> -> vector<18x16x128xf32>
    %34 = arith.addf %29, %33 : vector<18x16x128xf32>
    %c0_48 = arith.constant 0 : index
    %c0_49 = arith.constant 0 : index
    %c0_50 = arith.constant 0 : index
    %35 = vector.load %arg10[%c0_48, %c0_49, %c0_50] : memref<18x16x128xf32, #tpu.memory_space<vmem>>, vector<18x16x128xf32>
    tpu.vector_store %arg10[%c0_48, %c0_49, %c0_50], %34 {strides = array<i32>} : memref<18x16x128xf32, #tpu.memory_space<vmem>>, vector<18x16x128xf32>,
    %c0_51 = arith.constant 0 : index
    %c0_52 = arith.constant 0 : index
    %36 = vector.load %arg4[%c0_51, %c0_52] : memref<1x128xf32, #tpu.memory_space<vmem>>, vector<1x128xf32>
    %37 = vector.shape_cast %36 : vector<1x128xf32> to vector<128xf32>
    %c0_i32 = arith.constant 0 : i32
    %c2_i32 = arith.constant 2 : i32
    %38 = arith.muli %c0_i32, %c2_i32 : i32
    %39 = tpu.assume_multiple %38, 2 : i32
    %40 = arith.index_cast %39 : i32 to index
    %c0_53 = arith.constant 0 : index
    %c0_54 = arith.constant 0 : index
    %41 = vector.load %arg10[%40, %c0_53, %c0_54] : memref<18x16x128xf32, #tpu.memory_space<vmem>>, vector<2x16x128xf32>
    %42 = vector.shape_cast %37 : vector<128xf32> to vector<1x1x128xf32>
    %43 = vector.broadcast %42 : vector<1x1x128xf32> to vector<2x16x128xf32>
    %44 = arith.addf %41, %43 : vector<2x16x128xf32>
    %cst_55 = arith.constant 0.000000e+00 : f32
    %45 = vector.broadcast %cst_55 : f32 to vector<2x16x128xf32>
    %46 = arith.maximumf %44, %45 : vector<2x16x128xf32>
    %47 = arith.truncf %46 : vector<2x16x128xf32> to vector<2x16x128xbf16>
    %48 = arith.index_cast %39 : i32 to index
    %c8_56 = arith.constant 8 : index
    %c0_57 = arith.constant 0 : index
    %49 = vector.load %arg8[%48, %c8_56, %c0_57] : memref<18x32x128xbf16, #tpu.memory_space<vmem>>, vector<2x16x128xbf16>
    tpu.vector_store %arg8[%48, %c8_56, %c0_57], %47 {strides = array<i32>} : memref<18x32x128xbf16, #tpu.memory_space<vmem>>, vector<2x16x128xbf16>,
    %c1_i32 = arith.constant 1 : i32
    %c2_i32_58 = arith.constant 2 : i32
    %50 = arith.muli %c1_i32, %c2_i32_58 : i32
    %51 = tpu.assume_multiple %50, 2 : i32
    %52 = arith.index_cast %51 : i32 to index
    %c0_59 = arith.constant 0 : index
    %c0_60 = arith.constant 0 : index
    %53 = vector.load %arg10[%52, %c0_59, %c0_60] : memref<18x16x128xf32, #tpu.memory_space<vmem>>, vector<2x16x128xf32>
    %54 = vector.shape_cast %37 : vector<128xf32> to vector<1x1x128xf32>
    %55 = vector.broadcast %54 : vector<1x1x128xf32> to vector<2x16x128xf32>
    %56 = arith.addf %53, %55 : vector<2x16x128xf32>
    %cst_61 = arith.constant 0.000000e+00 : f32
    %57 = vector.broadcast %cst_61 : f32 to vector<2x16x128xf32>
    %58 = arith.maximumf %56, %57 : vector<2x16x128xf32>
    %59 = arith.truncf %58 : vector<2x16x128xf32> to vector<2x16x128xbf16>
    %60 = arith.index_cast %51 : i32 to index
    %c8_62 = arith.constant 8 : index
    %c0_63 = arith.constant 0 : index
    %61 = vector.load %arg8[%60, %c8_62, %c0_63] : memref<18x32x128xbf16, #tpu.memory_space<vmem>>, vector<2x16x128xbf16>
    tpu.vector_store %arg8[%60, %c8_62, %c0_63], %59 {strides = array<i32>} : memref<18x32x128xbf16, #tpu.memory_space<vmem>>, vector<2x16x128xbf16>,
    %c2_i32_64 = arith.constant 2 : i32
    %c2_i32_65 = arith.constant 2 : i32
    %62 = arith.muli %c2_i32_64, %c2_i32_65 : i32
    %63 = tpu.assume_multiple %62, 2 : i32
    %64 = arith.index_cast %63 : i32 to index
    %c0_66 = arith.constant 0 : index
    %c0_67 = arith.constant 0 : index
    %65 = vector.load %arg10[%64, %c0_66, %c0_67] : memref<18x16x128xf32, #tpu.memory_space<vmem>>, vector<2x16x128xf32>
    %66 = vector.shape_cast %37 : vector<128xf32> to vector<1x1x128xf32>
    %67 = vector.broadcast %66 : vector<1x1x128xf32> to vector<2x16x128xf32>
    %68 = arith.addf %65, %67 : vector<2x16x128xf32>
    %cst_68 = arith.constant 0.000000e+00 : f32
    %69 = vector.broadcast %cst_68 : f32 to vector<2x16x128xf32>
    %70 = arith.maximumf %68, %69 : vector<2x16x128xf32>
    %71 = arith.truncf %70 : vector<2x16x128xf32> to vector<2x16x128xbf16>
    %72 = arith.index_cast %63 : i32 to index
    %c8_69 = arith.constant 8 : index
    %c0_70 = arith.constant 0 : index
    %73 = vector.load %arg8[%72, %c8_69, %c0_70] : memref<18x32x128xbf16, #tpu.memory_space<vmem>>, vector<2x16x128xbf16>
    tpu.vector_store %arg8[%72, %c8_69, %c0_70], %71 {strides = array<i32>} : memref<18x32x128xbf16, #tpu.memory_space<vmem>>, vector<2x16x128xbf16>,
    %c3_i32 = arith.constant 3 : i32
    %c2_i32_71 = arith.constant 2 : i32
    %74 = arith.muli %c3_i32, %c2_i32_71 : i32
    %75 = tpu.assume_multiple %74, 2 : i32
    %76 = arith.index_cast %75 : i32 to index
    %c0_72 = arith.constant 0 : index
    %c0_73 = arith.constant 0 : index
    %77 = vector.load %arg10[%76, %c0_72, %c0_73] : memref<18x16x128xf32, #tpu.memory_space<vmem>>, vector<2x16x128xf32>
    %78 = vector.shape_cast %37 : vector<128xf32> to vector<1x1x128xf32>
    %79 = vector.broadcast %78 : vector<1x1x128xf32> to vector<2x16x128xf32>
    %80 = arith.addf %77, %79 : vector<2x16x128xf32>
    %cst_74 = arith.constant 0.000000e+00 : f32
    %81 = vector.broadcast %cst_74 : f32 to vector<2x16x128xf32>
    %82 = arith.maximumf %80, %81 : vector<2x16x128xf32>
    %83 = arith.truncf %82 : vector<2x16x128xf32> to vector<2x16x128xbf16>
    %84 = arith.index_cast %75 : i32 to index
    %c8_75 = arith.constant 8 : index
    %c0_76 = arith.constant 0 : index
    %85 = vector.load %arg8[%84, %c8_75, %c0_76] : memref<18x32x128xbf16, #tpu.memory_space<vmem>>, vector<2x16x128xbf16>
    tpu.vector_store %arg8[%84, %c8_75, %c0_76], %83 {strides = array<i32>} : memref<18x32x128xbf16, #tpu.memory_space<vmem>>, vector<2x16x128xbf16>,
    %c4_i32 = arith.constant 4 : i32
    %c2_i32_77 = arith.constant 2 : i32
    %86 = arith.muli %c4_i32, %c2_i32_77 : i32
    %87 = tpu.assume_multiple %86, 2 : i32
    %88 = arith.index_cast %87 : i32 to index
    %c0_78 = arith.constant 0 : index
    %c0_79 = arith.constant 0 : index
    %89 = vector.load %arg10[%88, %c0_78, %c0_79] : memref<18x16x128xf32, #tpu.memory_space<vmem>>, vector<2x16x128xf32>
    %90 = vector.shape_cast %37 : vector<128xf32> to vector<1x1x128xf32>
    %91 = vector.broadcast %90 : vector<1x1x128xf32> to vector<2x16x128xf32>
    %92 = arith.addf %89, %91 : vector<2x16x128xf32>
    %cst_80 = arith.constant 0.000000e+00 : f32
    %93 = vector.broadcast %cst_80 : f32 to vector<2x16x128xf32>
    %94 = arith.maximumf %92, %93 : vector<2x16x128xf32>
    %95 = arith.truncf %94 : vector<2x16x128xf32> to vector<2x16x128xbf16>
    %96 = arith.index_cast %87 : i32 to index
    %c8_81 = arith.constant 8 : index
    %c0_82 = arith.constant 0 : index
    %97 = vector.load %arg8[%96, %c8_81, %c0_82] : memref<18x32x128xbf16, #tpu.memory_space<vmem>>, vector<2x16x128xbf16>
    tpu.vector_store %arg8[%96, %c8_81, %c0_82], %95 {strides = array<i32>} : memref<18x32x128xbf16, #tpu.memory_space<vmem>>, vector<2x16x128xbf16>,
    %c5_i32 = arith.constant 5 : i32
    %c2_i32_83 = arith.constant 2 : i32
    %98 = arith.muli %c5_i32, %c2_i32_83 : i32
    %99 = tpu.assume_multiple %98, 2 : i32
    %100 = arith.index_cast %99 : i32 to index
    %c0_84 = arith.constant 0 : index
    %c0_85 = arith.constant 0 : index
    %101 = vector.load %arg10[%100, %c0_84, %c0_85] : memref<18x16x128xf32, #tpu.memory_space<vmem>>, vector<2x16x128xf32>
    %102 = vector.shape_cast %37 : vector<128xf32> to vector<1x1x128xf32>
    %103 = vector.broadcast %102 : vector<1x1x128xf32> to vector<2x16x128xf32>
    %104 = arith.addf %101, %103 : vector<2x16x128xf32>
    %cst_86 = arith.constant 0.000000e+00 : f32
    %105 = vector.broadcast %cst_86 : f32 to vector<2x16x128xf32>
    %106 = arith.maximumf %104, %105 : vector<2x16x128xf32>
    %107 = arith.truncf %106 : vector<2x16x128xf32> to vector<2x16x128xbf16>
    %108 = arith.index_cast %99 : i32 to index
    %c8_87 = arith.constant 8 : index
    %c0_88 = arith.constant 0 : index
    %109 = vector.load %arg8[%108, %c8_87, %c0_88] : memref<18x32x128xbf16, #tpu.memory_space<vmem>>, vector<2x16x128xbf16>
    tpu.vector_store %arg8[%108, %c8_87, %c0_88], %107 {strides = array<i32>} : memref<18x32x128xbf16, #tpu.memory_space<vmem>>, vector<2x16x128xbf16>,
    %c6_i32 = arith.constant 6 : i32
    %c2_i32_89 = arith.constant 2 : i32
    %110 = arith.muli %c6_i32, %c2_i32_89 : i32
    %111 = tpu.assume_multiple %110, 2 : i32
    %112 = arith.index_cast %111 : i32 to index
    %c0_90 = arith.constant 0 : index
    %c0_91 = arith.constant 0 : index
    %113 = vector.load %arg10[%112, %c0_90, %c0_91] : memref<18x16x128xf32, #tpu.memory_space<vmem>>, vector<2x16x128xf32>
    %114 = vector.shape_cast %37 : vector<128xf32> to vector<1x1x128xf32>
    %115 = vector.broadcast %114 : vector<1x1x128xf32> to vector<2x16x128xf32>
    %116 = arith.addf %113, %115 : vector<2x16x128xf32>
    %cst_92 = arith.constant 0.000000e+00 : f32
    %117 = vector.broadcast %cst_92 : f32 to vector<2x16x128xf32>
    %118 = arith.maximumf %116, %117 : vector<2x16x128xf32>
    %119 = arith.truncf %118 : vector<2x16x128xf32> to vector<2x16x128xbf16>
    %120 = arith.index_cast %111 : i32 to index
    %c8_93 = arith.constant 8 : index
    %c0_94 = arith.constant 0 : index
    %121 = vector.load %arg8[%120, %c8_93, %c0_94] : memref<18x32x128xbf16, #tpu.memory_space<vmem>>, vector<2x16x128xbf16>
    tpu.vector_store %arg8[%120, %c8_93, %c0_94], %119 {strides = array<i32>} : memref<18x32x128xbf16, #tpu.memory_space<vmem>>, vector<2x16x128xbf16>,
    %c7_i32 = arith.constant 7 : i32
    %c2_i32_95 = arith.constant 2 : i32
    %122 = arith.muli %c7_i32, %c2_i32_95 : i32
    %123 = tpu.assume_multiple %122, 2 : i32
    %124 = arith.index_cast %123 : i32 to index
    %c0_96 = arith.constant 0 : index
    %c0_97 = arith.constant 0 : index
    %125 = vector.load %arg10[%124, %c0_96, %c0_97] : memref<18x16x128xf32, #tpu.memory_space<vmem>>, vector<2x16x128xf32>
    %126 = vector.shape_cast %37 : vector<128xf32> to vector<1x1x128xf32>
    %127 = vector.broadcast %126 : vector<1x1x128xf32> to vector<2x16x128xf32>
    %128 = arith.addf %125, %127 : vector<2x16x128xf32>
    %cst_98 = arith.constant 0.000000e+00 : f32
    %129 = vector.broadcast %cst_98 : f32 to vector<2x16x128xf32>
    %130 = arith.maximumf %128, %129 : vector<2x16x128xf32>
    %131 = arith.truncf %130 : vector<2x16x128xf32> to vector<2x16x128xbf16>
    %132 = arith.index_cast %123 : i32 to index
    %c8_99 = arith.constant 8 : index
    %c0_100 = arith.constant 0 : index
    %133 = vector.load %arg8[%132, %c8_99, %c0_100] : memref<18x32x128xbf16, #tpu.memory_space<vmem>>, vector<2x16x128xbf16>
    tpu.vector_store %arg8[%132, %c8_99, %c0_100], %131 {strides = array<i32>} : memref<18x32x128xbf16, #tpu.memory_space<vmem>>, vector<2x16x128xbf16>,
    %c8_i32 = arith.constant 8 : i32
    %c2_i32_101 = arith.constant 2 : i32
    %134 = arith.muli %c8_i32, %c2_i32_101 : i32
    %135 = tpu.assume_multiple %134, 2 : i32
    %136 = arith.index_cast %135 : i32 to index
    %c0_102 = arith.constant 0 : index
    %c0_103 = arith.constant 0 : index
    %137 = vector.load %arg10[%136, %c0_102, %c0_103] : memref<18x16x128xf32, #tpu.memory_space<vmem>>, vector<2x16x128xf32>
    %138 = vector.shape_cast %37 : vector<128xf32> to vector<1x1x128xf32>
    %139 = vector.broadcast %138 : vector<1x1x128xf32> to vector<2x16x128xf32>
    %140 = arith.addf %137, %139 : vector<2x16x128xf32>
    %cst_104 = arith.constant 0.000000e+00 : f32
    %141 = vector.broadcast %cst_104 : f32 to vector<2x16x128xf32>
    %142 = arith.maximumf %140, %141 : vector<2x16x128xf32>
    %143 = arith.truncf %142 : vector<2x16x128xf32> to vector<2x16x128xbf16>
    %144 = arith.index_cast %135 : i32 to index
    %c8_105 = arith.constant 8 : index
    %c0_106 = arith.constant 0 : index
    %145 = vector.load %arg8[%144, %c8_105, %c0_106] : memref<18x32x128xbf16, #tpu.memory_space<vmem>>, vector<2x16x128xbf16>
    tpu.vector_store %arg8[%144, %c8_105, %c0_106], %143 {strides = array<i32>} : memref<18x32x128xbf16, #tpu.memory_space<vmem>>, vector<2x16x128xbf16>,
    %c9_i32 = arith.constant 9 : i32
    %cst_107 = arith.constant 0.000000e+00 : bf16
    %146 = vector.broadcast %cst_107 : bf16 to vector<1x16x128xbf16>
    %c0_i32_108 = arith.constant 0 : i32
    %147 = arith.cmpi eq, %1, %c0_i32_108 : i32
    %148 = arith.extui %147 : i1 to i32
    %c0_i32_109 = arith.constant 0 : i32
    %149 = arith.cmpi ne, %148, %c0_i32_109 : i32
    scf.if %149 {
      %c0_266 = arith.constant 0 : index
      %c8_267 = arith.constant 8 : index
      %c0_268 = arith.constant 0 : index
      %341 = vector.load %arg8[%c0_266, %c8_267, %c0_268] : memref<18x32x128xbf16, #tpu.memory_space<vmem>>, vector<1x16x128xbf16>
      tpu.vector_store %arg8[%c0_266, %c8_267, %c0_268], %146 {strides = array<i32>} : memref<18x32x128xbf16, #tpu.memory_space<vmem>>, vector<1x16x128xbf16>,
    } else {
    }
    %c16_i32_110 = arith.constant 16 : i32
    %150 = arith.addi %1, %c16_i32_110 : i32
    %c16_i32_111 = arith.constant 16 : i32
    %151 = arith.cmpi eq, %150, %c16_i32_111 : i32
    %152 = arith.extui %151 : i1 to i32
    %c0_i32_112 = arith.constant 0 : i32
    %153 = arith.cmpi ne, %152, %c0_i32_112 : i32
    scf.if %153 {
      %c17 = arith.constant 17 : index
      %c8_266 = arith.constant 8 : index
      %c0_267 = arith.constant 0 : index
      %341 = vector.load %arg8[%c17, %c8_266, %c0_267] : memref<18x32x128xbf16, #tpu.memory_space<vmem>>, vector<1x16x128xbf16>
      tpu.vector_store %arg8[%c17, %c8_266, %c0_267], %146 {strides = array<i32>} : memref<18x32x128xbf16, #tpu.memory_space<vmem>>, vector<1x16x128xbf16>,
    } else {
    }
    %c0_113 = arith.constant 0 : index
    %c7_114 = arith.constant 7 : index
    %c0_115 = arith.constant 0 : index
    %154 = vector.load %arg8[%c0_113, %c7_114, %c0_115] : memref<18x32x128xbf16, #tpu.memory_space<vmem>>, vector<18x16x128xbf16>
    %c0_116 = arith.constant 0 : index
    %c0_117 = arith.constant 0 : index
    %c0_118 = arith.constant 0 : index
    %155 = vector.load %arg9[%c0_116, %c0_117, %c0_118] : memref<20x16x384xbf16, #tpu.memory_space<vmem>>, vector<18x16x128xbf16>
    tpu.vector_store %arg9[%c0_116, %c0_117, %c0_118], %154 {strides = array<i32>} : memref<20x16x384xbf16, #tpu.memory_space<vmem>>, vector<18x16x128xbf16>,
    %c0_119 = arith.constant 0 : index
    %c8_120 = arith.constant 8 : index
    %c0_121 = arith.constant 0 : index
    %156 = vector.load %arg8[%c0_119, %c8_120, %c0_121] : memref<18x32x128xbf16, #tpu.memory_space<vmem>>, vector<18x16x128xbf16>
    %c0_122 = arith.constant 0 : index
    %c0_123 = arith.constant 0 : index
    %c128_124 = arith.constant 128 : index
    %157 = vector.load %arg9[%c0_122, %c0_123, %c128_124] : memref<20x16x384xbf16, #tpu.memory_space<vmem>>, vector<18x16x128xbf16>
    tpu.vector_store %arg9[%c0_122, %c0_123, %c128_124], %156 {strides = array<i32>} : memref<20x16x384xbf16, #tpu.memory_space<vmem>>, vector<18x16x128xbf16>,
    %c0_125 = arith.constant 0 : index
    %c9_126 = arith.constant 9 : index
    %c0_127 = arith.constant 0 : index
    %158 = vector.load %arg8[%c0_125, %c9_126, %c0_127] : memref<18x32x128xbf16, #tpu.memory_space<vmem>>, vector<18x16x128xbf16>
    %c0_128 = arith.constant 0 : index
    %c0_129 = arith.constant 0 : index
    %c256_130 = arith.constant 256 : index
    %159 = vector.load %arg9[%c0_128, %c0_129, %c256_130] : memref<20x16x384xbf16, #tpu.memory_space<vmem>>, vector<18x16x128xbf16>
    tpu.vector_store %arg9[%c0_128, %c0_129, %c256_130], %158 {strides = array<i32>} : memref<20x16x384xbf16, #tpu.memory_space<vmem>>, vector<18x16x128xbf16>,
    %c0_131 = arith.constant 0 : index
    %c0_132 = arith.constant 0 : index
    %c0_133 = arith.constant 0 : index
    %160 = vector.load %arg9[%c0_131, %c0_132, %c0_133] : memref<20x16x384xbf16, #tpu.memory_space<vmem>>, vector<16x16x384xbf16>
    %c0_134 = arith.constant 0 : index
    %c0_135 = arith.constant 0 : index
    %c0_136 = arith.constant 0 : index
    %161 = vector.load %arg5[%c0_134, %c0_135, %c0_136] : memref<3x384x128xbf16, #tpu.memory_space<vmem>>, vector<1x384x128xbf16>
    %162 = vector.shape_cast %161 : vector<1x384x128xbf16> to vector<384x128xbf16>
    %cst_137 = arith.constant dense<0.000000e+00> : vector<16x16x128xf32>
    %163 = tpu.matmul %160, %162, %cst_137 {dimension_numbers = #tpu.dot_dimension_numbers<[2], [0], [0, 1], [1], [0, 0, 0, 1, 1, 1], [], []>} : vector<16x16x384xbf16>, vector<384x128xbf16>, vector<16x16x128xf32> -> vector<16x16x128xf32>
    %c0_138 = arith.constant 0 : index
    %c0_139 = arith.constant 0 : index
    %c0_140 = arith.constant 0 : index
    %164 = vector.load %arg10[%c0_138, %c0_139, %c0_140] : memref<18x16x128xf32, #tpu.memory_space<vmem>>, vector<16x16x128xf32>
    tpu.vector_store %arg10[%c0_138, %c0_139, %c0_140], %163 {strides = array<i32>} : memref<18x16x128xf32, #tpu.memory_space<vmem>>, vector<16x16x128xf32>,
    %c0_141 = arith.constant 0 : index
    %c0_142 = arith.constant 0 : index
    %c0_143 = arith.constant 0 : index
    %165 = vector.load %arg10[%c0_141, %c0_142, %c0_143] : memref<18x16x128xf32, #tpu.memory_space<vmem>>, vector<16x16x128xf32>
    %c1_144 = arith.constant 1 : index
    %c0_145 = arith.constant 0 : index
    %c0_146 = arith.constant 0 : index
    %166 = vector.load %arg9[%c1_144, %c0_145, %c0_146] : memref<20x16x384xbf16, #tpu.memory_space<vmem>>, vector<16x16x384xbf16>
    %c1_147 = arith.constant 1 : index
    %c0_148 = arith.constant 0 : index
    %c0_149 = arith.constant 0 : index
    %167 = vector.load %arg5[%c1_147, %c0_148, %c0_149] : memref<3x384x128xbf16, #tpu.memory_space<vmem>>, vector<1x384x128xbf16>
    %168 = vector.shape_cast %167 : vector<1x384x128xbf16> to vector<384x128xbf16>
    %cst_150 = arith.constant dense<0.000000e+00> : vector<16x16x128xf32>
    %169 = tpu.matmul %166, %168, %cst_150 {dimension_numbers = #tpu.dot_dimension_numbers<[2], [0], [0, 1], [1], [0, 0, 0, 1, 1, 1], [], []>} : vector<16x16x384xbf16>, vector<384x128xbf16>, vector<16x16x128xf32> -> vector<16x16x128xf32>
    %170 = arith.addf %165, %169 : vector<16x16x128xf32>
    %c0_151 = arith.constant 0 : index
    %c0_152 = arith.constant 0 : index
    %c0_153 = arith.constant 0 : index
    %171 = vector.load %arg10[%c0_151, %c0_152, %c0_153] : memref<18x16x128xf32, #tpu.memory_space<vmem>>, vector<16x16x128xf32>
    tpu.vector_store %arg10[%c0_151, %c0_152, %c0_153], %170 {strides = array<i32>} : memref<18x16x128xf32, #tpu.memory_space<vmem>>, vector<16x16x128xf32>,
    %c0_154 = arith.constant 0 : index
    %c0_155 = arith.constant 0 : index
    %c0_156 = arith.constant 0 : index
    %172 = vector.load %arg10[%c0_154, %c0_155, %c0_156] : memref<18x16x128xf32, #tpu.memory_space<vmem>>, vector<16x16x128xf32>
    %c2_157 = arith.constant 2 : index
    %c0_158 = arith.constant 0 : index
    %c0_159 = arith.constant 0 : index
    %173 = vector.load %arg9[%c2_157, %c0_158, %c0_159] : memref<20x16x384xbf16, #tpu.memory_space<vmem>>, vector<16x16x384xbf16>
    %c2_160 = arith.constant 2 : index
    %c0_161 = arith.constant 0 : index
    %c0_162 = arith.constant 0 : index
    %174 = vector.load %arg5[%c2_160, %c0_161, %c0_162] : memref<3x384x128xbf16, #tpu.memory_space<vmem>>, vector<1x384x128xbf16>
    %175 = vector.shape_cast %174 : vector<1x384x128xbf16> to vector<384x128xbf16>
    %cst_163 = arith.constant dense<0.000000e+00> : vector<16x16x128xf32>
    %176 = tpu.matmul %173, %175, %cst_163 {dimension_numbers = #tpu.dot_dimension_numbers<[2], [0], [0, 1], [1], [0, 0, 0, 1, 1, 1], [], []>} : vector<16x16x384xbf16>, vector<384x128xbf16>, vector<16x16x128xf32> -> vector<16x16x128xf32>
    %177 = arith.addf %172, %176 : vector<16x16x128xf32>
    %c0_164 = arith.constant 0 : index
    %c0_165 = arith.constant 0 : index
    %c0_166 = arith.constant 0 : index
    %178 = vector.load %arg10[%c0_164, %c0_165, %c0_166] : memref<18x16x128xf32, #tpu.memory_space<vmem>>, vector<16x16x128xf32>
    tpu.vector_store %arg10[%c0_164, %c0_165, %c0_166], %177 {strides = array<i32>} : memref<18x16x128xf32, #tpu.memory_space<vmem>>, vector<16x16x128xf32>,
    %c0_167 = arith.constant 0 : index
    %c0_168 = arith.constant 0 : index
    %179 = vector.load %arg6[%c0_167, %c0_168] : memref<1x128xf32, #tpu.memory_space<vmem>>, vector<1x128xf32>
    %180 = vector.shape_cast %179 : vector<1x128xf32> to vector<128xf32>
    %c0_i32_169 = arith.constant 0 : i32
    %c2_i32_170 = arith.constant 2 : i32
    %181 = arith.muli %c0_i32_169, %c2_i32_170 : i32
    %182 = tpu.assume_multiple %181, 2 : i32
    %183 = arith.index_cast %182 : i32 to index
    %c0_171 = arith.constant 0 : index
    %c0_172 = arith.constant 0 : index
    %184 = vector.load %arg10[%183, %c0_171, %c0_172] : memref<18x16x128xf32, #tpu.memory_space<vmem>>, vector<2x16x128xf32>
    %185 = vector.shape_cast %180 : vector<128xf32> to vector<1x1x128xf32>
    %186 = vector.broadcast %185 : vector<1x1x128xf32> to vector<2x16x128xf32>
    %187 = arith.addf %184, %186 : vector<2x16x128xf32>
    %c2_i32_173 = arith.constant 2 : i32
    %188 = arith.addi %1, %c2_i32_173 : i32
    %189 = arith.addi %188, %182 : i32
    %c0_174 = arith.constant 0 : index
    %190 = arith.index_cast %189 : i32 to index
    %c8_175 = arith.constant 8 : index
    %c0_176 = arith.constant 0 : index
    %191 = vector.load %arg2[%c0_174, %190, %c8_175, %c0_176] : memref<1x20x32x128xbf16, #tpu.memory_space<vmem>>, vector<1x2x16x128xbf16>
    %192 = vector.shape_cast %191 : vector<1x2x16x128xbf16> to vector<2x16x128xbf16>
    %193 = arith.extf %192 : vector<2x16x128xbf16> to vector<2x16x128xf32>
    %194 = arith.addf %187, %193 : vector<2x16x128xf32>
    %cst_177 = arith.constant 0.000000e+00 : f32
    %195 = vector.broadcast %cst_177 : f32 to vector<2x16x128xf32>
    %196 = arith.maximumf %194, %195 : vector<2x16x128xf32>
    %c0_178 = arith.constant 0 : index
    %197 = arith.index_cast %182 : i32 to index
    %c0_179 = arith.constant 0 : index
    %c0_180 = arith.constant 0 : index
    %198 = vector.load %arg7[%c0_178, %197, %c0_179, %c0_180] : memref<1x16x16x128xf32, #tpu.memory_space<vmem>>, vector<1x2x16x128xf32>
    %199 = vector.shape_cast %198 : vector<1x2x16x128xf32> to vector<2x16x128xf32>
    %200 = vector.shape_cast %196 : vector<2x16x128xf32> to vector<1x2x16x128xf32>
    tpu.vector_store %arg7[%c0_178, %197, %c0_179, %c0_180], %200 {strides = array<i32>} : memref<1x16x16x128xf32, #tpu.memory_space<vmem>>, vector<1x2x16x128xf32>,
    %c1_i32_181 = arith.constant 1 : i32
    %c2_i32_182 = arith.constant 2 : i32
    %201 = arith.muli %c1_i32_181, %c2_i32_182 : i32
    %202 = tpu.assume_multiple %201, 2 : i32
    %203 = arith.index_cast %202 : i32 to index
    %c0_183 = arith.constant 0 : index
    %c0_184 = arith.constant 0 : index
    %204 = vector.load %arg10[%203, %c0_183, %c0_184] : memref<18x16x128xf32, #tpu.memory_space<vmem>>, vector<2x16x128xf32>
    %205 = vector.shape_cast %180 : vector<128xf32> to vector<1x1x128xf32>
    %206 = vector.broadcast %205 : vector<1x1x128xf32> to vector<2x16x128xf32>
    %207 = arith.addf %204, %206 : vector<2x16x128xf32>
    %c2_i32_185 = arith.constant 2 : i32
    %208 = arith.addi %1, %c2_i32_185 : i32
    %209 = arith.addi %208, %202 : i32
    %c0_186 = arith.constant 0 : index
    %210 = arith.index_cast %209 : i32 to index
    %c8_187 = arith.constant 8 : index
    %c0_188 = arith.constant 0 : index
    %211 = vector.load %arg2[%c0_186, %210, %c8_187, %c0_188] : memref<1x20x32x128xbf16, #tpu.memory_space<vmem>>, vector<1x2x16x128xbf16>
    %212 = vector.shape_cast %211 : vector<1x2x16x128xbf16> to vector<2x16x128xbf16>
    %213 = arith.extf %212 : vector<2x16x128xbf16> to vector<2x16x128xf32>
    %214 = arith.addf %207, %213 : vector<2x16x128xf32>
    %cst_189 = arith.constant 0.000000e+00 : f32
    %215 = vector.broadcast %cst_189 : f32 to vector<2x16x128xf32>
    %216 = arith.maximumf %214, %215 : vector<2x16x128xf32>
    %c0_190 = arith.constant 0 : index
    %217 = arith.index_cast %202 : i32 to index
    %c0_191 = arith.constant 0 : index
    %c0_192 = arith.constant 0 : index
    %218 = vector.load %arg7[%c0_190, %217, %c0_191, %c0_192] : memref<1x16x16x128xf32, #tpu.memory_space<vmem>>, vector<1x2x16x128xf32>
    %219 = vector.shape_cast %218 : vector<1x2x16x128xf32> to vector<2x16x128xf32>
    %220 = vector.shape_cast %216 : vector<2x16x128xf32> to vector<1x2x16x128xf32>
    tpu.vector_store %arg7[%c0_190, %217, %c0_191, %c0_192], %220 {strides = array<i32>} : memref<1x16x16x128xf32, #tpu.memory_space<vmem>>, vector<1x2x16x128xf32>,
    %c2_i32_193 = arith.constant 2 : i32
    %c2_i32_194 = arith.constant 2 : i32
    %221 = arith.muli %c2_i32_193, %c2_i32_194 : i32
    %222 = tpu.assume_multiple %221, 2 : i32
    %223 = arith.index_cast %222 : i32 to index
    %c0_195 = arith.constant 0 : index
    %c0_196 = arith.constant 0 : index
    %224 = vector.load %arg10[%223, %c0_195, %c0_196] : memref<18x16x128xf32, #tpu.memory_space<vmem>>, vector<2x16x128xf32>
    %225 = vector.shape_cast %180 : vector<128xf32> to vector<1x1x128xf32>
    %226 = vector.broadcast %225 : vector<1x1x128xf32> to vector<2x16x128xf32>
    %227 = arith.addf %224, %226 : vector<2x16x128xf32>
    %c2_i32_197 = arith.constant 2 : i32
    %228 = arith.addi %1, %c2_i32_197 : i32
    %229 = arith.addi %228, %222 : i32
    %c0_198 = arith.constant 0 : index
    %230 = arith.index_cast %229 : i32 to index
    %c8_199 = arith.constant 8 : index
    %c0_200 = arith.constant 0 : index
    %231 = vector.load %arg2[%c0_198, %230, %c8_199, %c0_200] : memref<1x20x32x128xbf16, #tpu.memory_space<vmem>>, vector<1x2x16x128xbf16>
    %232 = vector.shape_cast %231 : vector<1x2x16x128xbf16> to vector<2x16x128xbf16>
    %233 = arith.extf %232 : vector<2x16x128xbf16> to vector<2x16x128xf32>
    %234 = arith.addf %227, %233 : vector<2x16x128xf32>
    %cst_201 = arith.constant 0.000000e+00 : f32
    %235 = vector.broadcast %cst_201 : f32 to vector<2x16x128xf32>
    %236 = arith.maximumf %234, %235 : vector<2x16x128xf32>
    %c0_202 = arith.constant 0 : index
    %237 = arith.index_cast %222 : i32 to index
    %c0_203 = arith.constant 0 : index
    %c0_204 = arith.constant 0 : index
    %238 = vector.load %arg7[%c0_202, %237, %c0_203, %c0_204] : memref<1x16x16x128xf32, #tpu.memory_space<vmem>>, vector<1x2x16x128xf32>
    %239 = vector.shape_cast %238 : vector<1x2x16x128xf32> to vector<2x16x128xf32>
    %240 = vector.shape_cast %236 : vector<2x16x128xf32> to vector<1x2x16x128xf32>
    tpu.vector_store %arg7[%c0_202, %237, %c0_203, %c0_204], %240 {strides = array<i32>} : memref<1x16x16x128xf32, #tpu.memory_space<vmem>>, vector<1x2x16x128xf32>,
    %c3_i32_205 = arith.constant 3 : i32
    %c2_i32_206 = arith.constant 2 : i32
    %241 = arith.muli %c3_i32_205, %c2_i32_206 : i32
    %242 = tpu.assume_multiple %241, 2 : i32
    %243 = arith.index_cast %242 : i32 to index
    %c0_207 = arith.constant 0 : index
    %c0_208 = arith.constant 0 : index
    %244 = vector.load %arg10[%243, %c0_207, %c0_208] : memref<18x16x128xf32, #tpu.memory_space<vmem>>, vector<2x16x128xf32>
    %245 = vector.shape_cast %180 : vector<128xf32> to vector<1x1x128xf32>
    %246 = vector.broadcast %245 : vector<1x1x128xf32> to vector<2x16x128xf32>
    %247 = arith.addf %244, %246 : vector<2x16x128xf32>
    %c2_i32_209 = arith.constant 2 : i32
    %248 = arith.addi %1, %c2_i32_209 : i32
    %249 = arith.addi %248, %242 : i32
    %c0_210 = arith.constant 0 : index
    %250 = arith.index_cast %249 : i32 to index
    %c8_211 = arith.constant 8 : index
    %c0_212 = arith.constant 0 : index
    %251 = vector.load %arg2[%c0_210, %250, %c8_211, %c0_212] : memref<1x20x32x128xbf16, #tpu.memory_space<vmem>>, vector<1x2x16x128xbf16>
    %252 = vector.shape_cast %251 : vector<1x2x16x128xbf16> to vector<2x16x128xbf16>
    %253 = arith.extf %252 : vector<2x16x128xbf16> to vector<2x16x128xf32>
    %254 = arith.addf %247, %253 : vector<2x16x128xf32>
    %cst_213 = arith.constant 0.000000e+00 : f32
    %255 = vector.broadcast %cst_213 : f32 to vector<2x16x128xf32>
    %256 = arith.maximumf %254, %255 : vector<2x16x128xf32>
    %c0_214 = arith.constant 0 : index
    %257 = arith.index_cast %242 : i32 to index
    %c0_215 = arith.constant 0 : index
    %c0_216 = arith.constant 0 : index
    %258 = vector.load %arg7[%c0_214, %257, %c0_215, %c0_216] : memref<1x16x16x128xf32, #tpu.memory_space<vmem>>, vector<1x2x16x128xf32>
    %259 = vector.shape_cast %258 : vector<1x2x16x128xf32> to vector<2x16x128xf32>
    %260 = vector.shape_cast %256 : vector<2x16x128xf32> to vector<1x2x16x128xf32>
    tpu.vector_store %arg7[%c0_214, %257, %c0_215, %c0_216], %260 {strides = array<i32>} : memref<1x16x16x128xf32, #tpu.memory_space<vmem>>, vector<1x2x16x128xf32>,
    %c4_i32_217 = arith.constant 4 : i32
    %c2_i32_218 = arith.constant 2 : i32
    %261 = arith.muli %c4_i32_217, %c2_i32_218 : i32
    %262 = tpu.assume_multiple %261, 2 : i32
    %263 = arith.index_cast %262 : i32 to index
    %c0_219 = arith.constant 0 : index
    %c0_220 = arith.constant 0 : index
    %264 = vector.load %arg10[%263, %c0_219, %c0_220] : memref<18x16x128xf32, #tpu.memory_space<vmem>>, vector<2x16x128xf32>
    %265 = vector.shape_cast %180 : vector<128xf32> to vector<1x1x128xf32>
    %266 = vector.broadcast %265 : vector<1x1x128xf32> to vector<2x16x128xf32>
    %267 = arith.addf %264, %266 : vector<2x16x128xf32>
    %c2_i32_221 = arith.constant 2 : i32
    %268 = arith.addi %1, %c2_i32_221 : i32
    %269 = arith.addi %268, %262 : i32
    %c0_222 = arith.constant 0 : index
    %270 = arith.index_cast %269 : i32 to index
    %c8_223 = arith.constant 8 : index
    %c0_224 = arith.constant 0 : index
    %271 = vector.load %arg2[%c0_222, %270, %c8_223, %c0_224] : memref<1x20x32x128xbf16, #tpu.memory_space<vmem>>, vector<1x2x16x128xbf16>
    %272 = vector.shape_cast %271 : vector<1x2x16x128xbf16> to vector<2x16x128xbf16>
    %273 = arith.extf %272 : vector<2x16x128xbf16> to vector<2x16x128xf32>
    %274 = arith.addf %267, %273 : vector<2x16x128xf32>
    %cst_225 = arith.constant 0.000000e+00 : f32
    %275 = vector.broadcast %cst_225 : f32 to vector<2x16x128xf32>
    %276 = arith.maximumf %274, %275 : vector<2x16x128xf32>
    %c0_226 = arith.constant 0 : index
    %277 = arith.index_cast %262 : i32 to index
    %c0_227 = arith.constant 0 : index
    %c0_228 = arith.constant 0 : index
    %278 = vector.load %arg7[%c0_226, %277, %c0_227, %c0_228] : memref<1x16x16x128xf32, #tpu.memory_space<vmem>>, vector<1x2x16x128xf32>
    %279 = vector.shape_cast %278 : vector<1x2x16x128xf32> to vector<2x16x128xf32>
    %280 = vector.shape_cast %276 : vector<2x16x128xf32> to vector<1x2x16x128xf32>
    tpu.vector_store %arg7[%c0_226, %277, %c0_227, %c0_228], %280 {strides = array<i32>} : memref<1x16x16x128xf32, #tpu.memory_space<vmem>>, vector<1x2x16x128xf32>,
    %c5_i32_229 = arith.constant 5 : i32
    %c2_i32_230 = arith.constant 2 : i32
    %281 = arith.muli %c5_i32_229, %c2_i32_230 : i32
    %282 = tpu.assume_multiple %281, 2 : i32
    %283 = arith.index_cast %282 : i32 to index
    %c0_231 = arith.constant 0 : index
    %c0_232 = arith.constant 0 : index
    %284 = vector.load %arg10[%283, %c0_231, %c0_232] : memref<18x16x128xf32, #tpu.memory_space<vmem>>, vector<2x16x128xf32>
    %285 = vector.shape_cast %180 : vector<128xf32> to vector<1x1x128xf32>
    %286 = vector.broadcast %285 : vector<1x1x128xf32> to vector<2x16x128xf32>
    %287 = arith.addf %284, %286 : vector<2x16x128xf32>
    %c2_i32_233 = arith.constant 2 : i32
    %288 = arith.addi %1, %c2_i32_233 : i32
    %289 = arith.addi %288, %282 : i32
    %c0_234 = arith.constant 0 : index
    %290 = arith.index_cast %289 : i32 to index
    %c8_235 = arith.constant 8 : index
    %c0_236 = arith.constant 0 : index
    %291 = vector.load %arg2[%c0_234, %290, %c8_235, %c0_236] : memref<1x20x32x128xbf16, #tpu.memory_space<vmem>>, vector<1x2x16x128xbf16>
    %292 = vector.shape_cast %291 : vector<1x2x16x128xbf16> to vector<2x16x128xbf16>
    %293 = arith.extf %292 : vector<2x16x128xbf16> to vector<2x16x128xf32>
    %294 = arith.addf %287, %293 : vector<2x16x128xf32>
    %cst_237 = arith.constant 0.000000e+00 : f32
    %295 = vector.broadcast %cst_237 : f32 to vector<2x16x128xf32>
    %296 = arith.maximumf %294, %295 : vector<2x16x128xf32>
    %c0_238 = arith.constant 0 : index
    %297 = arith.index_cast %282 : i32 to index
    %c0_239 = arith.constant 0 : index
    %c0_240 = arith.constant 0 : index
    %298 = vector.load %arg7[%c0_238, %297, %c0_239, %c0_240] : memref<1x16x16x128xf32, #tpu.memory_space<vmem>>, vector<1x2x16x128xf32>
    %299 = vector.shape_cast %298 : vector<1x2x16x128xf32> to vector<2x16x128xf32>
    %300 = vector.shape_cast %296 : vector<2x16x128xf32> to vector<1x2x16x128xf32>
    tpu.vector_store %arg7[%c0_238, %297, %c0_239, %c0_240], %300 {strides = array<i32>} : memref<1x16x16x128xf32, #tpu.memory_space<vmem>>, vector<1x2x16x128xf32>,
    %c6_i32_241 = arith.constant 6 : i32
    %c2_i32_242 = arith.constant 2 : i32
    %301 = arith.muli %c6_i32_241, %c2_i32_242 : i32
    %302 = tpu.assume_multiple %301, 2 : i32
    %303 = arith.index_cast %302 : i32 to index
    %c0_243 = arith.constant 0 : index
    %c0_244 = arith.constant 0 : index
    %304 = vector.load %arg10[%303, %c0_243, %c0_244] : memref<18x16x128xf32, #tpu.memory_space<vmem>>, vector<2x16x128xf32>
    %305 = vector.shape_cast %180 : vector<128xf32> to vector<1x1x128xf32>
    %306 = vector.broadcast %305 : vector<1x1x128xf32> to vector<2x16x128xf32>
    %307 = arith.addf %304, %306 : vector<2x16x128xf32>
    %c2_i32_245 = arith.constant 2 : i32
    %308 = arith.addi %1, %c2_i32_245 : i32
    %309 = arith.addi %308, %302 : i32
    %c0_246 = arith.constant 0 : index
    %310 = arith.index_cast %309 : i32 to index
    %c8_247 = arith.constant 8 : index
    %c0_248 = arith.constant 0 : index
    %311 = vector.load %arg2[%c0_246, %310, %c8_247, %c0_248] : memref<1x20x32x128xbf16, #tpu.memory_space<vmem>>, vector<1x2x16x128xbf16>
    %312 = vector.shape_cast %311 : vector<1x2x16x128xbf16> to vector<2x16x128xbf16>
    %313 = arith.extf %312 : vector<2x16x128xbf16> to vector<2x16x128xf32>
    %314 = arith.addf %307, %313 : vector<2x16x128xf32>
    %cst_249 = arith.constant 0.000000e+00 : f32
    %315 = vector.broadcast %cst_249 : f32 to vector<2x16x128xf32>
    %316 = arith.maximumf %314, %315 : vector<2x16x128xf32>
    %c0_250 = arith.constant 0 : index
    %317 = arith.index_cast %302 : i32 to index
    %c0_251 = arith.constant 0 : index
    %c0_252 = arith.constant 0 : index
    %318 = vector.load %arg7[%c0_250, %317, %c0_251, %c0_252] : memref<1x16x16x128xf32, #tpu.memory_space<vmem>>, vector<1x2x16x128xf32>
    %319 = vector.shape_cast %318 : vector<1x2x16x128xf32> to vector<2x16x128xf32>
    %320 = vector.shape_cast %316 : vector<2x16x128xf32> to vector<1x2x16x128xf32>
    tpu.vector_store %arg7[%c0_250, %317, %c0_251, %c0_252], %320 {strides = array<i32>} : memref<1x16x16x128xf32, #tpu.memory_space<vmem>>, vector<1x2x16x128xf32>,
    %c7_i32_253 = arith.constant 7 : i32
    %c2_i32_254 = arith.constant 2 : i32
    %321 = arith.muli %c7_i32_253, %c2_i32_254 : i32
    %322 = tpu.assume_multiple %321, 2 : i32
    %323 = arith.index_cast %322 : i32 to index
    %c0_255 = arith.constant 0 : index
    %c0_256 = arith.constant 0 : index
    %324 = vector.load %arg10[%323, %c0_255, %c0_256] : memref<18x16x128xf32, #tpu.memory_space<vmem>>, vector<2x16x128xf32>
    %325 = vector.shape_cast %180 : vector<128xf32> to vector<1x1x128xf32>
    %326 = vector.broadcast %325 : vector<1x1x128xf32> to vector<2x16x128xf32>
    %327 = arith.addf %324, %326 : vector<2x16x128xf32>
    %c2_i32_257 = arith.constant 2 : i32
    %328 = arith.addi %1, %c2_i32_257 : i32
    %329 = arith.addi %328, %322 : i32
    %c0_258 = arith.constant 0 : index
    %330 = arith.index_cast %329 : i32 to index
    %c8_259 = arith.constant 8 : index
    %c0_260 = arith.constant 0 : index
    %331 = vector.load %arg2[%c0_258, %330, %c8_259, %c0_260] : memref<1x20x32x128xbf16, #tpu.memory_space<vmem>>, vector<1x2x16x128xbf16>
    %332 = vector.shape_cast %331 : vector<1x2x16x128xbf16> to vector<2x16x128xbf16>
    %333 = arith.extf %332 : vector<2x16x128xbf16> to vector<2x16x128xf32>
    %334 = arith.addf %327, %333 : vector<2x16x128xf32>
    %cst_261 = arith.constant 0.000000e+00 : f32
    %335 = vector.broadcast %cst_261 : f32 to vector<2x16x128xf32>
    %336 = arith.maximumf %334, %335 : vector<2x16x128xf32>
    %c0_262 = arith.constant 0 : index
    %337 = arith.index_cast %322 : i32 to index
    %c0_263 = arith.constant 0 : index
    %c0_264 = arith.constant 0 : index
    %338 = vector.load %arg7[%c0_262, %337, %c0_263, %c0_264] : memref<1x16x16x128xf32, #tpu.memory_space<vmem>>, vector<1x2x16x128xf32>
    %339 = vector.shape_cast %338 : vector<1x2x16x128xf32> to vector<2x16x128xf32>
    %340 = vector.shape_cast %336 : vector<2x16x128xf32> to vector<1x2x16x128xf32>
    tpu.vector_store %arg7[%c0_262, %337, %c0_263, %c0_264], %340 {strides = array<i32>} : memref<1x16x16x128xf32, #tpu.memory_space<vmem>>, vector<1x2x16x128xf32>,
    %c8_i32_265 = arith.constant 8 : i32
    return
  }
  func.func @transform_0(%arg0: i32, %arg1: i32) -> (i32, i32, i32, i32) {
    %c0_i32 = arith.constant 0 : i32
    %c0_i32_0 = arith.constant 0 : i32
    %c0_i32_1 = arith.constant 0 : i32
    %c0_i32_2 = arith.constant 0 : i32
    return %arg0, %c0_i32, %c0_i32_0, %c0_i32_1 : i32, i32, i32, i32
  }
  func.func @transform_1(%arg0: i32, %arg1: i32) -> (i32, i32, i32) {
    %c0_i32 = arith.constant 0 : i32
    %c0_i32_0 = arith.constant 0 : i32
    %c0_i32_1 = arith.constant 0 : i32
    %c0_i32_2 = arith.constant 0 : i32
    return %c0_i32, %c0_i32_0, %c0_i32_1 : i32, i32, i32
  }
  func.func @transform_2(%arg0: i32, %arg1: i32) -> (i32, i32) {
    %c0_i32 = arith.constant 0 : i32
    %c0_i32_0 = arith.constant 0 : i32
    %c0_i32_1 = arith.constant 0 : i32
    return %c0_i32, %c0_i32_0 : i32, i32
  }
  func.func @transform_3(%arg0: i32, %arg1: i32) -> (i32, i32, i32) {
    %c0_i32 = arith.constant 0 : i32
    %c0_i32_0 = arith.constant 0 : i32
    %c0_i32_1 = arith.constant 0 : i32
    %c0_i32_2 = arith.constant 0 : i32
    return %c0_i32, %c0_i32_0, %c0_i32_1 : i32, i32, i32
  }
  func.func @transform_4(%arg0: i32, %arg1: i32) -> (i32, i32) {
    %c0_i32 = arith.constant 0 : i32
    %c0_i32_0 = arith.constant 0 : i32
    %c0_i32_1 = arith.constant 0 : i32
    return %c0_i32, %c0_i32_0 : i32, i32
  }
  func.func @transform_5(%arg0: i32, %arg1: i32) -> (i32, i32, i32, i32) {
    %c0_i32 = arith.constant 0 : i32
    %c0_i32_0 = arith.constant 0 : i32
    %c0_i32_1 = arith.constant 0 : i32
    return %arg0, %arg1, %c0_i32, %c0_i32_0 : i32, i32, i32, i32
  }
}

</mosaic_0001>

<bundles_post_ra>
// kernel: tpu_custom_call.1
= control target key start
LH: loop header
LB: loop body
LE: loop exit
PB: predicated region body
PF: predicated region fallthrough
CT: control target
= control target key end

     0   :  { %10 = vsyncpa [#allocation6], 0  ;;  %s11218_s0 = inlined_call_operand.hbm [shape: bf16[2,20,32,128], index: 0, kind: input, shape index: {}]   ;;  %s11219_s1 = inlined_call_operand.hbm [shape: bf16[3,384,128], index: 1, kind: input, shape index: {}]   ;;  %s11220_s2 = inlined_call_operand.vmem [shape: f32[1,128], index: 2, kind: input, shape index: {}]   ;;  %s11221_s3 = inlined_call_operand.hbm [shape: bf16[3,384,128], index: 3, kind: input, shape index: {}]   ;;  %s11222_s4 = inlined_call_operand.vmem [shape: f32[1,128], index: 4, kind: input, shape index: {}]   ;;  %s11223_s5 = inlined_call_operand.hbm [shape: f32[2,16,16,128], index: 5, kind: output, shape index: {}]  }
   0x1   :  { %12 = vsyncpa [#allocation6 + $0x1], 0 }
   0x2   :  { %13 = vsyncpa [#allocation9], 0 }
   0x3   :  { %14 = vsyncpa [#allocation7], 0 }
   0x4   :  { %16 = vsyncpa [#allocation7 + $0x1], 0  ;;  %s9092_s18 = smov 0   ;;  %s9094_s19 = smov 0  }
   0x5   :  { %s9096_s20 = smov 0   ;;  %s9098_s21 = smov 0  }
   0x6   :  { %s9100_s22 = smov 0   ;;  %s9102_s23 = smov 0  }
   0x7 LB: > { %s7229_s24 = sadd.s32 4294967295, %s9051_s23   ;;  %s7230_s25 = sadd.s32 4294967294, %s9051_s23   ;;  %s9051_s23 = sphi %s9102_s23, %s22_s23   ;;  %s9047_s22 = sphi %s9100_s22, %s11326_s22   ;;  %s9043_s21 = sphi %s9098_s21, %s11325_s21   ;;  %s9039_s20 = sphi %s9096_s20, %s11324_s20   ;;  %s9035_s19 = sphi %s9094_s19, %s11323_s19   ;;  %s9031_s18 = sphi %s9092_s18, %s11322_s18  }
   0x8   : > { %p54_p0 = scmp.ne.s32.totalorder %s9035_s19, %s9031_s18  ;;  %p9126_p1 = scmp.eq.s32.totalorder %s7229_s24, 0 }
   0x9   : > { %p9130_p2 = scmp.eq.s32.totalorder %s7229_s24, 1  ;;  %p170_p3 = scmp.eq.s32.totalorder %s7230_s25, 1 }
   0xa   : > { %s11232_s26 = scalar_select %p9126_p1, 1, 0 }
   0xb   : > { %p9136_p4 = por %p9126_p1, %p54_p0  ;;  %p7231_p5 = scmp.ge.s32.totalorder %s9051_s23, 1 }
   0xc   : > { %p9141_p6 = por %p170_p3, %p54_p0  ;;  %p177_p7 = scmp.lt.s32.totalorder %s9051_s23, 3 }
   0xd   : > { %s11234_s28 = scalar_select %p9136_p4, 1, 0 }
   0xe   : > { %s11235_s29 = scalar_select %p9141_p6, 1, 0 }
   0xf   : > { %p9146_p8 = pnand %p7231_p5, %p177_p7  ;;  %s9053_s6 = smov [#allocation8]  }
  0x10   : > { %s189_s7 = sshll.u32 %s9053_s6, 4  ;;  %s9054_s9 = smov [#allocation10]   ;;  %s9150_s7 = int_to_ptr.vmem [resolvable:$true] %s189_s7 }
  0x11   : > { %p8545_p9 = pneg %p9146_p8  ;;  %s205_s10 = sshll.u32 %s9054_s9, 4  ;;  %s9161_s10 = int_to_ptr.vmem [resolvable:$true] %s205_s10 }
  0x12   : > { %s8879_s13 = scalar_lea.hbm %s11219_s1, 9216 }
  0x13   : > { %p9157_p11 = pnand %p8545_p9, %p9126_p1  ;;  %p8880_p12 = scmp.ne.s32.totalorder %s11219_s1, %s8879_s13 }
  0x14   : > { %p8886_p5 = scmp.lt.u32.totalorder %s8879_s13, %s11219_s1 }
  0x15   : > { %p8881_p13 = pneg %p9157_p11 }
  0x17   : > { %p8882_p0 = pnand %p8881_p13, %p8880_p12 }
  0x19   : > { %p8883_p3 = pneg %p8882_p0 }
  0x1b   : > { %p8888_p7 = pnand %p8886_p5, %p8883_p3 }
  0x1d   : > { %8891 = shalt.err (!%p8888_p7)
}
  0x1e   : > { %s8892_s24 = scalar_lea.vmem %s9150_s7, 9216  ;;  %p8900_p1 = scmp.lt.s32.totalorder %s9150_s7, %s9150_s7 }
  0x1f   : > { %p8893_p9 = scmp.ne.s32.totalorder %s9150_s7, %s8892_s24  ;;  %p8901_p12 = scmp.lt.s32.totalorder %s8892_s24, %s8892_s24 }
  0x21   : > { %p8895_p10 = pnand %p8893_p9, %p8881_p13  ;;  %p8902_p0 = por %p8901_p12, %p8900_p1 }
  0x23   : > { %p8896_p6 = pneg %p8895_p10 }
  0x25   : > { %p8903_p4 = pnand %p8902_p0, %p8896_p6 }
  0x27   : > { %8906 = shalt.err (!%p8903_p4)
}
  0x28   : > { %s11227_s25 = smov 64   ;;  %s11228_s6 = smov 4  }
  0x29   : > { %8548 = dma.hbm_to_vmem [thread:$0]  (!%p9157_p11), %s11219_s1, 9216, %s9150_s7, [#allocation9], %s11227_s25, %s11227_s25, %s11228_s6  }
  0x2a   : > { %s8907_s14 = scalar_lea.hbm %s11221_s3, 9216 }
  0x2b   : > { %p8908_p1 = scmp.ne.s32.totalorder %s11221_s3, %s8907_s14  ;;  %p8914_p10 = scmp.lt.u32.totalorder %s8907_s14, %s11221_s3 }
  0x2d   : > { %p8910_p4 = pnand %p8908_p1, %p8881_p13 }
  0x2f   : > { %p8911_p6 = pneg %p8910_p4 }
  0x31   : > { %p8916_p3 = pnand %p8914_p10, %p8911_p6 }
  0x33   : > { %8919 = shalt.err (!%p8916_p3)
}
  0x34   : > { %s8920_s7 = scalar_lea.vmem %s9161_s10, 9216  ;;  %p8928_p12 = scmp.lt.s32.totalorder %s9161_s10, %s9161_s10 }
  0x35   : > { %p8921_p5 = scmp.ne.s32.totalorder %s9161_s10, %s8920_s7  ;;  %p8929_p0 = scmp.lt.s32.totalorder %s8920_s7, %s8920_s7 }
  0x37   : > { %p8923_p7 = pnand %p8921_p5, %p8881_p13  ;;  %p8930_p1 = por %p8929_p0, %p8928_p12 }
  0x39   : > { %p8924_p9 = pneg %p8923_p7 }
  0x3b   : > { %p8931_p4 = pnand %p8930_p1, %p8924_p9 }
  0x3d   : > { %8934 = shalt.err (!%p8931_p4)
}
  0x3e   : > { %8551 = dma.hbm_to_vmem [thread:$0]  (!%p9157_p11), %s11221_s3, 9216, %s9161_s10, [#allocation9], %s11227_s25, %s11227_s25, %s11228_s6  }
  0x3f   : > { %s34_s8 = sadd.s32 1, %s9047_s22  ;;  %s41_s12 = sadd.s32 1, %s9039_s20 }
  0x40   : > { %p36_p13 = scmp.ge.s32.totalorder %s34_s8, 2  ;;  %p48_p6 = scmp.ne.s32.totalorder %s9039_s20, %s9035_s19 }
  0x41   : > { %p49_p10 = scmp.eq.s32.totalorder %s9051_s23, 0  ;;  %p8562_p3 = scmp.lt.s32.totalorder %s9051_s23, 2 }
  0x42   : > { %s11328_s8 = smov (%p36_p13, %s34_s8), 0  ;;  %p9231_p7 = por %p9130_p2, %p48_p6 }
  0x43   : > { %p50_p5 = por %p49_p10, %p48_p6  ;;  %s38_s14 = ssub.s32 %s9047_s22, %s11328_s8 }
  0x44   : > { %s11238_s13 = scalar_select %p9231_p7, 1, 0 }
  0x45   : > { %s222_s15 = sand.u32 1, %s9039_s20   ;;  %p39_p9 = scmp.eq.s32.totalorder %s38_s14, 0 }
  0x46   : > { %s8530_s10 = smul.u32 320, %s222_s15  ;;  %p9238_p11 = pnand %p8562_p3, %p50_p5 }
  0x47   : > { %s9243_s17 = scalar_select %p39_p9, %s9039_s20, %s41_s12  }
  0x48   : > { %s8531_s24 = smul.u32 5120, %s9047_s22  ;;  %s226_s7 = scalar_lea.vmem [#allocation5], %s8530_s10 }
  0x49   : > { %s233_s9 = sshll.u32 %s226_s7, 4  ;;  %s9253_s14 = scalar_lea.sflag [#allocation6], %s222_s15  ;;  %s9251_s9 = int_to_ptr.vmem [resolvable:$true] %s233_s9 }
  0x4a   : > { %s9249_s25 = scalar_lea.hbm %s11218_s0, %s8531_s24  ;;  %p8937_p12 = pneg %p9238_p11 }
  0x4b   : > { %s8935_s6 = scalar_lea.hbm %s9249_s25, 5120  ;;  %s8940_s24 = scalar_lea.hbm %s11218_s0, 10240 }
  0x4c   : > { %p8936_p2 = scmp.ne.s32.totalorder %s9249_s25, %s8935_s6  ;;  %p8941_p4 = scmp.lt.u32.totalorder %s9249_s25, %s11218_s0 }
  0x4d   : > { %p8942_p13 = scmp.lt.u32.totalorder %s8940_s24, %s8935_s6  ;;  %p8944_p10 = scmp.lt.u32.totalorder %s8935_s6, %s9249_s25 }
  0x4e   : > { %p8938_p0 = pnand %p8937_p12, %p8936_p2 }
  0x4f   : > { %p8943_p6 = por %p8942_p13, %p8941_p4 }
  0x50   : > { %p8939_p1 = pneg %p8938_p0 }
  0x51   : > { %p8945_p3 = por %p8944_p10, %p8943_p6 }
  0x53   : > { %p8946_p5 = pnand %p8945_p3, %p8939_p1 }
  0x55   : > { %8949 = shalt.err (!%p8946_p5)
}
  0x56   : > { %s8950_s15 = scalar_lea.vmem %s9251_s9, 5120  ;;  %s9057_s11 = smov [#allocation5]  }
  0x57   : > { %p8951_p9 = scmp.ne.s32.totalorder %s9251_s9, %s8950_s15  ;;  %s8955_s12 = sshll.u32 %s9057_s11, 4  ;;  %s8956_s12 = int_to_ptr.vmem [resolvable:$false] %s8955_s12 }
  0x58   : > { %s8957_s10 = scalar_lea.vmem %s8956_s12, 10240  ;;  %p8958_p7 = scmp.lt.s32.totalorder %s9251_s9, %s8956_s12 }
  0x59   : > { %p8953_p2 = pnand %p8951_p9, %p8937_p12  ;;  %p8959_p4 = scmp.lt.s32.totalorder %s8957_s10, %s8950_s15 }
  0x5b   : > { %p8954_p0 = pneg %p8953_p2  ;;  %p8960_p13 = por %p8959_p4, %p8958_p7 }
  0x5d   : > { %p8961_p6 = pnand %p8960_p13, %p8954_p0 }
  0x5f   : > { %8964 = shalt.err (!%p8961_p6)
}
  0x60   : > { %s11240_s6 = smov 4   ;;  %s11241_s24 = smov 64  }
  0x61   : > { %8555 = dma.hbm_to_vmem [thread:$0]  (!%p9238_p11), %s9249_s25, 5120, %s9251_s9, %s9253_s14, %s11241_s24, %s11241_s24, %s11240_s6  }
  0x62   : > { %245 = sbr.rel (%p9146_p8) target bundleno = 1281 (0x501), region = 40 }
  0x69   : > { %s9287_s7 = sand.u32 1, %s9035_s19   ;;  %p11242_p7 = scmp.ne.s32.totalorder %s11234_s28, 0 }
  0x6a   : > { %s8532_s27 = smul.u32 320, %s9287_s7  ;;  %s248_s15 = scalar_lea.sflag [#allocation6], %s9287_s7 }
  0x6c   : > { %s9291_s11 = scalar_lea.vmem [#allocation5], %s8532_s27 }
  0x6d   : > { %9018 = dma.done.wait (%p11242_p7), %s248_s15, 5120  }
  0x6e   : > { %9020 = vsyncadd (%p11242_p7), %s248_s15, 4294962176  ;;  %p11243_p11 = scmp.ne.s32.totalorder %s11232_s26, 0 }
  0x70   : > { %9022 = dma.done.wait (%p11243_p11), [#allocation9], 18432  }
  0x71   : > { %9024 = vsyncadd (%p11243_p11), [#allocation9], 4294948864  ;;  %v11230_v0 = vmov 0   ;;  %v8621_v1 = vld [vmem:[#allocation8] sm:$0xff]   ;;  %v8622_v2 = vld [vmem:[#allocation8 + $0x8] sm:$0xff]   ;;  %vm4398_vm2 = vcmask 1043456  }
  0x72   : > { %1856 = vmatprep.subr.bf16.mxu0 %v11230_v0  ;;  %289 = vst [vmem:[#allocation2] sm:$0xf] %v11230_v0  ;;  %290 = vst [vmem:[#allocation2 + $0x10] sm:$0xf] %v11230_v0  ;;  %v8623_v3 = vld [vmem:[#allocation8 + $0x10] sm:$0xff]   ;;  %v8629_v4 = vld [vmem:[#allocation8 + $0x80] sm:$0xff]  }
  0x73   : > { %291 = vst [vmem:[#allocation2 + $0x20] sm:$0xf] %v11230_v0  ;;  %292 = vst [vmem:[#allocation2 + $0x30] sm:$0xf] %v11230_v0  ;;  %1857 = vmatpush1.bf16.msra.mxu0 %v8621_v1  ;;  %v8624_v5 = vld [vmem:[#allocation8 + $0x18] sm:$0xff]   ;;  %8038 = vmatprep.subr.bf16.mxu1 %v8629_v4  ;;  %v8631_v6 = vld [vmem:[#allocation8 + $0x88] sm:$0xff]  }
  0x74   : > { %293 = vst [vmem:[#allocation2 + $0x40] sm:$0xf] %v11230_v0  ;;  %294 = vst [vmem:[#allocation2 + $0x50] sm:$0xf] %v11230_v0  ;;  %1858 = vmatprep.subr.bf16.mxu0 %v11230_v0  ;;  %8039 = vmatpush3.bf16.msra.mxu1 %v8629_v4  ;;  %v8633_v7 = vld [vmem:[#allocation8 + $0x90] sm:$0xff]   ;;  %v8625_v8 = vld [vmem:[#allocation8 + $0x20] sm:$0xff]  }
  0x75   : > { %295 = vst [vmem:[#allocation2 + $0x60] sm:$0xf] %v11230_v0  ;;  %296 = vst [vmem:[#allocation2 + $0x70] sm:$0xf] %v11230_v0  ;;  %8040 = vmatprep.subr.bf16.mxu1 %v8631_v6  ;;  %v8635_v9 = vld [vmem:[#allocation8 + $0x98] sm:$0xff]   ;;  %v8626_v10 = vld [vmem:[#allocation8 + $0x28] sm:$0xff]  }
  0x76   : > { %297 = vst [vmem:[#allocation2 + $0x80] sm:$0xf] %v11230_v0  ;;  %298 = vst [vmem:[#allocation2 + $0x90] sm:$0xf] %v11230_v0  ;;  %v8637_v11 = vld [vmem:[#allocation8 + $0xa0] sm:$0xff]   ;;  %v8627_v12 = vld [vmem:[#allocation8 + $0x30] sm:$0xff]  }
  0x77   : > { %299 = vst [vmem:[#allocation2 + $0xa0] sm:$0xf] %v11230_v0  ;;  %300 = vst [vmem:[#allocation2 + $0xb0] sm:$0xf] %v11230_v0  ;;  %1859 = vmatpush1.bf16.msra.mxu0 %v8622_v2  ;;  %vm1329_vm0 = vsmask.f32 7424 }
  0x78   : > { %301 = vst [vmem:[#allocation2 + $0xc0] sm:$0xf] %v11230_v0  ;;  %302 = vst [vmem:[#allocation2 + $0xd0] sm:$0xf] %v11230_v0  ;;  %1860 = vmatprep.subr.bf16.mxu0 %v11230_v0  ;;  %8041 = vmatpush3.bf16.msra.mxu1 %v8631_v6  ;;  %v8639_v13 = vld [vmem:[#allocation8 + $0xa8] sm:$0xff]   ;;  %v8628_v14 = vld [vmem:[#allocation8 + $0x38] sm:$0xff]  }
  0x79   : > { %303 = vst [vmem:[#allocation2 + $0xe0] sm:$0xf] %v11230_v0  ;;  %304 = vst [vmem:[#allocation2 + $0xf0] sm:$0xf] %v11230_v0  ;;  %8042 = vmatprep.subr.bf16.mxu1 %v8633_v7  ;;  %v8645_v15 = vld [vmem:[%s9291_s11 + $0x4] sm:$0xff]   ;;  %v8648_v21 = vld [vmem:[%s9291_s11 + $0x14] sm:$0xff]  }
  0x7a   : > { %305 = vst [vmem:[#allocation2 + $0x100] sm:$0xf] %v11230_v0  ;;  %306 = vst [vmem:[#allocation2 + $0x110] sm:$0xf] %v11230_v0  ;;  %v8647_v17 = vld [vmem:[%s9291_s11 + $0x4] sm:$0xff]   ;;  %v1331_v18 = vshrl.u32 %v8645_v15, 16 }
  0x7b   : > { %307 = vst [vmem:[#allocation2 + $0x8] sm:$0xf0] %v11230_v0  ;;  %308 = vst [vmem:[#allocation2 + $0x18] sm:$0xf0] %v11230_v0  ;;  %1861 = vmatpush1.bf16.msra.mxu0 %v8623_v3  ;;  %v1333_v19 = vshll.u32 %v8645_v15, 16  ;;  %v8641_v22 = vld [vmem:[#allocation8 + $0xb0] sm:$0xff]   ;;  %1888 = vmatprep.mubr.bf16.mxu0 %v8647_v17 }
  0x7c   : > { %309 = vst [vmem:[#allocation2 + $0x28] sm:$0xf0] %v11230_v0  ;;  %310 = vst [vmem:[#allocation2 + $0x38] sm:$0xf0] %v11230_v0  ;;  %1862 = vmatprep.subr.bf16.mxu0 %v11230_v0  ;;  %8043 = vmatpush3.bf16.msra.mxu1 %v8633_v7  ;;  %v1345_v26 = vshll.u32 %v8648_v21, 16  ;;  %v8630_v27 = vld [vmem:[#allocation8 + $0x40] sm:$0xff]  }
  0x7d   : > { %311 = vst [vmem:[#allocation2 + $0x48] sm:$0xf0] %v11230_v0  ;;  %312 = vst [vmem:[#allocation2 + $0x58] sm:$0xf0] %v11230_v0  ;;  %8044 = vmatprep.subr.bf16.mxu1 %v8635_v9  ;;  %v1335_v24 = vrot.slane %v1333_v19, 1  ;;  %v1343_v29 = vshrl.u32 %v8648_v21, 16 }
  0x7e   : > { %313 = vst [vmem:[#allocation2 + $0x68] sm:$0xf0] %v11230_v0  ;;  %314 = vst [vmem:[#allocation2 + $0x78] sm:$0xf0] %v11230_v0  ;;  %v1347_v30 = vrot.slane %v1345_v26, 1  ;;  %v8643_v32 = vld [vmem:[#allocation8 + $0xb8] sm:$0xff]  }
  0x7f   : > { %315 = vst [vmem:[#allocation2 + $0x88] sm:$0xf0] %v11230_v0  ;;  %316 = vst [vmem:[#allocation2 + $0x98] sm:$0xf0] %v11230_v0  ;;  %1863 = vmatpush1.bf16.msra.mxu0 %v8624_v5  ;;  %v1336_v28 = vor.u32 %v1335_v24, %v1331_v18  ;;  %v8632_v34 = vld [vmem:[#allocation8 + $0x48] sm:$0xff]   ;;  %v8634_v38 = vld [vmem:[#allocation8 + $0x50] sm:$0xff]  }
  0x80   : > { %317 = vst [vmem:[#allocation2 + $0xa8] sm:$0xf0] %v11230_v0  ;;  %318 = vst [vmem:[#allocation2 + $0xb8] sm:$0xf0] %v11230_v0  ;;  %1864 = vmatprep.subr.bf16.mxu0 %v11230_v0  ;;  %8045 = vmatpush3.bf16.msra.mxu1 %v8635_v9  ;;  %v1348_v35 = vor.u32 %v1347_v30, %v1343_v29  ;;  %v8657_v37 = vld [vmem:[%s9291_s11 + $0x24] sm:$0xff]   ;;  %v8636_v43 = vld [vmem:[#allocation8 + $0x58] sm:$0xff]  }
  0x81   : > { %319 = vst [vmem:[#allocation2 + $0xc8] sm:$0xf0] %v11230_v0  ;;  %320 = vst [vmem:[#allocation2 + $0xd8] sm:$0xf0] %v11230_v0  ;;  %8046 = vmatprep.subr.bf16.mxu1 %v8637_v11  ;;  %v8650_v39 = vld [vmem:[%s9291_s11] sm:$0xf8]  }
  0x82   : > { %321 = vst [vmem:[#allocation2 + $0xe8] sm:$0xf0] %v11230_v0  ;;  %322 = vst [vmem:[#allocation2 + $0xf8] sm:$0xf0] %v11230_v0  ;;  %v9359_v41 = vld [vmem:[#allocation8 + $0xc0] sm:$0xff]   ;;  %v1355_v45 = vshrl.u32 %v8657_v37, 16 }
  0x83   : > { %323 = vst [vmem:[#allocation2 + $0x108] sm:$0xf0] %v11230_v0  ;;  %324 = vst [vmem:[#allocation2 + $0x118] sm:$0xf0] %v11230_v0  ;;  %1865 = vmatpush1.bf16.msra.mxu0 %v8625_v8  ;;  %v8651_v44 = vld [vmem:[%s9291_s11 + $0x8] ss:$0 sps:$4 sm:$0xff]  }
  0x84   : > { %1866 = vmatprep.subr.bf16.mxu0 %v11230_v0  ;;  %v8646_v16 = vld [vmem:[%s9291_s11 + $0xc] ss:$0 sps:$4 sm:$0x11]   ;;  %8047 = vmatpush3.bf16.msra.mxu1 %v8637_v11  ;;  %v8649_v23 = vld [vmem:[%s9291_s11 + $0x1c] ss:$0 sps:$4 sm:$0x11]  }
  0x85   : > { %v1338_v20 = vshll.u32 %v8646_v16, 16  ;;  %8048 = vmatprep.subr.bf16.mxu1 %v8639_v13  ;;  %v1350_v31 = vshll.u32 %v8649_v23, 16  ;;  %v8658_v42 = vld [vmem:[%s9291_s11 + $0x2c] ss:$0 sps:$4 sm:$0x11]   ;;  %v1357_v46 = vshll.u32 %v8657_v37, 16 }
  0x86   : > { %v1362_v47 = vshll.u32 %v8658_v42, 16  ;;  %v8660_v48 = vld [vmem:[%s9291_s11 + $0x34] sm:$0xff]   ;;  %v550_v49 = vshrl.u32 %v8650_v39, 16  ;;  %v9366_v50 = vld [vmem:[#allocation8 + $0xc8] sm:$0xff]   ;;  %v8638_v56 = vld [vmem:[#allocation8 + $0x60] sm:$0xff]   ;;  %v553_v58 = vshll.u32 %v8650_v39, 16 }
  0x87   : > { %1867 = vmatpush1.bf16.msra.mxu0 %v8626_v10  ;;  %v1340_v25 = vrot.slane %v1338_v20, 1  ;;  %v1352_v36 = vrot.slane %v1350_v31, 1  ;;  %v1359_v51 = vrot.slane %v1357_v46, 1  ;;  %v8661_v53 = vld [vmem:[%s9291_s11 + $0x3c] ss:$0 sps:$4 sm:$0x11]  }
  0x88   : > { %1868 = vmatprep.subr.bf16.mxu0 %v11230_v0  ;;  %8049 = vmatpush3.bf16.msra.mxu1 %v8639_v13  ;;  %v1364_v52 = vrot.slane %v1362_v47, 1  ;;  %v1367_v54 = vshrl.u32 %v8660_v48, 16  ;;  %v1369_v55 = vshll.u32 %v8660_v48, 16  ;;  %v558_v59 = vshrl.u32 %v8651_v44, 16  ;;  %v8654_v60 = vld [vmem:[%s9291_s11 + $0x10] sm:$0xf8]  }
  0x89   : > { %8050 = vmatprep.subr.bf16.mxu1 %v8641_v22  ;;  %v1341_v33 = vsel %vm1329_vm0, %v1336_v28, %v1340_v25  ;;  %v9357_v40 = vsel %vm1329_vm0, %v1348_v35, %v1352_v36  ;;  %v1360_v57 = vor.u32 %v1359_v51, %v1355_v45  ;;  %v1374_v62 = vshll.u32 %v8661_v53, 16  ;;  %v8655_v2 = vld [vmem:[%s9291_s11 + $0x18] ss:$0 sps:$4 sm:$0xff]   ;;  %v9379_v5 = vld [vmem:[#allocation8 + $0xd0] sm:$0xff]   ;;  %v8640_v8 = vld [vmem:[#allocation8 + $0x68] sm:$0xff]   ;;  %s7239_s14 = sshll.u32 %s9287_s7, 8 }
  0x8a   : > { %8054 = vmatprep.mubr.bf16.mxu1 %v1341_v33  ;;  %v1371_v61 = vrot.slane %v1369_v55, 1  ;;  %v561_v1 = vshll.u32 %v8651_v44, 16  ;;  %v567_v6 = vshrl.u32 %v8654_v60, 16  ;;  %v552_v9 = vrot.slane %v550_v49, 3  ;;  %v8642_v15 = vld [vmem:[#allocation8 + $0x70] sm:$0xff]   ;;  %v9389_v17 = vld [vmem:[#allocation8 + $0xd8] sm:$0xff]  }
  0x8b   : > { %1869 = vmatpush1.bf16.msra.mxu0 %v8627_v12  ;;  %v9374_v63 = vsel %vm1329_vm0, %v1360_v57, %v1364_v52  ;;  %v1376_v4 = vrot.slane %v1374_v62, 1  ;;  %v570_v10 = vshll.u32 %v8654_v60, 16  ;;  %vm548_vm1 = vsmask.f32 4352  ;;  %v8662_v23 = vld [vmem:[%s9291_s11 + $0x20] sm:$0xf8]  }
  0x8c   : > { %1870 = vmatprep.subr.bf16.mxu0 %v11230_v0  ;;  %8051 = vmatpush3.bf16.msra.mxu1 %v8641_v22  ;;  %v1372_v3 = vor.u32 %v1371_v61, %v1367_v54  ;;  %v555_v11 = vrot.slane %v553_v58, 4  ;;  %v560_v12 = vrot.slane %v558_v59, 3  ;;  %v563_v13 = vrot.slane %v561_v1, 4  ;;  %v8670_v24 = vld [vmem:[%s9291_s11 + $0x4c] ss:$0 sps:$4 sm:$0x11]  }
  0x8d   : > { %8052 = vmatprep.subr.bf16.mxu1 %v8643_v32  ;;  %v575_v16 = vshrl.u32 %v8655_v2, 16  ;;  %v9392_v18 = vrot.slane %v567_v6, 3  ;;  %v578_v19 = vshll.u32 %v8655_v2, 16  ;;  %v9395_v22 = vrot.slane %v570_v10, 4  ;;  %v8663_v25 = vld [vmem:[%s9291_s11 + $0x28] ss:$0 sps:$4 sm:$0xff]  }
  0x8e   : > { %v9383_v7 = vsel %vm1329_vm0, %v1372_v3, %v1376_v4  ;;  %v8644_v28 = vld [vmem:[#allocation8 + $0x78] sm:$0xff]   ;;  %v1386_v29 = vshll.u32 %v8670_v24, 16  ;;  %v9402_v30 = vld [vmem:[#allocation8 + $0xe0] sm:$0xff]   ;;  %v564_v35 = vor.u32 %v563_v13, %v560_v12  ;;  %v584_v42 = vshrl.u32 %v8662_v23, 16  ;;  %v8666_v46 = vld [vmem:[%s9291_s11 + $0x30] sm:$0xf8]  }
  0x8f   : > { %1871 = vmatpush1.bf16.msra.mxu0 %v8628_v14  ;;  %v8669_v14 = vld [vmem:[%s9291_s11 + $0x44] sm:$0xff]   ;;  %v580_v39 = vrot.slane %v578_v19, 4  ;;  %v8653_v44 = vld [vmem:[%s9291_s11 + $0x14] sm:$0xff]   ;;  %v587_v45 = vshll.u32 %v8662_v23, 16  ;;  %v592_v49 = vshrl.u32 %v8663_v25, 16  ;;  %v595_v51 = vshll.u32 %v8663_v25, 16 }
  0x90   : > { %1872 = vmatprep.subr.bf16.mxu0 %v11230_v0  ;;  %8053 = vmatpush3.bf16.msra.mxu1 %v8643_v32  ;;  %v1379_v20 = vshrl.u32 %v8669_v14, 16  ;;  %v1381_v21 = vshll.u32 %v8669_v14, 16  ;;  %v8673_v32 = vld [vmem:[%s9291_s11 + $0x5c] ss:$0 sps:$4 sm:$0x11]   ;;  %v1388_v36 = vrot.slane %v1386_v29, 1  ;;  %v573_v61 = vor.u32 %v9395_v22, %v9392_v18 }
  0x91   : > { %8338 = vmatprep.subr.bf16.mxu1 %v11230_v0  ;;  %v9415_v53 = vld [vmem:[#allocation8 + $0xe8] sm:$0xff]   ;;  %v8667_v55 = vld [vmem:[%s9291_s11 + $0x38] ss:$0 sps:$4 sm:$0xff]   ;;  %v601_v58 = vshrl.u32 %v8666_v46, 16  ;;  %v604_v59 = vshll.u32 %v8666_v46, 16  ;;  %v586_v2 = vrot.slane %v584_v42, 3 }
  0x92   : > { %v1383_v26 = vrot.slane %v1381_v21, 1  ;;  %v8680_v57 = vld [vmem:[%s9291_s11 + $0x64] sm:$0xff]   ;;  %v589_v3 = vrot.slane %v587_v45, 4  ;;  %v594_v4 = vrot.slane %v592_v49, 3  ;;  %v597_v6 = vrot.slane %v595_v51, 4  ;;  %v8684_v23 = vld [vmem:[%s9291_s11 + $0x74] sm:$0xff]  }
  0x93   : > { %1873 = vmatpush1.bf16.msra.mxu0 %v8630_v27  ;;  %8055 = vmatmul.mubr.bf16.vlgmr.msra.gmra.mrb[0].mxu1 %v9357_v40  ;;  %v8672_v27 = vld [vmem:[%s9291_s11 + $0x54] sm:$0xff]   ;;  %v8674_v1 = vld [vmem:[%s9291_s11 + $0x40] sm:$0xf8]   ;;  %v1403_v10 = vshrl.u32 %v8680_v57, 16  ;;  %v9435_v13 = vrot.slane %v601_v58, 3  ;;  %v9437_v14 = vrot.slane %v604_v59, 4 }
  0x94   : > { %1874 = vmatprep.subr.bf16.mxu0 %v11230_v0  ;;  %8354 = vmatpush1.bf16.msra.mxu1 %v9359_v41  ;;  %v1384_v31 = vor.u32 %v1383_v26, %v1379_v20  ;;  %v1391_v33 = vshrl.u32 %v8672_v27, 16  ;;  %v1393_v37 = vshll.u32 %v8672_v27, 16  ;;  %v8659_v12 = vld [vmem:[%s9291_s11 + $0x24] sm:$0xff]   ;;  %v621_v24 = vshll.u32 %v8674_v1, 16  ;;  %v8679_v45 = vld [vmem:[%s9291_s11 + $0x58] ss:$0 sps:$4 sm:$0xff]  }
  0x95   : > { %8339 = vmatprep.subr.bf16.mxu1 %v11230_v0  ;;  %8058 = vmatprep.mubr.bf16.mxu1 %v9374_v63  ;;  %v8685_v25 = vld [vmem:[%s9291_s11 + $0x7c] ss:$0 sps:$4 sm:$0x11]   ;;  %v1417_v29 = vshll.u32 %v8684_v23, 16  ;;  %vm4525_vm3 = vsmask.f32 3328 }
  0x96   : > { %v9411_v47 = vsel %vm1329_vm0, %v1384_v31, %v1388_v36  ;;  %v1395_v48 = vrot.slane %v1393_v37, 1  ;;  %v598_v31 = vor.u32 %v597_v6, %v594_v4  ;;  %v8690_v51 = vld [vmem:[%s9291_s11 + $0x8c] ss:$0 sps:$4 sm:$0x11]   ;;  %v8694_v4 = vld [vmem:[%s9291_s11 + $0x94] sm:$0xff]   ;;  %s11060_s12 = scalar_lea.vmem [#allocation11], %s7239_s14 }
  0x97   : > { %1875 = vmatpush1.bf16.msra.mxu0 %v8632_v34  ;;  %v556_v34 = vor.u32 %v555_v11, %v552_v9  ;;  %v8681_v9 = vld [vmem:[%s9291_s11 + $0x6c] ss:$0 sps:$4 sm:$0x11]   ;;  %v1405_v11 = vshll.u32 %v8680_v57, 16  ;;  %v1419_v37 = vrot.slane %v1417_v29, 1  ;;  %v1434_v57 = vshll.u32 %v8690_v51, 16 }
  0x98   : > { %1876 = vmatprep.subr.bf16.mxu0 %v11230_v0  ;;  %8355 = vmatpush1.bf16.msra.mxu1 %v9366_v50  ;;  %v1410_v19 = vshll.u32 %v8681_v9, 16  ;;  %v8686_v9 = vld [vmem:[%s9291_s11 + $0x60] sm:$0xf8]   ;;  %v8699_v29 = vld [vmem:[%s9291_s11 + $0xac] ss:$0 sps:$4 sm:$0x11]  }
  0x99   : > { %8340 = vmatprep.subr.bf16.mxu1 %v11230_v0  ;;  %v565_v54 = vsel %vm548_vm1, %v556_v34, %v564_v35  ;;  %v1407_v18 = vrot.slane %v1405_v11, 1  ;;  %v8689_v34 = vld [vmem:[%s9291_s11 + $0x84] sm:$0xff]   ;;  %s7551_s10 = sshll.u32 %s9043_s21, 12  ;;  %s7069_s6 = sshll.u32 %s11060_s12, 4  ;;  %s11166_s6 = int_to_ptr.vmem [resolvable:$true] %s7069_s6 }
  0x9a   : > { %v1412_v22 = vrot.slane %v1410_v19, 1  ;;  %s11164_s15 = scalar_lea.hbm %s11223_s5, %s7551_s10  ;;  %s7053_s21 = scalar_lea.sflag [#allocation7], %s9287_s7 }
  0x9b   : > { %1877 = vmatpush1.bf16.msra.mxu0 %v8634_v38  ;;  %8059 = vmatmul.mubr.bf16.gmra.mrb[4].mxu1 %v9383_v7  ;;  %v577_v38 = vrot.slane %v575_v16, 3  ;;  %v618_v16 = vshrl.u32 %v8674_v1, 16  ;;  %v1408_v21 = vor.u32 %v1407_v18, %v1403_v10  ;;  %v8671_v10 = vld [vmem:[%s9291_s11 + $0x44] sm:$0xff]   ;;  %p11319_p12 = scmp.ne.s32.totalorder %s11238_s13, 0  ;;  %s9059_s26 = smov [#allocation11]  }
  0x9c   : > { %1878 = vmatprep.subr.bf16.mxu0 %v11230_v0  ;;  %8356 = vmatpush1.bf16.msra.mxu1 %v9379_v5  ;;  %s8969_s28 = sshll.u32 %s9059_s26, 4  ;;  %s8970_s28 = int_to_ptr.vmem [resolvable:$false] %s8969_s28 }
  0x9d   : > { %8341 = vmatprep.subr.bf16.mxu1 %v11230_v0  ;;  %8062 = vmatprep.mubr.bf16.mxu1 %v9411_v47  ;;  %v581_v62 = vor.u32 %v580_v39, %v577_v38  ;;  %v9451_v27 = vsel %vm1329_vm0, %v1408_v21, %v1412_v22  ;;  %v9458_v38 = vld [vmem:[#allocation8 + $0xf0] sm:$0xff]   ;;  %v9461_v42 = vrot.slane %v618_v16, 3  ;;  %v9498_v16 = vld [vmem:[%s9291_s11 + $0x68] ss:$0 sps:$4 sm:$0xff]   ;;  %s8971_s30 = scalar_lea.vmem %s8970_s28, 8192  ;;  %p8972_p3 = scmp.lt.s32.totalorder %s11166_s6, %s8970_s28 }
  0x9e   : > { %v8665_v39 = vld [vmem:[%s9291_s11 + $0x34] sm:$0xff]  }
  0x9f   : > { %1879 = vmatpush1.bf16.msra.mxu0 %v8636_v43  ;;  %v1398_v43 = vshll.u32 %v8673_v32, 16  ;;  %v9441_v20 = vsel %vm548_vm1, %v573_v61, %v581_v62  ;;  %v8678_v32 = vld [vmem:[%s9291_s11 + $0x50] sm:$0xf8]   ;;  %v643_v61 = vshrl.u32 %v8679_v45, 16  ;;  %v607_v62 = vor.u32 %v9437_v14, %v9435_v13  ;;  %v8696_v14 = vld [vmem:[#allocation8 + $0xf8] sm:$0xff]  }
  0xa0   : > { %1880 = vmatprep.subr.bf16.mxu0 %v11230_v0  ;;  %8357 = vmatpush1.bf16.msra.mxu1 %v9389_v17  ;;  %v635_v49 = vshrl.u32 %v8678_v32, 16  ;;  %v638_v59 = vshll.u32 %v8678_v32, 16  ;;  %v1439_v13 = vshrl.u32 %v8694_v4, 16 }
  0xa1   : > { %8342 = vmatprep.subr.bf16.mxu1 %v11230_v0  ;;  %v1400_v52 = vrot.slane %v1398_v43, 1  ;;  %v9463_v43 = vrot.slane %v621_v24, 4 }
  0xa2   : > { %v9484_v6 = vrot.slane %v635_v49, 3  ;;  %v8704_v49 = vld [vmem:[#allocation8 + $0x100] sm:$0xff]  }
  0xa3   : > { %1881 = vmatpush1.bf16.msra.mxu0 %v8638_v56  ;;  %v1396_v56 = vor.u32 %v1395_v48, %v1391_v33  ;;  %v1422_v33 = vshll.u32 %v8685_v25, 16 }
  0xa4   : > { %1882 = vmatprep.subr.bf16.mxu0 %v11230_v0  ;;  %8358 = vmatpush1.bf16.msra.mxu1 %v9402_v30 }
  0xa5   : > { %8343 = vmatprep.subr.bf16.mxu1 %v11230_v0  ;;  %v9423_v60 = vsel %vm1329_vm0, %v1396_v56, %v1400_v52  ;;  %v1427_v52 = vshrl.u32 %v8689_v34, 16 }
  0xa6   : > { %8063 = vmatmul.mubr.bf16.gmra.mrb[8].mxu1 %v9423_v60 }
  0xa7   : > { %1883 = vmatpush1.bf16.msra.mxu0 %v8640_v8  ;;  %v609_v8 = vshrl.u32 %v8667_v55, 16  ;;  %8066 = vmatprep.mubr.bf16.mxu1 %v9451_v27 }
  0xa8   : > { %1884 = vmatprep.subr.bf16.mxu0 %v11230_v0  ;;  %8359 = vmatpush1.bf16.msra.mxu1 %v9415_v53 }
  0xa9   : > { %8344 = vmatprep.subr.bf16.mxu1 %v11230_v0  ;;  %v9448_v26 = vrot.slane %v609_v8, 3  ;;  %v646_v8 = vshll.u32 %v8679_v45, 16  ;;  %v8693_v45 = vld [vmem:[%s9291_s11 + $0x78] ss:$0 sps:$4 sm:$0xff]  }
  0xab   : > { %1885 = vmatpush1.bf16.msra.mxu0 %v8642_v15  ;;  %v8675_v15 = vld [vmem:[%s9291_s11 + $0x48] ss:$0 sps:$4 sm:$0xff]   ;;  %v9505_v22 = vrot.slane %v646_v8, 4 }
  0xac   : > { %1886 = vmatprep.subr.bf16.mxu0 %v11230_v0  ;;  %v626_v36 = vshrl.u32 %v8675_v15, 16  ;;  %8360 = vmatpush1.bf16.msra.mxu1 %v9458_v38 }
  0xad   : > { %8345 = vmatprep.subr.bf16.mxu1 %v11230_v0 }
  0xaf   : > { %1887 = vmatpush1.bf16.msra.mxu0 %v8644_v28  ;;  %v1415_v28 = vshrl.u32 %v8684_v23, 16  ;;  %v652_v23 = vshrl.u32 %v8686_v9, 16 }
  0xb0   : > { %2530 = vmatprep.subr.bf16.mxu0 %v11230_v0  ;;  %8361 = vmatpush1.bf16.msra.mxu1 %v8696_v14 }
  0xb1   : > { %v1420_v46 = vor.u32 %v1419_v37, %v1415_v28  ;;  %8346 = vmatprep.subr.bf16.mxu1 %v11230_v0  ;;  %v1458_v37 = vshll.u32 %v8699_v29, 16  ;;  %v9529_v51 = vrot.slane %v652_v23, 3  ;;  %v8700_v23 = vld [vmem:[%s9291_s11 + $0x80] sm:$0xf8]   ;;  %v8713_v29 = vld [vmem:[#allocation8 + $0x110] sm:$0xff]  }
  0xb2   : > { %1889 = vmatmul.mubr.bf16.vlgmr.msra.gmra.mrb[0].mxu0 %v565_v54  ;;  %v1429_v54 = vshll.u32 %v8689_v34, 16 }
  0xb3   : > { %2531 = vmatpush1.bf16.msra.mxu0 %v9359_v41  ;;  %1896 = vmatprep.mubr.bf16.mxu0 %v8653_v44  ;;  %v612_v41 = vshll.u32 %v8667_v55, 16  ;;  %v629_v44 = vshll.u32 %v8675_v15, 16  ;;  %v9495_v15 = vrot.slane %v643_v61, 3 }
  0xb4   : > { %2532 = vmatprep.subr.bf16.mxu0 %v11230_v0  ;;  %v1431_v56 = vrot.slane %v1429_v54, 1  ;;  %8362 = vmatpush1.bf16.msra.mxu1 %v8704_v49 }
  0xb5   : > { %v614_v35 = vrot.slane %v612_v41, 4  ;;  %v631_v58 = vrot.slane %v629_v44, 4  ;;  %v1441_v41 = vshll.u32 %v8694_v4, 16  ;;  %8347 = vmatprep.subr.bf16.mxu1 %v11230_v0  ;;  %v649_v8 = vor.u32 %v9505_v22, %v9495_v15 }
  0xb7   : > { %2533 = vmatpush1.bf16.msra.mxu0 %v9366_v50  ;;  %v590_v50 = vor.u32 %v589_v3, %v586_v2  ;;  %v615_v1 = vor.u32 %v614_v35, %v9448_v26  ;;  %v1432_v2 = vor.u32 %v1431_v56, %v1427_v52  ;;  %v1436_v3 = vrot.slane %v1434_v57, 1  ;;  %v8698_v26 = vld [vmem:[%s9291_s11 + $0xa4] sm:$0xff]   ;;  %v8703_v56 = vld [vmem:[%s9291_s11 + $0xbc] ss:$0 sps:$4 sm:$0x11]  }
  0xb8   : > { %2534 = vmatprep.subr.bf16.mxu0 %v11230_v0  ;;  %v1443_v19 = vrot.slane %v1441_v41, 1  ;;  %v1453_v34 = vshll.u32 %v8698_v26, 16  ;;  %v660_v35 = vshrl.u32 %v9498_v16, 16  ;;  %v8683_v41 = vld [vmem:[%s9291_s11 + $0x64] sm:$0xff]  }
  0xb9   : > { %v9468_v48 = vsel %vm548_vm1, %v590_v50, %v598_v31  ;;  %v9490_v11 = vsel %vm1329_vm0, %v1432_v2, %v1436_v3  ;;  %v9502_v18 = vsel %vm548_vm1, %v607_v62, %v615_v1  ;;  %v8702_v50 = vld [vmem:[%s9291_s11 + $0xb4] sm:$0xff]   ;;  %v655_v31 = vshll.u32 %v8686_v9, 16  ;;  %v8705_v1 = vld [vmem:[#allocation8 + $0x108] sm:$0xff]  }
  0xba   : > { %1897 = vmatmul.mubr.bf16.gmra.mrb[4].mxu0 %v9441_v20  ;;  %v1444_v24 = vor.u32 %v1443_v19, %v1439_v13  ;;  %v1463_v44 = vshrl.u32 %v8702_v50, 16  ;;  %v1470_v62 = vshll.u32 %v8703_v56, 16  ;;  %v677_v2 = vshrl.u32 %v8693_v45, 16  ;;  %8363 = vmatpush1.bf16.msra.mxu1 %v8705_v1  ;;  %v8711_v13 = vld [vmem:[%s9291_s11 + $0xd4] sm:$0xff]  }
  0xbb   : > { %1904 = vmatprep.mubr.bf16.mxu0 %v8659_v12  ;;  %2535 = vmatpush1.bf16.msra.mxu0 %v9379_v5  ;;  %v1424_v5 = vrot.slane %v1422_v33, 1  ;;  %v8695_v12 = vld [vmem:[%s9291_s11 + $0x9c] ss:$0 sps:$4 sm:$0x11]   ;;  %v1451_v33 = vshrl.u32 %v8698_v26, 16  ;;  %v9531_v52 = vrot.slane %v655_v31, 4 }
  0xbc   : > { %2536 = vmatprep.subr.bf16.mxu0 %v11230_v0  ;;  %v1446_v21 = vshll.u32 %v8695_v12, 16  ;;  %v680_v3 = vshll.u32 %v8693_v45, 16  ;;  %v1472_v9 = vrot.slane %v1470_v62, 1  ;;  %v8708_v12 = vld [vmem:[%s9291_s11 + $0xcc] ss:$0 sps:$4 sm:$0x11]   ;;  %8348 = vmatprep.subr.bf16.mxu1 %v11230_v0 }
  0xbd   : > { %v9475_v55 = vsel %vm1329_vm0, %v1420_v46, %v1424_v5  ;;  %v1460_v46 = vrot.slane %v1458_v37, 1  ;;  %v8712_v37 = vld [vmem:[%s9291_s11 + $0xdc] ss:$0 sps:$4 sm:$0x11]  }
  0xbe   : > { %8067 = vmatmul.mubr.bf16.gmra.mrb[12].mxu1 %v9475_v55  ;;  %v1448_v25 = vrot.slane %v1446_v21, 1  ;;  %v1482_v21 = vshll.u32 %v8708_v12, 16  ;;  %v9566_v31 = vrot.slane %v680_v3, 4  ;;  %v8710_v12 = vld [vmem:[%s9291_s11 + $0x98] ss:$0 sps:$4 sm:$0xff]  }
  0xbf   : > { %2537 = vmatpush1.bf16.msra.mxu0 %v9389_v17  ;;  %v628_v17 = vrot.slane %v626_v36, 3  ;;  %8070 = vmatprep.mubr.bf16.mxu1 %v9490_v11  ;;  %v8692_v36 = vld [vmem:[%s9291_s11 + $0x70] sm:$0xf8]  }
  0xc0   : > { %2538 = vmatprep.subr.bf16.mxu0 %v11230_v0  ;;  %v9517_v32 = vsel %vm1329_vm0, %v1444_v24, %v1448_v25  ;;  %v1489_v25 = vshll.u32 %v8711_v13, 16  ;;  %8364 = vmatpush1.bf16.msra.mxu1 %v8713_v29 }
  0xc1   : > { %v632_v28 = vor.u32 %v631_v58, %v628_v17  ;;  %v669_v17 = vshrl.u32 %v8692_v36, 16  ;;  %v672_v58 = vshll.u32 %v8692_v36, 16  ;;  %v8701_v36 = vld [vmem:[%s9291_s11 + $0x88] ss:$0 sps:$4 sm:$0xff]   ;;  %8349 = vmatprep.subr.bf16.mxu1 %v11230_v0 }
  0xc2   : > { %1905 = vmatmul.mubr.bf16.gmra.mrb[8].mxu0 %v9468_v48 }
  0xc3   : > { %1912 = vmatprep.mubr.bf16.mxu0 %v8665_v39  ;;  %2539 = vmatpush1.bf16.msra.mxu0 %v9402_v30  ;;  %v9493_v30 = vrot.slane %v638_v59, 4  ;;  %v8677_v39 = vld [vmem:[%s9291_s11 + $0x54] sm:$0xff]   ;;  %v9554_v15 = vrot.slane %v669_v17, 3  ;;  %v9561_v26 = vrot.slane %v672_v58, 4  ;;  %v694_v58 = vshrl.u32 %v8701_v36, 16 }
  0xc4   : > { %2540 = vmatprep.subr.bf16.mxu0 %v11230_v0 }
  0xc5   : > { %v641_v4 = vor.u32 %v9493_v30, %v9484_v6  ;;  %v662_v6 = vrot.slane %v660_v35, 3  ;;  %v658_v35 = vor.u32 %v9531_v52, %v9529_v51  ;;  %v9580_v51 = vld [vmem:[%s9291_s11 + $0x74] sm:$0xff]  }
  0xc6   : > { %8071 = vmatmul.mubr.bf16.gmra.mrb[16].mxu1 %v9517_v32 }
  0xc7   : > { %2541 = vmatpush1.bf16.msra.mxu0 %v9415_v53  ;;  %v624_v53 = vor.u32 %v9463_v43, %v9461_v42  ;;  %v663_v42 = vshll.u32 %v9498_v16, 16  ;;  %v1455_v43 = vrot.slane %v1453_v34, 1  ;;  %v9558_v22 = vsel %vm548_vm1, %v641_v4, %v649_v8 }
  0xc8   : > { %2542 = vmatprep.subr.bf16.mxu0 %v11230_v0  ;;  %v1491_v34 = vrot.slane %v1489_v25, 1 }
  0xc9   : > { %v9526_v5 = vsel %vm548_vm1, %v624_v53, %v632_v28  ;;  %v1456_v54 = vor.u32 %v1455_v43, %v1451_v33  ;;  %v665_v30 = vrot.slane %v663_v42, 4  ;;  %v1484_v53 = vrot.slane %v1482_v21, 1  ;;  %v8722_v21 = vld [vmem:[#allocation8 + $0x120] sm:$0xff]  }
  0xca   : > { %1913 = vmatmul.mubr.bf16.gmra.mrb[12].mxu0 %v9502_v18  ;;  %v1487_v28 = vshrl.u32 %v8711_v13, 16  ;;  %v686_v43 = vshrl.u32 %v8700_v23, 16 }
  0xcb   : > { %1920 = vmatprep.mubr.bf16.mxu0 %v8671_v10  ;;  %2543 = vmatpush1.bf16.msra.mxu0 %v9458_v38  ;;  %v1465_v38 = vshll.u32 %v8702_v50, 16  ;;  %v9536_v59 = vsel %vm1329_vm0, %v1456_v54, %v1460_v46  ;;  %v8707_v10 = vld [vmem:[%s9291_s11 + $0xc4] sm:$0xff]   ;;  %v9564_v50 = vrot.slane %v677_v2, 3  ;;  %v666_v42 = vor.u32 %v665_v30, %v662_v6  ;;  %v8721_v30 = vld [vmem:[%s9291_s11 + $0xfc] ss:$0 sps:$4 sm:$0x11]  }
  0xcc   : > { %2544 = vmatprep.subr.bf16.mxu0 %v11230_v0  ;;  %8074 = vmatprep.mubr.bf16.mxu1 %v9536_v59  ;;  %v1475_v16 = vshrl.u32 %v8707_v10, 16  ;;  %v1477_v19 = vshll.u32 %v8707_v10, 16  ;;  %v1492_v45 = vor.u32 %v1491_v34, %v1487_v28  ;;  %v1494_v46 = vshll.u32 %v8712_v37, 16  ;;  %v8726_v37 = vld [vmem:[%s9291_s11 + $0x10c] ss:$0 sps:$4 sm:$0x11]  }
  0xcd   : > { %v1467_v57 = vrot.slane %v1465_v38, 1  ;;  %v9584_v56 = vsel %vm548_vm1, %v658_v35, %v666_v42  ;;  %v688_v4 = vrot.slane %v686_v43, 3  ;;  %v683_v10 = vor.u32 %v9566_v31, %v9564_v50 }
  0xce   : > { %v1479_v24 = vrot.slane %v1477_v19, 1  ;;  %v1496_v52 = vrot.slane %v1494_v46, 1  ;;  %v696_v19 = vrot.slane %v694_v58, 3  ;;  %v711_v31 = vshrl.u32 %v8710_v12, 16 }
  0xcf   : > { %2545 = vmatpush1.bf16.msra.mxu0 %v8696_v14  ;;  %v1468_v61 = vor.u32 %v1467_v57, %v1463_v44  ;;  %v689_v44 = vshll.u32 %v8700_v23, 16  ;;  %v8717_v57 = vld [vmem:[%s9291_s11 + $0xec] ss:$0 sps:$4 sm:$0x11]   ;;  %v9604_v23 = vld [vmem:[%s9291_s11 + $0x84] sm:$0xff]  }
  0xd0   : > { %2546 = vmatprep.subr.bf16.mxu0 %v11230_v0  ;;  %v1480_v33 = vor.u32 %v1479_v24, %v1475_v16  ;;  %v9589_v62 = vsel %vm1329_vm0, %v1492_v45, %v1496_v52  ;;  %v1506_v3 = vshll.u32 %v8717_v57, 16  ;;  %v8720_v16 = vld [vmem:[%s9291_s11 + $0xf4] sm:$0xff]  }
  0xd1   : > { %v9551_v14 = vsel %vm1329_vm0, %v1468_v61, %v1472_v9  ;;  %v697_v61 = vshll.u32 %v8701_v36, 16  ;;  %v691_v8 = vrot.slane %v689_v44, 4  ;;  %v675_v9 = vor.u32 %v9561_v26, %v9554_v15  ;;  %v8723_v26 = vld [vmem:[#allocation8 + $0x128] sm:$0xff]   ;;  %v8718_v44 = vld [vmem:[%s9291_s11 + $0xa0] sm:$0xf8]   ;;  %v8729_v52 = vld [vmem:[%s9291_s11 + $0x114] sm:$0xff]  }
  0xd2   : > { %1921 = vmatmul.mubr.bf16.gmra.mrb[16].mxu0 %v9526_v5  ;;  %8075 = vmatmul.mubr.bf16.gmra.mrb[20].mxu1 %v9551_v14  ;;  %v9574_v38 = vsel %vm1329_vm0, %v1480_v33, %v1484_v53  ;;  %v1511_v15 = vshrl.u32 %v8720_v16, 16  ;;  %v1513_v28 = vshll.u32 %v8720_v16, 16  ;;  %v714_v33 = vshll.u32 %v8710_v12, 16  ;;  %v8725_v36 = vld [vmem:[%s9291_s11 + $0x104] sm:$0xff]  }
  0xd3   : > { %1928 = vmatprep.mubr.bf16.mxu0 %v8677_v39  ;;  %2547 = vmatpush1.bf16.msra.mxu0 %v8704_v49  ;;  %v8714_v39 = vld [vmem:[#allocation8 + $0x118] sm:$0xff]   ;;  %v8716_v49 = vld [vmem:[%s9291_s11 + $0xe4] sm:$0xff]   ;;  %v699_v6 = vrot.slane %v697_v61, 4  ;;  %v9611_v50 = vsel %vm548_vm1, %v675_v9, %v683_v10  ;;  %v1523_v45 = vshrl.u32 %v8725_v36, 16  ;;  %v1525_v46 = vshll.u32 %v8725_v36, 16 }
  0xd4   : > { %2548 = vmatprep.subr.bf16.mxu0 %v11230_v0  ;;  %8078 = vmatprep.mubr.bf16.mxu1 %v9574_v38  ;;  %v1499_v54 = vshrl.u32 %v8716_v49, 16  ;;  %v1501_v17 = vshll.u32 %v8716_v49, 16  ;;  %v1515_v34 = vrot.slane %v1513_v28, 1  ;;  %v1530_v49 = vshll.u32 %v8726_v37, 16  ;;  %v9633_v9 = vld [vmem:[%s9291_s11 + $0x94] sm:$0xff]   ;;  %v9652_v37 = vld [vmem:[%s9291_s11 + $0xa4] sm:$0xff]  }
  0xd5   : > { %8365 = vmatpush1.bf16.msra.mxu1 %v8714_v39  ;;  %v700_v43 = vor.u32 %v699_v6, %v696_v19  ;;  %v1527_v58 = vrot.slane %v1525_v46, 1  ;;  %v1535_v12 = vshrl.u32 %v8729_v52, 16  ;;  %v720_v16 = vshrl.u32 %v8718_v44, 16 }
  0xd6   : > { %8350 = vmatprep.subr.bf16.mxu1 %v11230_v0  ;;  %v1503_v2 = vrot.slane %v1501_v17, 1  ;;  %v1516_v42 = vor.u32 %v1515_v34, %v1511_v15  ;;  %v1532_v61 = vrot.slane %v1530_v49, 1  ;;  %v723_v19 = vshll.u32 %v8718_v44, 16  ;;  %v8728_v34 = vld [vmem:[%s9291_s11 + $0xb8] ss:$0 sps:$4 sm:$0xff]  }
  0xd7   : > { %2549 = vmatpush1.bf16.msra.mxu0 %v8705_v1  ;;  %v8709_v1 = vld [vmem:[%s9291_s11 + $0x90] sm:$0xf8]   ;;  %v1528_v10 = vor.u32 %v1527_v58, %v1523_v45  ;;  %v745_v49 = vshrl.u32 %v8728_v34, 16  ;;  %v8739_v58 = vld [vmem:[#allocation8 + $0x180] sm:$0xff]  }
  0xd8   : > { %2550 = vmatprep.subr.bf16.mxu0 %v11230_v0  ;;  %v1504_v13 = vor.u32 %v1503_v2, %v1499_v54  ;;  %v703_v24 = vshrl.u32 %v8709_v1, 16  ;;  %v706_v25 = vshll.u32 %v8709_v1, 16  ;;  %v8719_v54 = vld [vmem:[%s9291_s11 + $0xa8] ss:$0 sps:$4 sm:$0xff]   ;;  %v713_v2 = vrot.slane %v711_v31, 3 }
  0xd9   : > { %8366 = vmatpush1.bf16.msra.mxu1 %v8722_v21  ;;  %v728_v6 = vshrl.u32 %v8719_v54, 16  ;;  %v731_v28 = vshll.u32 %v8719_v54, 16 }
  0xda   : > { %1929 = vmatmul.mubr.bf16.gmra.mrb[20].mxu0 %v9558_v22  ;;  %8079 = vmatmul.mubr.bf16.gmra.mrb[24].mxu1 %v9589_v62  ;;  %v705_v17 = vrot.slane %v703_v24, 3  ;;  %v708_v1 = vrot.slane %v706_v25, 4  ;;  %v8732_v25 = vld [vmem:[#allocation8 + $0x138] sm:$0xff]  }
  0xdb   : > { %1936 = vmatprep.mubr.bf16.mxu0 %v8683_v41  ;;  %2551 = vmatpush1.bf16.msra.mxu0 %v8713_v29  ;;  %v1508_v41 = vrot.slane %v1506_v3, 1  ;;  %v1518_v29 = vshll.u32 %v8721_v30, 16  ;;  %v716_v3 = vrot.slane %v714_v33, 4  ;;  %v8727_v33 = vld [vmem:[%s9291_s11 + $0xb0] sm:$0xf8]   ;;  %v733_v44 = vrot.slane %v731_v28, 4 }
  0xdc   : > { %2552 = vmatprep.subr.bf16.mxu0 %v11230_v0  ;;  %8351 = vmatprep.subr.bf16.mxu1 %v11230_v0  ;;  %v709_v15 = vor.u32 %v708_v1, %v705_v17  ;;  %v737_v45 = vshrl.u32 %v8727_v33, 16  ;;  %v740_v46 = vshll.u32 %v8727_v33, 16  ;;  %v748_v17 = vshll.u32 %v8728_v34, 16  ;;  %v9660_v1 = vld [vmem:[%s9291_s11 + $0xb4] sm:$0xff]  }
  0xdd   : > { %v9607_v53 = vsel %vm1329_vm0, %v1504_v13, %v1508_v41  ;;  %v1520_v35 = vrot.slane %v1518_v29, 1  ;;  %8367 = vmatpush1.bf16.msra.mxu1 %v8723_v26  ;;  %v1537_v13 = vshll.u32 %v8729_v52, 16  ;;  %v8731_v41 = vld [vmem:[#allocation8 + $0x130] sm:$0xff]  }
  0xde   : > { %8082 = vmatprep.mubr.bf16.mxu1 %v9607_v53  ;;  %8352 = vmatprep.subr.bf16.mxu1 %v11230_v0 }
  0xdf   : > { %2553 = vmatpush1.bf16.msra.mxu0 %v8714_v39  ;;  %v692_v39 = vor.u32 %v691_v8, %v688_v4  ;;  %v9624_v57 = vsel %vm1329_vm0, %v1516_v42, %v1520_v35  ;;  %v8730_v4 = vld [vmem:[%s9291_s11 + $0x11c] ss:$0 sps:$4 sm:$0x11]   ;;  %v1539_v24 = vrot.slane %v1537_v13, 1  ;;  %v725_v42 = vrot.slane %v723_v19, 4  ;;  %v8743_v13 = vld [vmem:[#allocation8 + $0x188] sm:$0xff]  }
  0xe0   : > { %2554 = vmatprep.subr.bf16.mxu0 %v11230_v0  ;;  %v1542_v30 = vshll.u32 %v8730_v4, 16  ;;  %v8734_v4 = vld [vmem:[%s9291_s11 + $0xc0] sm:$0xf8]  }
  0xe1   : > { %v9630_v8 = vsel %vm548_vm1, %v692_v39, %v700_v43  ;;  %8368 = vmatpush1.bf16.msra.mxu1 %v8731_v41  ;;  %v1540_v31 = vor.u32 %v1539_v24, %v1535_v12  ;;  %v722_v39 = vrot.slane %v720_v16, 3  ;;  %v730_v43 = vrot.slane %v728_v6, 3 }
  0xe2   : > { %1937 = vmatmul.mubr.bf16.gmra.mrb[24].mxu0 %v9584_v56  ;;  %8083 = vmatmul.mubr.bf16.gmra.mrb[28].mxu1 %v9624_v57  ;;  %v1544_v29 = vrot.slane %v1542_v30, 1  ;;  %v750_v12 = vrot.slane %v748_v17, 4  ;;  %v754_v16 = vshrl.u32 %v8734_v4, 16  ;;  %v757_v6 = vshll.u32 %v8734_v4, 16 }
  0xe3   : > { %1944 = vmatprep.mubr.bf16.mxu0 %v9580_v51  ;;  %2555 = vmatpush1.bf16.msra.mxu0 %v8722_v21  ;;  %v9636_v21 = vsel %vm1329_vm0, %v1528_v10, %v1532_v61  ;;  %v726_v52 = vor.u32 %v725_v42, %v722_v39  ;;  %v734_v54 = vor.u32 %v733_v44, %v730_v43  ;;  %v739_v61 = vrot.slane %v737_v45, 3  ;;  %v8735_v10 = vld [vmem:[%s9291_s11 + $0xc8] ss:$0 sps:$4 sm:$0xff]   ;;  %v8748_v39 = vld [vmem:[#allocation8 + $0x198] sm:$0xff]  }
  0xe4   : > { %2556 = vmatprep.subr.bf16.mxu0 %v11230_v0  ;;  %8086 = vmatprep.mubr.bf16.mxu1 %v9636_v21  ;;  %v9646_v35 = vsel %vm1329_vm0, %v1540_v31, %v1544_v29  ;;  %v762_v30 = vshrl.u32 %v8735_v10, 16  ;;  %v765_v24 = vshll.u32 %v8735_v10, 16  ;;  %v756_v28 = vrot.slane %v754_v16, 3 }
  0xe5   : > { %8353 = vmatprep.subr.bf16.mxu1 %v11230_v0  ;;  %v759_v31 = vrot.slane %v757_v6, 4 }
  0xe6   : > { %8369 = vmatpush1.bf16.msra.mxu1 %v8732_v25  ;;  %v764_v33 = vrot.slane %v762_v30, 3  ;;  %v767_v34 = vrot.slane %v765_v24, 4 }
  0xe7   : > { %2557 = vmatpush1.bf16.msra.mxu0 %v8723_v26  ;;  %v717_v26 = vor.u32 %v716_v3, %v713_v2  ;;  %3240 = vmatprep.subr.bf16.mxu1 %v11230_v0  ;;  %v742_v2 = vrot.slane %v740_v46, 4  ;;  %v747_v3 = vrot.slane %v745_v49, 3  ;;  %v8741_v46 = vld [vmem:[%s9291_s11 + $0xe0] sm:$0xf8]   ;;  %v760_v49 = vor.u32 %v759_v31, %v756_v28 }
  0xe8   : > { %2558 = vmatprep.subr.bf16.mxu0 %v11230_v0 }
  0xe9   : > { %v9649_v36 = vsel %vm548_vm1, %v709_v15, %v717_v26  ;;  %v751_v19 = vor.u32 %v750_v12, %v747_v3  ;;  %v8737_v15 = vld [vmem:[%s9291_s11 + $0xd0] sm:$0xf8]   ;;  %v9676_v26 = vld [vmem:[%s9291_s11 + $0xc4] sm:$0xff]   ;;  %v788_v12 = vshrl.u32 %v8741_v46, 16 }
  0xea   : > { %1945 = vmatmul.mubr.bf16.gmra.mrb[28].mxu0 %v9611_v50  ;;  %8087 = vmatmul.mubr.bf16.gmra.mrb[32].mxu1 %v9646_v35  ;;  %v771_v42 = vshrl.u32 %v8737_v15, 16  ;;  %v774_v43 = vshll.u32 %v8737_v15, 16  ;;  %v8745_v15 = vld [vmem:[%s9291_s11 + $0xf0] sm:$0xf8]  }
  0xeb   : > { %1952 = vmatprep.mubr.bf16.mxu0 %v9604_v23  ;;  %2559 = vmatpush1.bf16.msra.mxu0 %v8731_v41  ;;  %v743_v41 = vor.u32 %v742_v2, %v739_v61  ;;  %v9691_v61 = vld [vmem:[%s9291_s11 + $0xd4] sm:$0xff]   ;;  %v8742_v2 = vld [vmem:[%s9291_s11 + $0xe8] ss:$0 sps:$4 sm:$0xff]   ;;  %v790_v24 = vrot.slane %v788_v12, 3 }
  0xec   : > { %2560 = vmatprep.subr.bf16.mxu0 %v11230_v0  ;;  %2610 = vmatprep.mubr.bf16.mxu1 %v9580_v51  ;;  %v9666_v51 = vsel %vm548_vm1, %v726_v52, %v734_v54  ;;  %v768_v52 = vor.u32 %v767_v34, %v764_v33  ;;  %v8752_v54 = vld [vmem:[#allocation8 + $0x1a0] sm:$0xff]   ;;  %v773_v17 = vrot.slane %v771_v42, 3  ;;  %v796_v16 = vshrl.u32 %v8742_v2, 16 }
  0xed   : > { %v9680_v29 = vsel %vm548_vm1, %v743_v41, %v751_v19  ;;  %v791_v41 = vshll.u32 %v8741_v46, 16  ;;  %v799_v19 = vshll.u32 %v8742_v2, 16  ;;  %v805_v42 = vshrl.u32 %v8745_v15, 16 }
  0xee   : > { %v9697_v10 = vsel %vm548_vm1, %v760_v49, %v768_v52  ;;  %v798_v31 = vrot.slane %v796_v16, 3  ;;  %v8764_v16 = vld [vmem:[#allocation8 + $0x1c8] sm:$0xff]  }
  0xef   : > { %2561 = vmatpush1.bf16.msra.mxu0 %v8732_v25  ;;  %v8747_v25 = vld [vmem:[#allocation8 + $0x190] sm:$0xff]   ;;  %v793_v28 = vrot.slane %v791_v41, 4  ;;  %v801_v34 = vrot.slane %v799_v19, 4 }
  0xf1   : > { %v794_v46 = vor.u32 %v793_v28, %v790_v24  ;;  %v802_v49 = vor.u32 %v801_v34, %v798_v31  ;;  %v8766_v28 = vld [vmem:[#allocation8 + $0x1d0] sm:$0xff]   ;;  %v9735_v31 = vld [vmem:[%s9291_s11 + $0x104] sm:$0xff]  }
  0xf2   : > { %1953 = vmatmul.mubr.bf16.gmra.mrb[32].mxu0 %v9630_v8  ;;  %2611 = vmatmul.mubr.bf16.vlgmr.msra.gmra.mrb[36].mxu1 %v9611_v50 }
  0xf3   : > { %1960 = vmatprep.mubr.bf16.mxu0 %v9633_v9  ;;  %2618 = vmatprep.mubr.bf16.mxu1 %v9604_v23  ;;  %v8738_v23 = vld [vmem:[%s9291_s11 + $0xd8] ss:$0 sps:$4 sm:$0xff]  }
  0xf4   : > { %3241 = vmatpush1.bf16.msra.mxu1 %v8739_v58  ;;  %v779_v44 = vshrl.u32 %v8738_v23, 16  ;;  %v782_v45 = vshll.u32 %v8738_v23, 16  ;;  %v776_v58 = vrot.slane %v774_v43, 4  ;;  %v8746_v23 = vld [vmem:[%s9291_s11 + $0xf8] ss:$0 sps:$4 sm:$0xff]   ;;  %v808_v43 = vshll.u32 %v8745_v15, 16 }
  0xf5   : > { %3242 = vmatprep.subr.bf16.mxu1 %v11230_v0  ;;  %v816_v52 = vshll.u32 %v8746_v23, 16 }
  0xf6   : > { %v781_v3 = vrot.slane %v779_v44, 3  ;;  %v784_v4 = vrot.slane %v782_v45, 4  ;;  %v777_v6 = vor.u32 %v776_v58, %v773_v17  ;;  %v813_v44 = vshrl.u32 %v8746_v23, 16  ;;  %v8750_v45 = vld [vmem:[%s9291_s11 + $0x100] sm:$0xf8]   ;;  %v9720_v17 = vld [vmem:[%s9291_s11 + $0xf4] sm:$0xff]  }
  0xf7   : > { %v8751_v58 = vld [vmem:[%s9291_s11 + $0x108] ss:$0 sps:$4 sm:$0xff]   ;;  %v810_v2 = vrot.slane %v808_v43, 4  ;;  %v818_v12 = vrot.slane %v816_v52, 4  ;;  %v825_v41 = vshll.u32 %v8750_v45, 16  ;;  %v8767_v43 = vld [vmem:[#allocation8 + $0x1d8] sm:$0xff]  }
  0xf8   : > { %3243 = vmatpush1.bf16.msra.mxu1 %v8743_v13  ;;  %v8756_v13 = vld [vmem:[#allocation8 + $0x1a8] sm:$0xff]   ;;  %v785_v30 = vor.u32 %v784_v4, %v781_v3  ;;  %v815_v3 = vrot.slane %v813_v44, 3  ;;  %v9725_v4 = vsel %vm548_vm1, %v794_v46, %v802_v49  ;;  %v830_v19 = vshrl.u32 %v8751_v58, 16 }
  0xf9   : > { %3244 = vmatprep.subr.bf16.mxu1 %v11230_v0  ;;  %v827_v23 = vrot.slane %v825_v41, 4  ;;  %v8774_v52 = vld [vmem:[%s9291_s11 + $0x128] ss:$0 sps:$4 sm:$0xff]  }
  0xfa   : > { %1961 = vmatmul.mubr.bf16.gmra.mrb[36].mxu0 %v9649_v36  ;;  %2619 = vmatmul.mubr.bf16.gmra.mrb[40].mxu1 %v9630_v8  ;;  %v9711_v33 = vsel %vm548_vm1, %v777_v6, %v785_v30  ;;  %v833_v6 = vshll.u32 %v8751_v58, 16  ;;  %v8754_v30 = vld [vmem:[%s9291_s11 + $0x110] sm:$0xf8]   ;;  %v832_v34 = vrot.slane %v830_v19, 3  ;;  %v864_v41 = vshrl.u32 %v8774_v52, 16 }
  0xfb   : > { %1968 = vmatprep.mubr.bf16.mxu0 %v9652_v37  ;;  %2626 = vmatprep.mubr.bf16.mxu1 %v9633_v9  ;;  %v9687_v9 = vld [vmem:[#allocation8 + $0x140] sm:$0xff]   ;;  %v842_v46 = vshll.u32 %v8754_v30, 16 }
  0xfc   : > { %3245 = vmatpush1.bf16.msra.mxu1 %v8747_v25  ;;  %8090 = vmatprep.subr.bf16.mxu0 %v9687_v9  ;;  %v8758_v25 = vld [vmem:[#allocation8 + $0x1b0] sm:$0xff]  }
  0xfd   : > { %3246 = vmatprep.subr.bf16.mxu1 %v11230_v0 }
 0x100   : > { %3247 = vmatpush1.bf16.msra.mxu1 %v8748_v39  ;;  %v8760_v39 = vld [vmem:[#allocation8 + $0x1b8] sm:$0xff]  }
 0x101   : > { %3248 = vmatprep.subr.bf16.mxu1 %v11230_v0 }
 0x102   : > { %1969 = vmatmul.mubr.bf16.gmra.mrb[40].mxu0 %v9666_v51  ;;  %2627 = vmatmul.mubr.bf16.gmra.mrb[44].mxu1 %v9649_v36 }
 0x103   : > { %1976 = vmatprep.mubr.bf16.mxu0 %v9660_v1  ;;  %2634 = vmatprep.mubr.bf16.mxu1 %v9652_v37  ;;  %v9706_v37 = vld [vmem:[%s9291_s11 + $0xe4] sm:$0xff]  }
 0x104   : > { %3249 = vmatpush1.bf16.msra.mxu1 %v8752_v54  ;;  %v8762_v54 = vld [vmem:[#allocation8 + $0x1c0] sm:$0xff]  }
 0x105   : > { %3250 = vmatprep.subr.bf16.mxu1 %v11230_v0 }
 0x108   : > { %3251 = vmatpush1.bf16.msra.mxu1 %v8756_v13  ;;  %v822_v13 = vshrl.u32 %v8750_v45, 16  ;;  %v8773_v45 = vld [vmem:[%s9291_s11 + $0x120] sm:$0xf8]  }
 0x109   : > { %3252 = vmatprep.subr.bf16.mxu1 %v11230_v0 }
 0x10a   : > { %1977 = vmatmul.mubr.bf16.gmra.mrb[44].mxu0 %v9680_v29  ;;  %2635 = vmatmul.mubr.bf16.gmra.mrb[48].mxu1 %v9666_v51  ;;  %v824_v15 = vrot.slane %v822_v13, 3 }
 0x10b   : > { %1984 = vmatprep.mubr.bf16.mxu0 %v9676_v26  ;;  %2642 = vmatprep.mubr.bf16.mxu1 %v9660_v1  ;;  %v807_v1 = vrot.slane %v805_v42, 3  ;;  %v839_v42 = vshrl.u32 %v8754_v30, 16 }
 0x10c   : > { %3253 = vmatpush1.bf16.msra.mxu1 %v8758_v25  ;;  %v819_v25 = vor.u32 %v818_v12, %v815_v3  ;;  %v828_v58 = vor.u32 %v827_v23, %v824_v15  ;;  %v856_v3 = vshrl.u32 %v8773_v45, 16  ;;  %v859_v12 = vshll.u32 %v8773_v45, 16 }
 0x10d   : > { %3254 = vmatprep.subr.bf16.mxu1 %v11230_v0  ;;  %v811_v24 = vor.u32 %v810_v2, %v807_v1  ;;  %v8769_v1 = vld [vmem:[#allocation8 + $0x1e0] sm:$0xff]   ;;  %v841_v13 = vrot.slane %v839_v42, 3 }
 0x10e   : > { %v858_v15 = vrot.slane %v856_v3, 3  ;;  %v861_v23 = vrot.slane %v859_v12, 4 }
 0x10f   : > { %v9739_v44 = vsel %vm548_vm1, %v811_v24, %v819_v25  ;;  %v8771_v25 = vld [vmem:[#allocation8 + $0x1e8] sm:$0xff]  }
 0x110   : > { %3255 = vmatpush1.bf16.msra.mxu1 %v8760_v39  ;;  %v835_v39 = vrot.slane %v833_v6, 4  ;;  %v844_v6 = vrot.slane %v842_v46, 4  ;;  %v8865_v46 = vld [vmem:[%s9291_s11 + $0x14] sm:$0xff]   ;;  %v862_v3 = vor.u32 %v861_v23, %v858_v15 }
 0x111   : > { %3256 = vmatprep.subr.bf16.mxu1 %v11230_v0 }
 0x112   : > { %1985 = vmatmul.mubr.bf16.gmra.mrb[48].mxu0 %v9697_v10  ;;  %2643 = vmatmul.mubr.bf16.gmra.mrb[52].mxu1 %v9680_v29  ;;  %v836_v2 = vor.u32 %v835_v39, %v832_v34  ;;  %v8775_v34 = vld [vmem:[#allocation8 + $0x1f0] sm:$0xff]   ;;  %v845_v39 = vor.u32 %v844_v6, %v841_v13  ;;  %v8776_v6 = vld [vmem:[#allocation8 + $0x178] sm:$0xff]  }
 0x113   : > { %1992 = vmatprep.mubr.bf16.mxu0 %v9691_v61  ;;  %2650 = vmatprep.mubr.bf16.mxu1 %v9676_v26  ;;  %v8755_v26 = vld [vmem:[%s9291_s11 + $0x118] ss:$0 sps:$4 sm:$0xff]   ;;  %v8770_v13 = vld [vmem:[#allocation8 + $0x170] sm:$0xff]  }
 0x114   : > { %3257 = vmatpush1.bf16.msra.mxu1 %v8762_v54  ;;  %v847_v49 = vshrl.u32 %v8755_v26, 16  ;;  %v850_v54 = vshll.u32 %v8755_v26, 16  ;;  %v9753_v19 = vsel %vm548_vm1, %v828_v58, %v836_v2  ;;  %v9776_v58 = vld [vmem:[%s9291_s11 + $0x124] sm:$0xff]  }
 0x115   : > { %3258 = vmatprep.subr.bf16.mxu1 %v11230_v0  ;;  %v8765_v2 = vld [vmem:[#allocation8 + $0x160] sm:$0xff]  }
 0x116   : > { %v849_v30 = vrot.slane %v847_v49, 3  ;;  %v852_v24 = vrot.slane %v850_v54, 4  ;;  %v8759_v49 = vld [vmem:[#allocation8 + $0x148] sm:$0xff]  }
 0x117   : > { %v8866_v54 = vld [vmem:[%s9291_s11 + $0x24] sm:$0xff]  }
 0x118   : > { %3259 = vmatpush1.bf16.msra.mxu1 %v8764_v16  ;;  %v867_v16 = vshll.u32 %v8774_v52, 16  ;;  %v853_v42 = vor.u32 %v852_v24, %v849_v30  ;;  %v8761_v52 = vld [vmem:[#allocation8 + $0x150] sm:$0xff]   ;;  %v8778_v30 = vld [vmem:[#allocation8 + $0x200] sm:$0xff]  }
 0x119   : > { %3260 = vmatprep.subr.bf16.mxu1 %v11230_v0  ;;  %v8869_v24 = vld [vmem:[%s9291_s11 + $0x54] sm:$0xff]  }
 0x11a   : > { %1993 = vmatmul.mubr.bf16.gmra.mrb[52].mxu0 %v9711_v33  ;;  %2651 = vmatmul.mubr.bf16.gmra.mrb[56].mxu1 %v9697_v10  ;;  %v869_v26 = vrot.slane %v867_v16, 4  ;;  %v9762_v45 = vsel %vm548_vm1, %v845_v39, %v853_v42 }
 0x11b   : > { %2000 = vmatprep.mubr.bf16.mxu0 %v9706_v37  ;;  %2658 = vmatprep.mubr.bf16.mxu1 %v9691_v61  ;;  %v9749_v61 = vld [vmem:[%s9291_s11 + $0x114] sm:$0xff]  }
 0x11c   : > { %3261 = vmatpush1.bf16.msra.mxu1 %v8766_v28  ;;  %v866_v28 = vrot.slane %v864_v41, 3  ;;  %v8868_v41 = vld [vmem:[%s9291_s11 + $0x44] sm:$0xff]  }
 0x11d   : > { %3262 = vmatprep.subr.bf16.mxu1 %v11230_v0 }
 0x11e   : > { %v870_v12 = vor.u32 %v869_v26, %v866_v28 }
 0x120   : > { %3263 = vmatpush1.bf16.msra.mxu1 %v8767_v43  ;;  %v8777_v43 = vld [vmem:[#allocation8 + $0x1f8] sm:$0xff]   ;;  %v9785_v16 = vsel %vm548_vm1, %v862_v3, %v870_v12 }
 0x121   : > { %3264 = vmatprep.subr.bf16.mxu1 %v11230_v0 }
 0x122   : > { %2001 = vmatmul.mubr.bf16.gmra.mrb[56].mxu0 %v9725_v4  ;;  %2659 = vmatmul.mubr.bf16.gmra.mrb[60].mxu1 %v9711_v33 }
 0x123   : > { %2008 = vmatprep.mubr.bf16.mxu0 %v9720_v17  ;;  %2666 = vmatprep.mubr.bf16.mxu1 %v9706_v37 }
 0x124   : > { %3265 = vmatpush1.bf16.msra.mxu1 %v8769_v1  ;;  %v8763_v1 = vld [vmem:[#allocation8 + $0x158] sm:$0xff]  }
 0x125   : > { %3266 = vmatprep.subr.bf16.mxu1 %v11230_v0 }
 0x128   : > { %3267 = vmatpush1.bf16.msra.mxu1 %v8771_v25  ;;  %v8870_v25 = vld [vmem:[%s9291_s11 + $0x64] sm:$0xff]  }
 0x129   : > { %3268 = vmatprep.subr.bf16.mxu1 %v11230_v0 }
 0x12a   : > { %2009 = vmatmul.mubr.bf16.gmra.mrb[60].mxu0 %v9739_v44  ;;  %2667 = vmatmul.mubr.bf16.gmra.mrb[64].mxu1 %v9725_v4 }
 0x12b   : > { %2016 = vmatprep.mubr.bf16.mxu0 %v9735_v31  ;;  %2674 = vmatprep.mubr.bf16.mxu1 %v9720_v17 }
 0x12c   : > { %3269 = vmatpush1.bf16.msra.mxu1 %v8775_v34 }
 0x12d   : > { %3270 = vmatprep.subr.bf16.mxu1 %v11230_v0 }
 0x130   : > { %3271 = vmatpush1.bf16.msra.mxu1 %v8777_v43  ;;  %v8782_v43 = vld [vmem:[#allocation8 + $0x220] sm:$0xff]  }
 0x132   : > { %2017 = vmatmul.mubr.bf16.gmra.mrb[64].mxu0 %v9753_v19  ;;  %2675 = vmatmul.mubr.bf16.gmra.mrb[68].mxu1 %v9739_v44 }
 0x133   : > { %2024 = vmatprep.mubr.bf16.mxu0 %v9749_v61  ;;  %2682 = vmatprep.mubr.bf16.mxu1 %v9735_v31 }
 0x13a   : > { %2025 = vmatmul.mubr.bf16.gmra.mrb[68].mxu0 %v9762_v45  ;;  %2683 = vmatmul.mubr.bf16.gmra.mrb[72].mxu1 %v9753_v19 }
 0x13b   : > { %2562 = vmatprep.mubr.bf16.mxu0 %v8865_v46  ;;  %2690 = vmatprep.mubr.bf16.mxu1 %v9749_v61  ;;  %v8783_v46 = vld [vmem:[#allocation8 + $0x228] sm:$0xff]  }
 0x142   : > { %2563 = vmatmul.mubr.bf16.vlgmr.msra.gmra.mrb[72].mxu0 %v9441_v20  ;;  %v8867_v20 = vld [vmem:[%s9291_s11 + $0x34] sm:$0xff]   ;;  %2691 = vmatmul.mubr.bf16.gmra.mrb[76].mxu1 %v9762_v45 }
 0x143   : > { %8091 = vmatpush3.bf16.msra.mxu0 %v9687_v9  ;;  %2570 = vmatprep.mubr.bf16.mxu0 %v8866_v54  ;;  %v8768_v9 = vld [vmem:[#allocation8 + $0x168] sm:$0xff]  }
 0x144   : > { %8092 = vmatprep.subr.bf16.mxu0 %v8759_v49  ;;  %2698 = vmatprep.mubr.bf16.mxu1 %v9776_v58 }
 0x147   : > { %8093 = vmatpush3.bf16.msra.mxu0 %v8759_v49  ;;  %v8784_v49 = vld [vmem:[#allocation8 + $0x230] sm:$0xff]  }
 0x148   : > { %8094 = vmatprep.subr.bf16.mxu0 %v8761_v52 }
 0x14a   : > { %2571 = vmatmul.mubr.bf16.gmra.mrb[76].mxu0 %v9468_v48  ;;  %2699 = vmatmul.mubr.bf16.gmra.mrb[80].mxu1 %v9785_v16 }
 0x14b   : > { %8095 = vmatpush3.bf16.msra.mxu0 %v8761_v52  ;;  %2578 = vmatprep.mubr.bf16.mxu0 %v8867_v20 }
 0x14c   : > { %8096 = vmatprep.subr.bf16.mxu0 %v8763_v1  ;;  %3272 = vmatprep.mubr.bf16.mxu1 %v8866_v54 }
 0x14f   : > { %8097 = vmatpush3.bf16.msra.mxu0 %v8763_v1 }
 0x150   : > { %8098 = vmatprep.subr.bf16.mxu0 %v8765_v2 }
 0x152   : > { %2579 = vmatmul.mubr.bf16.gmra.mrb[80].mxu0 %v9502_v18  ;;  %3273 = vmatmul.mubr.bf16.vlgmr.msra.gmra.mrb[84].mxu1 %v9468_v48  ;;  %v8779_v48 = vld [vmem:[#allocation8 + $0x208] sm:$0xff]  }
 0x153   : > { %2586 = vmatprep.mubr.bf16.mxu0 %v8868_v41  ;;  %8099 = vmatpush3.bf16.msra.mxu0 %v8765_v2 }
 0x154   : > { %8100 = vmatprep.subr.bf16.mxu0 %v8768_v9  ;;  %3280 = vmatprep.mubr.bf16.mxu1 %v8867_v20 }
 0x157   : > { %8101 = vmatpush3.bf16.msra.mxu0 %v8768_v9  ;;  %v8872_v9 = vld [vmem:[%s9291_s11 + $0x84] sm:$0xff]  }
 0x158   : > { %8102 = vmatprep.subr.bf16.mxu0 %v8770_v13 }
 0x15a   : > { %2587 = vmatmul.mubr.bf16.gmra.mrb[84].mxu0 %v9526_v5  ;;  %3281 = vmatmul.mubr.bf16.gmra.mrb[88].mxu1 %v9502_v18  ;;  %v8780_v18 = vld [vmem:[#allocation8 + $0x210] sm:$0xff]  }
 0x15b   : > { %2594 = vmatprep.mubr.bf16.mxu0 %v8869_v24  ;;  %8103 = vmatpush3.bf16.msra.mxu0 %v8770_v13 }
 0x15c   : > { %8104 = vmatprep.subr.bf16.mxu0 %v8776_v6  ;;  %3288 = vmatprep.mubr.bf16.mxu1 %v8868_v41 }
 0x15f   : > { %8105 = vmatpush3.bf16.msra.mxu0 %v8776_v6  ;;  %v8785_v6 = vld [vmem:[#allocation8 + $0x238] sm:$0xff]  }
 0x160   : > { %8142 = vmatprep.subr.bf16.mxu0 %v8778_v30 }
 0x162   : > { %2595 = vmatmul.mubr.bf16.gmra.mrb[88].mxu0 %v9558_v22  ;;  %3289 = vmatmul.mubr.bf16.gmra.mrb[92].mxu1 %v9526_v5  ;;  %v8781_v5 = vld [vmem:[#allocation8 + $0x218] sm:$0xff]  }
 0x163   : > { %2602 = vmatprep.mubr.bf16.mxu0 %v8870_v25  ;;  %3296 = vmatprep.mubr.bf16.mxu1 %v8869_v24 }
 0x166   : > { %v8056_v15 = vpop.f32.mrb[0].mxu1 }
 0x167   : > { %v2067_v23 = vpop.f32.mrb[1].mxu1 }
 0x168   : > { %v8057_v28 = vpop.f32.mrb[2].mxu1 }
 0x169   : > { %v2070_v26 = vpop.f32.mrb[3].mxu1 }
 0x16a   : > { %2603 = vmatmul.mubr.bf16.gmra.mrb[92].mxu0 %v9584_v56  ;;  %3297 = vmatmul.mubr.bf16.gmra.mrb[96].mxu1 %v9558_v22  ;;  %v8871_v22 = vld [vmem:[%s9291_s11 + $0x74] sm:$0xff]  }
 0x16b   : > { %8106 = vmatprep.mubr.bf16.mxu0 %v9357_v40  ;;  %3304 = vmatprep.mubr.bf16.mxu1 %v8870_v25 }
 0x16e   : > { %v9800_v34 = vpop.f32.mrb[4].mxu1 }
 0x16f   : > { %v2083_v40 = vpop.f32.mrb[5].mxu1 }
 0x170   : > { %v9802_v39 = vpop.f32.mrb[6].mxu1 }
 0x171   : > { %v2086_v42 = vpop.f32.mrb[7].mxu1 }
 0x172   : > { %8107 = vmatmul.mubr.bf16.vlgmr.msra.gmra.mrb[96].mxu0 %v9374_v63  ;;  %3305 = vmatmul.mubr.bf16.gmra.mrb[100].mxu1 %v9584_v56 }
 0x173   : > { %8143 = vmatpush3.bf16.msra.mxu0 %v8778_v30  ;;  %8110 = vmatprep.mubr.bf16.mxu0 %v9383_v7 }
 0x174   : > { %8144 = vmatprep.subr.bf16.mxu0 %v8779_v48  ;;  %3312 = vmatprep.mubr.bf16.mxu1 %v8871_v22 }
 0x177   : > { %8145 = vmatpush3.bf16.msra.mxu0 %v8779_v48 }
 0x178   : > { %8146 = vmatprep.subr.bf16.mxu0 %v8780_v18 }
 0x179   : > { %v9810_v54 = vpop.f32.mrb[8].mxu1 }
 0x17a   : > { %8111 = vmatmul.mubr.bf16.gmra.mrb[100].mxu0 %v9411_v47  ;;  %3313 = vmatmul.mubr.bf16.gmra.mrb[104].mxu1 %v9611_v50  ;;  %v9815_v56 = vpop.f32.mrb[9].mxu1 }
 0x17b   : > { %8114 = vmatprep.mubr.bf16.mxu0 %v9423_v60  ;;  %8147 = vmatpush3.bf16.msra.mxu0 %v8780_v18  ;;  %v9818_v3 = vpop.f32.mrb[10].mxu1 }
 0x17c   : > { %8148 = vmatprep.subr.bf16.mxu0 %v8781_v5  ;;  %3320 = vmatprep.mubr.bf16.mxu1 %v8872_v9  ;;  %v9822_v41 = vpop.f32.mrb[11].mxu1  ;;  %v8793_v9 = vld [vmem:[#allocation10 + $0x80] sm:$0xff]  }
 0x17d   : > { %8194 = vmatprep.subr.bf16.mxu1 %v8793_v9 }
 0x17e   : > { %8195 = vmatpush3.bf16.msra.mxu1 %v8793_v9  ;;  %v8876_v9 = vld [vmem:[%s9291_s11 + $0xc4] sm:$0xff]  }
 0x17f   : > { %8149 = vmatpush3.bf16.msra.mxu0 %v8781_v5 }
 0x180   : > { %8150 = vmatprep.subr.bf16.mxu0 %v8782_v43 }
 0x182   : > { %8115 = vmatmul.mubr.bf16.gmra.mrb[104].mxu0 %v9451_v27  ;;  %3321 = vmatmul.mubr.bf16.gmra.mrb[108].mxu1 %v9630_v8 }
 0x183   : > { %8118 = vmatprep.mubr.bf16.mxu0 %v9475_v55  ;;  %8151 = vmatpush3.bf16.msra.mxu0 %v8782_v43 }
 0x184   : > { %8152 = vmatprep.subr.bf16.mxu0 %v8783_v46 }
 0x185   : > { %v1890_v52 = vpop.f32.mrb[0].mxu0 }
 0x186   : > { %v9812_v1 = vadd.f32 %v2067_v23, %v1890_v52  ;;  %v1892_v2 = vpop.f32.mrb[1].mxu0  ;;  %v8873_v23 = vld [vmem:[%s9291_s11 + $0x94] sm:$0xff]  }
 0x187   : > { %v1893_v20 = vpop.f32.mrb[2].mxu0  ;;  %8153 = vmatpush3.bf16.msra.mxu0 %v8783_v46  ;;  %3328 = vmatprep.mubr.bf16.mxu1 %v8873_v23  ;;  %v8874_v46 = vld [vmem:[%s9291_s11 + $0xa4] sm:$0xff]  }
 0x188   : > { %v9820_v12 = vadd.f32 %v2070_v26, %v1893_v20  ;;  %v1895_v13 = vpop.f32.mrb[3].mxu0  ;;  %8154 = vmatprep.subr.bf16.mxu0 %v8784_v49 }
 0x18a   : > { %8119 = vmatmul.mubr.bf16.gmra.mrb[108].mxu0 %v9490_v11  ;;  %3329 = vmatmul.mubr.bf16.gmra.mrb[112].mxu1 %v9649_v36 }
 0x18b   : > { %8122 = vmatprep.mubr.bf16.mxu0 %v9517_v32  ;;  %8155 = vmatpush3.bf16.msra.mxu0 %v8784_v49 }
 0x18c   : > { %8156 = vmatprep.subr.bf16.mxu0 %v8785_v6  ;;  %3336 = vmatprep.mubr.bf16.mxu1 %v8874_v46 }
 0x18d   : > { %v1898_v50 = vpop.f32.mrb[4].mxu0 }
 0x18e   : > { %v9826_v30 = vadd.f32 %v8056_v15, %v1898_v50  ;;  %v1900_v24 = vpop.f32.mrb[5].mxu0  ;;  %v8875_v50 = vld [vmem:[%s9291_s11 + $0xb4] sm:$0xff]  }
 0x18f   : > { %v1901_v25 = vpop.f32.mrb[6].mxu0  ;;  %8157 = vmatpush3.bf16.msra.mxu0 %v8785_v6  ;;  %v8786_v6 = vld [vmem:[%s9291_s11 + $0x124] sm:$0xff]  }
 0x190   : > { %v9830_v48 = vadd.f32 %v8057_v28, %v1901_v25  ;;  %v1903_v26 = vpop.f32.mrb[7].mxu0 }
 0x191   : > { %v9834_v18 = vpop.f32.mrb[12].mxu1  ;;  %v8787_v26 = vld [vmem:[%s9291_s11 + $0x12c] ss:$0 sps:$4 sm:$0x11]  }
 0x192   : > { %8123 = vmatmul.mubr.bf16.gmra.mrb[112].mxu0 %v9536_v59  ;;  %v9836_v15 = vpop.f32.mrb[13].mxu1  ;;  %3337 = vmatmul.mubr.bf16.gmra.mrb[116].mxu1 %v9666_v51 }
 0x193   : > { %8126 = vmatprep.mubr.bf16.mxu0 %v9551_v14  ;;  %v9841_v22 = vpop.f32.mrb[14].mxu1  ;;  %3344 = vmatprep.mubr.bf16.mxu1 %v8875_v50 }
 0x194   : > { %v9844_v49 = vpop.f32.mrb[15].mxu1 }
 0x195   : > { %v1906_v5 = vpop.f32.mrb[8].mxu0 }
 0x196   : > { %v9838_v43 = vadd.f32 %v2083_v40, %v1906_v5  ;;  %v1908_v8 = vpop.f32.mrb[9].mxu0  ;;  %v1549_v5 = vshll.u32 %v8786_v6, 16 }
 0x197   : > { %v1909_v28 = vpop.f32.mrb[10].mxu0 }
 0x198   : > { %v9846_v52 = vadd.f32 %v2086_v42, %v1909_v28  ;;  %v1911_v2 = vpop.f32.mrb[11].mxu0 }
 0x199   : > { %v9856_v42 = vpop.f32.mrb[16].mxu1  ;;  %v1547_v2 = vshrl.u32 %v8786_v6, 16 }
 0x19a   : > { %8127 = vmatmul.mubr.bf16.gmra.mrb[116].mxu0 %v9574_v38  ;;  %v9861_v23 = vpop.f32.mrb[17].mxu1  ;;  %3345 = vmatmul.mubr.bf16.gmra.mrb[120].mxu1 %v9680_v29 }
 0x19b   : > { %8130 = vmatprep.mubr.bf16.mxu0 %v9589_v62  ;;  %3352 = vmatprep.mubr.bf16.mxu1 %v8876_v9 }
 0x19d   : > { %v1914_v40 = vpop.f32.mrb[12].mxu0 }
 0x19e   : > { %v9851_v20 = vadd.f32 %v9800_v34, %v1914_v40  ;;  %v1916_v36 = vpop.f32.mrb[13].mxu0  ;;  %v9863_v34 = vpop.f32.mrb[18].mxu1  ;;  %v1551_v40 = vrot.slane %v1549_v5, 1 }
 0x19f   : > { %v1917_v13 = vpop.f32.mrb[14].mxu0  ;;  %v9866_v51 = vpop.f32.mrb[19].mxu1  ;;  %v1554_v36 = vshll.u32 %v8787_v26, 16 }
 0x1a0   : > { %v9859_v24 = vadd.f32 %v9802_v39, %v1917_v13  ;;  %v1919_v25 = vpop.f32.mrb[15].mxu0  ;;  %v1552_v29 = vor.u32 %v1551_v40, %v1547_v2 }
 0x1a2   : > { %8131 = vmatmul.mubr.bf16.gmra.mrb[120].mxu0 %v9607_v53  ;;  %3353 = vmatmul.mubr.bf16.gmra.mrb[124].mxu1 %v9697_v10 }
 0x1a3   : > { %8134 = vmatprep.mubr.bf16.mxu0 %v9624_v57 }
 0x1a5   : > { %v1922_v8 = vpop.f32.mrb[16].mxu0  ;;  %v9878_v25 = vpop.f32.mrb[20].mxu1 }
 0x1a6   : > { %v9871_v39 = vadd.f32 %v9815_v56, %v1922_v8  ;;  %v1924_v28 = vpop.f32.mrb[17].mxu0  ;;  %v9881_v56 = vpop.f32.mrb[21].mxu1  ;;  %v1556_v8 = vrot.slane %v1554_v36, 1  ;;  %v8794_v36 = vld [vmem:[#allocation10 + $0x88] sm:$0xff]  }
 0x1a7   : > { %v1925_v46 = vpop.f32.mrb[18].mxu0  ;;  %v9884_v6 = vpop.f32.mrb[22].mxu1  ;;  %8196 = vmatprep.subr.bf16.mxu1 %v8794_v36 }
 0x1a8   : > { %v9876_v13 = vadd.f32 %v9822_v41, %v1925_v46  ;;  %v1927_v50 = vpop.f32.mrb[19].mxu0  ;;  %v9886_v26 = vpop.f32.mrb[23].mxu1  ;;  %v9893_v9 = vsel %vm1329_vm0, %v1552_v29, %v1556_v8  ;;  %8197 = vmatpush3.bf16.msra.mxu1 %v8794_v36 }
 0x1a9   : > { %v8877_v50 = vld [vmem:[%s9291_s11 + $0xd4] sm:$0xff]  }
 0x1aa   : > { %8135 = vmatmul.mubr.bf16.gmra.mrb[124].mxu0 %v9636_v21  ;;  %3360 = vmatprep.mubr.bf16.mxu1 %v8877_v50 }
 0x1ab   : > { %8138 = vmatprep.mubr.bf16.mxu0 %v9646_v35  ;;  %3361 = vmatmul.mubr.bf16.gmra.mrb[128].mxu1 %v9711_v33 }
 0x1ac   : > { %3368 = vmatprep.mubr.bf16.mxu1 %v9706_v37 }
 0x1ad   : > { %v1930_v5 = vpop.f32.mrb[20].mxu0 }
 0x1ae   : > { %v9889_v41 = vadd.f32 %v9810_v54, %v1930_v5  ;;  %v1932_v28 = vpop.f32.mrb[21].mxu0  ;;  %v9901_v54 = vpop.f32.mrb[24].mxu1 }
 0x1af   : > { %v1933_v46 = vpop.f32.mrb[22].mxu0  ;;  %v9903_v5 = vpop.f32.mrb[25].mxu1 }
 0x1b0   : > { %v9897_v2 = vadd.f32 %v9818_v3, %v1933_v46  ;;  %v1935_v40 = vpop.f32.mrb[23].mxu0  ;;  %v9909_v3 = vpop.f32.mrb[26].mxu1 }
 0x1b1   : > { %v9912_v46 = vpop.f32.mrb[27].mxu1 }
 0x1b2   : > { %8139 = vmatmul.mubr.bf16.gmra.mrb[128].mxu0 %v9893_v9 }
 0x1b3   : > { %8158 = vmatprep.mubr.bf16.mxu0 %v9374_v63  ;;  %3369 = vmatmul.mubr.bf16.gmra.mrb[132].mxu1 %v9725_v4 }
 0x1b4   : > { %3376 = vmatprep.mubr.bf16.mxu1 %v9720_v17 }
 0x1b5   : > { %v1938_v10 = vpop.f32.mrb[24].mxu0 }
 0x1b6   : > { %v9906_v29 = vadd.f32 %v9836_v15, %v1938_v10  ;;  %v1940_v8 = vpop.f32.mrb[25].mxu0  ;;  %v9927_v10 = vpop.f32.mrb[28].mxu1 }
 0x1b7   : > { %v1941_v28 = vpop.f32.mrb[26].mxu0  ;;  %v8795_v8 = vld [vmem:[#allocation10 + $0x90] sm:$0xff]  }
 0x1b8   : > { %v9915_v63 = vadd.f32 %v9844_v49, %v1941_v28  ;;  %v1943_v50 = vpop.f32.mrb[27].mxu0  ;;  %8198 = vmatprep.subr.bf16.mxu1 %v8795_v8 }
 0x1b9   : > { %8199 = vmatpush3.bf16.msra.mxu1 %v8795_v8 }
 0x1ba   : > { %8159 = vmatmul.mubr.bf16.vlgmr.msra.gmra.mrb[132].mxu0 %v9383_v7  ;;  %v9929_v7 = vpop.f32.mrb[29].mxu1 }
 0x1bb   : > { %8162 = vmatprep.mubr.bf16.mxu0 %v9411_v47  ;;  %v9932_v47 = vpop.f32.mrb[30].mxu1  ;;  %3377 = vmatmul.mubr.bf16.gmra.mrb[136].mxu1 %v9739_v44 }
 0x1bc   : > { %v9935_v4 = vpop.f32.mrb[31].mxu1  ;;  %3384 = vmatprep.mubr.bf16.mxu1 %v9735_v31 }
 0x1bd   : > { %v1946_v15 = vpop.f32.mrb[28].mxu0 }
 0x1be   : > { %v9920_v40 = vadd.f32 %v9834_v18, %v1946_v15  ;;  %v1948_v33 = vpop.f32.mrb[29].mxu0  ;;  %v9945_v15 = vpop.f32.mrb[32].mxu1 }
 0x1bf   : > { %v1949_v36 = vpop.f32.mrb[30].mxu0 }
 0x1c0   : > { %v9925_v37 = vadd.f32 %v9841_v22, %v1949_v36  ;;  %v1951_v49 = vpop.f32.mrb[31].mxu0 }
 0x1c2   : > { %8163 = vmatmul.mubr.bf16.gmra.mrb[136].mxu0 %v9423_v60 }
 0x1c3   : > { %8166 = vmatprep.mubr.bf16.mxu0 %v9451_v27  ;;  %v9948_v27 = vpop.f32.mrb[33].mxu1  ;;  %3385 = vmatmul.mubr.bf16.gmra.mrb[140].mxu1 %v9753_v19 }
 0x1c4   : > { %3392 = vmatprep.mubr.bf16.mxu1 %v9749_v61 }
 0x1c5   : > { %v1954_v17 = vpop.f32.mrb[32].mxu0 }
 0x1c6   : > { %v9938_v18 = vadd.f32 %v9861_v23, %v1954_v17  ;;  %v1956_v22 = vpop.f32.mrb[33].mxu0  ;;  %v9951_v23 = vpop.f32.mrb[34].mxu1 }
 0x1c7   : > { %v1957_v28 = vpop.f32.mrb[34].mxu0  ;;  %v9953_v44 = vpop.f32.mrb[35].mxu1  ;;  %v8790_v22 = vld [vmem:[%s9291_s11 + $0x138] ss:$0 sps:$4 sm:$0xff]  }
 0x1c8   : > { %v9943_v60 = vadd.f32 %v9866_v51, %v1957_v28  ;;  %v1959_v50 = vpop.f32.mrb[35].mxu0  ;;  %v9963_v49 = vpop.f32.mrb[36].mxu1  ;;  %v8796_v28 = vld [vmem:[#allocation10 + $0x98] sm:$0xff]  }
 0x1c9   : > { %v2614_v8 = vpop.f32.mrb[37].mxu1  ;;  %8200 = vmatprep.subr.bf16.mxu1 %v8796_v28 }
 0x1ca   : > { %8167 = vmatmul.mubr.bf16.gmra.mrb[140].mxu0 %v9475_v55  ;;  %v9967_v17 = vpop.f32.mrb[38].mxu1  ;;  %8201 = vmatpush3.bf16.msra.mxu1 %v8796_v28 }
 0x1cb   : > { %8170 = vmatprep.mubr.bf16.mxu0 %v9490_v11  ;;  %v2617_v19 = vpop.f32.mrb[39].mxu1  ;;  %3393 = vmatmul.mubr.bf16.gmra.mrb[144].mxu1 %v9762_v45 }
 0x1cc   : > { %3400 = vmatprep.mubr.bf16.mxu1 %v9776_v58 }
 0x1cd   : > { %v1962_v33 = vpop.f32.mrb[36].mxu0  ;;  %v9979_v19 = vpop.f32.mrb[40].mxu1 }
 0x1ce   : > { %v9956_v31 = vadd.f32 %v9856_v42, %v1962_v33  ;;  %v1964_v51 = vpop.f32.mrb[37].mxu0  ;;  %v8789_v42 = vld [vmem:[%s9291_s11 + $0x130] sm:$0xf8]  }
 0x1cf   : > { %v1965_v36 = vpop.f32.mrb[38].mxu0  ;;  %v881_v51 = vshrl.u32 %v8790_v22, 16 }
 0x1d0   : > { %v9961_v55 = vadd.f32 %v9863_v34, %v1965_v36  ;;  %v1967_v11 = vpop.f32.mrb[39].mxu0  ;;  %v884_v36 = vshll.u32 %v8790_v22, 16 }
 0x1d2   : > { %8171 = vmatmul.mubr.bf16.gmra.mrb[144].mxu0 %v9517_v32  ;;  %v873_v32 = vshrl.u32 %v8789_v42, 16  ;;  %v886_v0 = vrot.slane %v884_v36, 4 }
 0x1d3   : > { %8174 = vmatprep.mubr.bf16.mxu0 %v9536_v59  ;;  %v876_v59 = vshll.u32 %v8789_v42, 16  ;;  %v883_v42 = vrot.slane %v881_v51, 3  ;;  %3401 = vmatmul.mubr.bf16.gmra.mrb[148].mxu1 %v9785_v16 }
 0x1d4   : > { %v875_v58 = vrot.slane %v873_v32, 3 }
 0x1d5   : > { %v1970_v50 = vpop.f32.mrb[40].mxu0 }
 0x1d6   : > { %v9972_v61 = vadd.f32 %v9881_v56, %v1970_v50  ;;  %v1972_v34 = vpop.f32.mrb[41].mxu0  ;;  %v2622_v56 = vpop.f32.mrb[41].mxu1  ;;  %v8788_v50 = vld [vmem:[%s9291_s11 + $0x134] sm:$0xff]  }
 0x1d7   : > { %v1973_v33 = vpop.f32.mrb[42].mxu0  ;;  %v9983_v45 = vpop.f32.mrb[42].mxu1  ;;  %v878_v34 = vrot.slane %v876_v59, 4  ;;  %3408 = vmatprep.mubr.bf16.mxu1 %v8788_v50 }
 0x1d8   : > { %v9977_v11 = vadd.f32 %v9886_v26, %v1973_v33  ;;  %v1975_v8 = vpop.f32.mrb[43].mxu0  ;;  %v2625_v22 = vpop.f32.mrb[43].mxu1 }
 0x1d9   : > { %v9993_v59 = vpop.f32.mrb[44].mxu1 }
 0x1da   : > { %8175 = vmatmul.mubr.bf16.gmra.mrb[148].mxu0 %v9551_v14  ;;  %v879_v14 = vor.u32 %v878_v34, %v875_v58  ;;  %v2630_v51 = vpop.f32.mrb[45].mxu1  ;;  %v8791_v34 = vld [vmem:[%s9291_s11 + $0x134] sm:$0xff]  }
 0x1db   : > { %8178 = vmatprep.mubr.bf16.mxu0 %v9574_v38  ;;  %v887_v38 = vor.u32 %v886_v0, %v883_v42  ;;  %v9998_v16 = vpop.f32.mrb[46].mxu1 }
 0x1dc   : > { %v2633_v36 = vpop.f32.mrb[47].mxu1 }
 0x1dd   : > { %v1978_v28 = vpop.f32.mrb[44].mxu0  ;;  %v10007_v22 = vpop.f32.mrb[48].mxu1 }
 0x1de   : > { %v9987_v26 = vadd.f32 %v9878_v25, %v1978_v28  ;;  %v1980_v33 = vpop.f32.mrb[45].mxu0  ;;  %v888_v25 = vsel %vm548_vm1, %v879_v14, %v887_v38  ;;  %v2638_v28 = vpop.f32.mrb[49].mxu1 }
 0x1df   : > { %v1981_v8 = vpop.f32.mrb[46].mxu0  ;;  %3409 = vmatmul.mubr.bf16.gmra.mrb[152].mxu1 %v888_v25  ;;  %v8792_v33 = vld [vmem:[%s9291_s11 + $0x13c] ss:$0 sps:$4 sm:$0x11]   ;;  %v1559_v25 = vshrl.u32 %v8791_v34, 16 }
 0x1e0   : > { %v9991_v56 = vadd.f32 %v9884_v6, %v1981_v8  ;;  %v1983_v32 = vpop.f32.mrb[47].mxu0  ;;  %v1561_v8 = vshll.u32 %v8791_v34, 16 }
 0x1e2   : > { %8179 = vmatmul.mubr.bf16.gmra.mrb[152].mxu0 %v9589_v62  ;;  %v1563_v36 = vrot.slane %v1561_v8, 1 }
 0x1e3   : > { %8182 = vmatprep.mubr.bf16.mxu0 %v9607_v53  ;;  %v8797_v53 = vld [vmem:[#allocation10 + $0xa0] sm:$0xff]  }
 0x1e4   : > { %8202 = vmatprep.subr.bf16.mxu1 %v8797_v53 }
 0x1e5   : > { %v1986_v50 = vpop.f32.mrb[48].mxu0  ;;  %8203 = vmatpush3.bf16.msra.mxu1 %v8797_v53 }
 0x1e6   : > { %v10001_v0 = vadd.f32 %v9903_v5, %v1986_v50  ;;  %v1988_v6 = vpop.f32.mrb[49].mxu0  ;;  %v10012_v5 = vpop.f32.mrb[50].mxu1  ;;  %v1566_v50 = vshll.u32 %v8792_v33, 16 }
 0x1e7   : > { %v1989_v58 = vpop.f32.mrb[50].mxu0  ;;  %v2641_v14 = vpop.f32.mrb[51].mxu1 }
 0x1e8   : > { %11244 = vst [vmem:[#allocation15_spill] sm:$0xff] %v10001_v0  ;;  %v10005_v42 = vadd.f32 %v9912_v46, %v1989_v58  ;;  %v1991_v62 = vpop.f32.mrb[51].mxu0  ;;  %v10020_v6 = vpop.f32.mrb[52].mxu1  ;;  %v1568_v53 = vrot.slane %v1566_v50, 1 }
 0x1e9   : > { %v2646_v58 = vpop.f32.mrb[53].mxu1  ;;  %v1564_v62 = vor.u32 %v1563_v36, %v1559_v25  ;;  %v8798_v25 = vld [vmem:[#allocation10 + $0xa8] sm:$0xff]  }
 0x1ea   : > { %11245 = vst [vmem:[#allocation16_spill] sm:$0xff] %v10005_v42  ;;  %8183 = vmatmul.mubr.bf16.gmra.mrb[156].mxu0 %v9624_v57  ;;  %8204 = vmatprep.subr.bf16.mxu1 %v8798_v25 }
 0x1eb   : > { %8186 = vmatprep.mubr.bf16.mxu0 %v9636_v21  ;;  %v1569_v8 = vsel %vm1329_vm0, %v1564_v62, %v1568_v53  ;;  %8205 = vmatpush3.bf16.msra.mxu1 %v8798_v25 }
 0x1ed   : > { %v1994_v38 = vpop.f32.mrb[52].mxu0 }
 0x1ee   : > { %v10015_v46 = vadd.f32 %v9901_v54, %v1994_v38  ;;  %v1996_v32 = vpop.f32.mrb[53].mxu0  ;;  %v10024_v54 = vpop.f32.mrb[54].mxu1 }
 0x1ef   : > { %v1997_v51 = vpop.f32.mrb[54].mxu0  ;;  %v2649_v28 = vpop.f32.mrb[55].mxu1 }
 0x1f0   : > { %11246 = vst [vmem:[#allocation17_spill] sm:$0xff] %v10015_v46  ;;  %v10018_v57 = vadd.f32 %v9909_v3, %v1997_v51  ;;  %v1999_v21 = vpop.f32.mrb[55].mxu0  ;;  %v10033_v32 = vpop.f32.mrb[56].mxu1 }
 0x1f2   : > { %11247 = vst [vmem:[#allocation18_spill] sm:$0xff] %v10018_v57  ;;  %8187 = vmatmul.mubr.bf16.gmra.mrb[160].mxu0 %v9646_v35 }
 0x1f3   : > { %8190 = vmatprep.mubr.bf16.mxu0 %v9893_v9  ;;  %v2654_v9 = vpop.f32.mrb[57].mxu1 }
 0x1f4   : > { %v10035_v51 = vpop.f32.mrb[58].mxu1 }
 0x1f5   : > { %v2002_v14 = vpop.f32.mrb[56].mxu0  ;;  %v2657_v36 = vpop.f32.mrb[59].mxu1 }
 0x1f6   : > { %v10027_v34 = vadd.f32 %v9929_v7, %v2002_v14  ;;  %v2004_v33 = vpop.f32.mrb[57].mxu0  ;;  %v10043_v53 = vpop.f32.mrb[60].mxu1 }
 0x1f7   : > { %v2005_v3 = vpop.f32.mrb[58].mxu0  ;;  %v2662_v28 = vpop.f32.mrb[61].mxu1 }
 0x1f8   : > { %11248 = vst [vmem:[#allocation19_spill] sm:$0xff] %v10027_v34  ;;  %v10031_v38 = vadd.f32 %v9935_v4, %v2005_v3  ;;  %v2007_v35 = vpop.f32.mrb[59].mxu0  ;;  %v10045_v14 = vpop.f32.mrb[62].mxu1  ;;  %v8801_v28 = vld [vmem:[#allocation10] sm:$0xff]  }
 0x1f9   : > { %11252 = vst [vmem:[#allocation23_spill] sm:$0xff] %v10045_v14  ;;  %v2665_v33 = vpop.f32.mrb[63].mxu1 }
 0x1fa   : > { %11249 = vst [vmem:[#allocation20_spill] sm:$0xff] %v10031_v38  ;;  %8191 = vmatmul.mubr.bf16.gmra.mrb[164].mxu0 %v1569_v8 }
 0x1fd   : > { %v2010_v50 = vpop.f32.mrb[60].mxu0  ;;  %v10053_v36 = vpop.f32.mrb[64].mxu1 }
 0x1fe   : > { %v10038_v7 = vadd.f32 %v9927_v10, %v2010_v50  ;;  %v2012_v21 = vpop.f32.mrb[61].mxu0 }
 0x1ff   : > { %v2013_v58 = vpop.f32.mrb[62].mxu0  ;;  %v8799_v21 = vld [vmem:[#allocation10 + $0xb0] sm:$0xff]  }
 0x200   : > { %11250 = vst [vmem:[#allocation21_spill] sm:$0xff] %v10038_v7  ;;  %v10041_v4 = vadd.f32 %v9932_v47, %v2013_v58  ;;  %v2015_v62 = vpop.f32.mrb[63].mxu0  ;;  %v2670_v47 = vpop.f32.mrb[65].mxu1  ;;  %v8800_v58 = vld [vmem:[#allocation10 + $0x40] sm:$0xff]   ;;  %8206 = vmatprep.subr.bf16.mxu1 %v8799_v21  ;;  %v8808_v7 = vld [vmem:[#allocation10 + $0xb8] sm:$0xff]  }
 0x201   : > { %v10055_v50 = vpop.f32.mrb[66].mxu1  ;;  %7630 = vmatprep.subr.bf16.mxu0 %v8800_v58  ;;  %8207 = vmatpush3.bf16.msra.mxu1 %v8799_v21  ;;  %v8803_v47 = vld [vmem:[#allocation10 + $0x8] sm:$0xff]   ;;  %v8804_v58 = vld [vmem:[#allocation10 + $0x50] sm:$0xff]  }
 0x202   : > { %11251 = vst [vmem:[#allocation22_spill] sm:$0xff] %v10041_v4  ;;  %11255 = vst [vmem:[#allocation26_spill] sm:$0xff] %v10055_v50  ;;  %v2673_v62 = vpop.f32.mrb[67].mxu1  ;;  %7631 = vmatpush3.bf16.msra.mxu0 %v8801_v28  ;;  %8208 = vmatprep.subr.bf16.mxu1 %v8808_v7 }
 0x205   : > { %v2018_v3 = vpop.f32.mrb[64].mxu0  ;;  %8209 = vmatpush3.bf16.msra.mxu1 %v8808_v7 }
 0x206   : > { %v10048_v8 = vadd.f32 %v9948_v27, %v2018_v3  ;;  %v2020_v35 = vpop.f32.mrb[65].mxu0 }
 0x207   : > { %v2021_v10 = vpop.f32.mrb[66].mxu0  ;;  %v8802_v35 = vld [vmem:[#allocation10 + $0x48] sm:$0xff]  }
 0x208   : > { %11253 = vst [vmem:[#allocation24_spill] sm:$0xff] %v10048_v8  ;;  %v10051_v9 = vadd.f32 %v9953_v44, %v2021_v10  ;;  %v2023_v25 = vpop.f32.mrb[67].mxu0  ;;  %7632 = vmatprep.subr.bf16.mxu0 %v8802_v35 }
 0x209   : > { %7633 = vmatpush3.bf16.msra.mxu0 %v8803_v47 }
 0x20a   : > { %11254 = vst [vmem:[#allocation25_spill] sm:$0xff] %v10051_v9  ;;  %v10063_v9 = vpop.f32.mrb[68].mxu1  ;;  %7634 = vmatprep.subr.bf16.mxu0 %v8804_v58 }
 0x20b   : > { %11258 = vst [vmem:[#allocation29_spill] sm:$0xff] %v10063_v9  ;;  %v2678_v62 = vpop.f32.mrb[69].mxu1 }
 0x20c   : > { %v10065_v8 = vpop.f32.mrb[70].mxu1  ;;  %v8809_v62 = vld [vmem:[#allocation10 + $0x60] sm:$0xff]  }
 0x20d   : > { %v2026_v33 = vpop.f32.mrb[68].mxu0  ;;  %11259 = vst [vmem:[#allocation30_spill] sm:$0xff] %v10065_v8  ;;  %v8812_v8 = vld [vmem:[#allocation10 + $0x28] sm:$0xff]  }
 0x20e   : > { %v10058_v27 = vadd.f32 %v9945_v15, %v2026_v33  ;;  %v2028_v3 = vpop.f32.mrb[69].mxu0  ;;  %v2681_v15 = vpop.f32.mrb[71].mxu1  ;;  %v8805_v33 = vld [vmem:[#allocation10 + $0x10] sm:$0xff]  }
 0x20f   : > { %v2029_v44 = vpop.f32.mrb[70].mxu0  ;;  %7635 = vmatpush3.bf16.msra.mxu0 %v8805_v33 }
 0x210   : > { %11256 = vst [vmem:[#allocation27_spill] sm:$0xff] %v10058_v27  ;;  %v10061_v10 = vadd.f32 %v9951_v23, %v2029_v44  ;;  %v2031_v25 = vpop.f32.mrb[71].mxu0  ;;  %v8806_v23 = vld [vmem:[#allocation10 + $0x58] sm:$0xff]   ;;  %v8810_v27 = vld [vmem:[#allocation10 + $0x20] sm:$0xff]  }
 0x211   : > { %v8807_v25 = vld [vmem:[#allocation10 + $0x18] sm:$0xff]   ;;  %7636 = vmatprep.subr.bf16.mxu0 %v8806_v23 }
 0x212   : > { %11257 = vst [vmem:[#allocation28_spill] sm:$0xff] %v10061_v10  ;;  %v10071_v10 = vpop.f32.mrb[72].mxu1 }
 0x213   : > { %11260 = vst [vmem:[#allocation31_spill] sm:$0xff] %v10071_v10  ;;  %v2686_v35 = vpop.f32.mrb[73].mxu1  ;;  %7637 = vmatpush3.bf16.msra.mxu0 %v8807_v25  ;;  %v8813_v25 = vld [vmem:[#allocation10 + $0x70] sm:$0xff]  }
 0x214   : > { %v10073_v47 = vpop.f32.mrb[74].mxu1  ;;  %7638 = vmatprep.subr.bf16.mxu0 %v8809_v62 }
 0x215   : > { %v10067_v3 = vpop.f32.mrb[72].mxu0  ;;  %11261 = vst [vmem:[#allocation32_spill] sm:$0xff] %v10073_v47  ;;  %v2689_v15 = vpop.f32.mrb[75].mxu1  ;;  %v8814_v47 = vld [vmem:[#allocation10 + $0x30] sm:$0xff]  }
 0x216   : > { %v2566_v21 = vpop.f32.mrb[73].mxu0 }
 0x217   : > { %v10069_v28 = vpop.f32.mrb[74].mxu0  ;;  %7639 = vmatpush3.bf16.msra.mxu0 %v8810_v27  ;;  %v8811_v21 = vld [vmem:[#allocation10 + $0x68] sm:$0xff]  }
 0x218   : > { %v2569_v44 = vpop.f32.mrb[75].mxu0  ;;  %7640 = vmatprep.subr.bf16.mxu0 %v8811_v21 }
 0x219   : > { %v10075_v44 = vpop.f32.mrb[76].mxu1 }
 0x21a   : > { %11262 = vst [vmem:[#allocation33_spill] sm:$0xff] %v10075_v44  ;;  %v2694_v34 = vpop.f32.mrb[77].mxu1  ;;  %v8816_v44 = vld [vmem:[#allocation10 + $0x38] sm:$0xff]  }
 0x21b   : > { %7641 = vmatpush3.bf16.msra.mxu0 %v8812_v8  ;;  %v10077_v23 = vpop.f32.mrb[78].mxu1 }
 0x21c   : > { %11263 = vst [vmem:[#allocation34_spill] sm:$0xff] %v10077_v23  ;;  %v2697_v35 = vpop.f32.mrb[79].mxu1  ;;  %7642 = vmatprep.subr.bf16.mxu0 %v8813_v25 }
 0x21d   : > { %v2572_v38 = vpop.f32.mrb[76].mxu0  ;;  %v10081_v21 = vpop.f32.mrb[80].mxu1 }
 0x21e   : > { %v2574_v58 = vpop.f32.mrb[77].mxu0  ;;  %11264 = vst [vmem:[#allocation35_spill] sm:$0xff] %v10081_v21  ;;  %v2702_v34 = vpop.f32.mrb[81].mxu1 }
 0x21f   : > { %v2575_v33 = vpop.f32.mrb[78].mxu0  ;;  %7643 = vmatpush3.bf16.msra.mxu0 %v8814_v47  ;;  %v10083_v8 = vpop.f32.mrb[82].mxu1 }
 0x220   : > { %v2577_v4 = vpop.f32.mrb[79].mxu0  ;;  %11265 = vst [vmem:[#allocation36_spill] sm:$0xff] %v10083_v8  ;;  %v2705_v35 = vpop.f32.mrb[83].mxu1  ;;  %v8817_v8 = vld [vmem:[#allocation10 + $0x100] sm:$0xff]  }
 0x221   : > { %v8815_v4 = vld [vmem:[#allocation10 + $0x78] sm:$0xff]   ;;  %7766 = vmatprep.subr.bf16.mxu1 %v8817_v8 }
 0x222   : > { %7644 = vmatprep.subr.bf16.mxu0 %v8815_v4 }
 0x223   : > { %7645 = vmatpush3.bf16.msra.mxu0 %v8816_v44 }
 0x225   : > { %v2580_v15 = vpop.f32.mrb[80].mxu0  ;;  %v10085_v47 = vpop.f32.mrb[84].mxu1 }
 0x226   : > { %v2582_v62 = vpop.f32.mrb[81].mxu0  ;;  %11266 = vst [vmem:[#allocation37_spill] sm:$0xff] %v10085_v47  ;;  %v3276_v10 = vpop.f32.mrb[85].mxu1 }
 0x227   : > { %v10079_v27 = vpop.f32.mrb[82].mxu0  ;;  %v10087_v42 = vpop.f32.mrb[86].mxu1 }
 0x228   : > { %v2585_v58 = vpop.f32.mrb[83].mxu0  ;;  %11267 = vst [vmem:[#allocation38_spill] sm:$0xff] %v10087_v42 }
 0x229   : > { %v3279_v58 = vpop.f32.mrb[87].mxu1 }
 0x22d   : > { %v2588_v23 = vpop.f32.mrb[84].mxu0  ;;  %v10089_v4 = vpop.f32.mrb[88].mxu1 }
 0x22e   : > { %v2590_v9 = vpop.f32.mrb[85].mxu0  ;;  %11268 = vst [vmem:[#allocation39_spill] sm:$0xff] %v10089_v4  ;;  %v3284_v44 = vpop.f32.mrb[89].mxu1 }
 0x22f   : > { %v2591_v25 = vpop.f32.mrb[86].mxu0  ;;  %v10091_v34 = vpop.f32.mrb[90].mxu1 }
 0x230   : > { %v2593_v62 = vpop.f32.mrb[87].mxu0  ;;  %11269 = vst [vmem:[#allocation40_spill] sm:$0xff] %v10091_v34  ;;  %v3287_v35 = vpop.f32.mrb[91].mxu1 }
 0x235   : > { %v2596_v7 = vpop.f32.mrb[88].mxu0  ;;  %v10093_v10 = vpop.f32.mrb[92].mxu1 }
 0x236   : > { %v2598_v57 = vpop.f32.mrb[89].mxu0  ;;  %v3292_v42 = vpop.f32.mrb[93].mxu1 }
 0x237   : > { %v2599_v14 = vpop.f32.mrb[90].mxu0  ;;  %v10095_v58 = vpop.f32.mrb[94].mxu1 }
 0x238   : > { %v2601_v21 = vpop.f32.mrb[91].mxu0  ;;  %v3295_v57 = vpop.f32.mrb[95].mxu1 }
 0x23d   : > { %v2604_v9 = vpop.f32.mrb[92].mxu0  ;;  %v10105_v42 = vpop.f32.mrb[96].mxu1 }
 0x23e   : > { %v2606_v0 = vpop.f32.mrb[93].mxu0 }
 0x23f   : > { %v2607_v62 = vpop.f32.mrb[94].mxu0 }
 0x240   : > { %v2609_v47 = vpop.f32.mrb[95].mxu0 }
 0x245   : > { %v8108_v50 = vpop.f32.mrb[96].mxu0 }
 0x246   : > { %v2750_v21 = vadd.f32 %v8108_v50, %v2572_v38  ;;  %v2741_v46 = vpop.f32.mrb[97].mxu0  ;;  %v3300_v38 = vpop.f32.mrb[97].mxu1 }
 0x247   : > { %v2742_v44 = vadd.f32 %v2741_v46, %v10067_v3  ;;  %v8109_v4 = vpop.f32.mrb[98].mxu0  ;;  %v10113_v46 = vpop.f32.mrb[98].mxu1 }
 0x248   : > { %v10099_v35 = vadd.f32 %v2750_v21, %v9826_v30  ;;  %v2753_v34 = vadd.f32 %v8109_v4, %v2575_v33  ;;  %v2744_v0 = vpop.f32.mrb[99].mxu0  ;;  %v3303_v30 = vpop.f32.mrb[99].mxu1 }
 0x249   : > { %v10102_v8 = vadd.f32 %v2742_v44, %v9812_v1  ;;  %v2745_v47 = vadd.f32 %v2744_v0, %v10069_v28 }
 0x24a   : > { %v10108_v57 = vadd.f32 %v2753_v34, %v9830_v48 }
 0x24b   : > { %v10111_v50 = vadd.f32 %v2745_v47, %v9820_v12  ;;  %v10122_v12 = vpop.f32.mrb[100].mxu1 }
 0x24c   : > { %v3308_v38 = vpop.f32.mrb[101].mxu1 }
 0x24d   : > { %v8112_v3 = vpop.f32.mrb[100].mxu0 }
 0x24e   : > { %v2766_v33 = vadd.f32 %v8112_v3, %v2588_v23  ;;  %v2757_v4 = vpop.f32.mrb[101].mxu0 }
 0x24f   : > { %v2758_v21 = vadd.f32 %v2757_v4, %v2580_v15  ;;  %v8113_v1 = vpop.f32.mrb[102].mxu0  ;;  %v10130_v15 = vpop.f32.mrb[102].mxu1 }
 0x250   : > { %v10116_v44 = vadd.f32 %v2766_v33, %v9851_v20  ;;  %v2769_v28 = vadd.f32 %v8113_v1, %v2591_v25  ;;  %v2760_v0 = vpop.f32.mrb[103].mxu0  ;;  %v3311_v20 = vpop.f32.mrb[103].mxu1 }
 0x251   : > { %v10119_v48 = vadd.f32 %v2758_v21, %v9838_v43  ;;  %v2761_v34 = vadd.f32 %v2760_v0, %v10079_v27 }
 0x252   : > { %v10125_v47 = vadd.f32 %v2769_v28, %v9859_v24  ;;  %v10138_v28 = vpop.f32.mrb[104].mxu1 }
 0x253   : > { %v10128_v23 = vadd.f32 %v2761_v34, %v9846_v52  ;;  %v3316_v0 = vpop.f32.mrb[105].mxu1 }
 0x255   : > { %v8116_v30 = vpop.f32.mrb[104].mxu0 }
 0x256   : > { %v2782_v25 = vadd.f32 %v8116_v30, %v2604_v9  ;;  %v2773_v3 = vpop.f32.mrb[105].mxu0 }
 0x257   : > { %v2774_v33 = vadd.f32 %v2773_v3, %v2596_v7  ;;  %v8117_v43 = vpop.f32.mrb[106].mxu0  ;;  %v10146_v7 = vpop.f32.mrb[106].mxu1 }
 0x258   : > { %v10133_v4 = vadd.f32 %v2782_v25, %v9889_v41  ;;  %v2785_v27 = vadd.f32 %v8117_v43, %v2607_v62  ;;  %v2776_v21 = vpop.f32.mrb[107].mxu0  ;;  %v3319_v34 = vpop.f32.mrb[107].mxu1 }
 0x259   : > { %v10136_v24 = vadd.f32 %v2774_v33, %v9871_v39  ;;  %v2777_v1 = vadd.f32 %v2776_v21, %v2599_v14  ;;  %v10158_v3 = vpop.f32.mrb[108].mxu1 }
 0x25a   : > { %v10141_v52 = vadd.f32 %v2785_v27, %v9897_v2 }
 0x25b   : > { %v10144_v9 = vadd.f32 %v2777_v1, %v9876_v13 }
 0x25d   : > { %v8120_v41 = vpop.f32.mrb[108].mxu0 }
 0x25e   : > { %v2798_v62 = vadd.f32 %v8120_v41, %v9979_v19  ;;  %v2789_v38 = vpop.f32.mrb[109].mxu0  ;;  %v3324_v19 = vpop.f32.mrb[109].mxu1 }
 0x25f   : > { %v2790_v39 = vadd.f32 %v2789_v38, %v9963_v49  ;;  %v8121_v20 = vpop.f32.mrb[110].mxu0  ;;  %v10166_v43 = vpop.f32.mrb[110].mxu1 }
 0x260   : > { %v10151_v14 = vadd.f32 %v2798_v62, %v9920_v40  ;;  %v2801_v2 = vadd.f32 %v8121_v20, %v9983_v45  ;;  %v2792_v30 = vpop.f32.mrb[111].mxu0  ;;  %v3327_v40 = vpop.f32.mrb[111].mxu1 }
 0x261   : > { %v10155_v25 = vadd.f32 %v2790_v39, %v9906_v29  ;;  %v2793_v13 = vadd.f32 %v2792_v30, %v9967_v17  ;;  %v10178_v41 = vpop.f32.mrb[112].mxu1 }
 0x262   : > { %v10161_v33 = vadd.f32 %v2801_v2, %v9925_v37 }
 0x263   : > { %v10164_v49 = vadd.f32 %v2793_v13, %v9915_v63 }
 0x265   : > { %v8124_v27 = vpop.f32.mrb[112].mxu0 }
 0x266   : > { %v2814_v45 = vadd.f32 %v8124_v27, %v10007_v22  ;;  %v2805_v21 = vpop.f32.mrb[113].mxu0  ;;  %v3332_v22 = vpop.f32.mrb[113].mxu1 }
 0x267   : > { %v2806_v29 = vadd.f32 %v2805_v21, %v9993_v59  ;;  %v8125_v1 = vpop.f32.mrb[114].mxu0  ;;  %v10186_v38 = vpop.f32.mrb[114].mxu1 }
 0x268   : > { %v10171_v17 = vadd.f32 %v2814_v45, %v9956_v31  ;;  %v2817_v37 = vadd.f32 %v8125_v1, %v10012_v5  ;;  %v2808_v0 = vpop.f32.mrb[115].mxu0  ;;  %v3335_v31 = vpop.f32.mrb[115].mxu1 }
 0x269   : > { %v10175_v34 = vadd.f32 %v2806_v29, %v9938_v18  ;;  %v2809_v63 = vadd.f32 %v2808_v0, %v9998_v16  ;;  %v10198_v19 = vpop.f32.mrb[116].mxu1 }
 0x26a   : > { %v10181_v62 = vadd.f32 %v2817_v37, %v9961_v55  ;;  %v11271_v37 = vld [vmem:[#allocation26_spill] sm:$0xff] }
 0x26b   : > { %v10184_v59 = vadd.f32 %v2809_v63, %v9943_v60  ;;  %v11272_v63 = vld [vmem:[#allocation15_spill] sm:$0xff] }
 0x26d   : > { %v8128_v39 = vpop.f32.mrb[116].mxu0 }
 0x26e   : > { %v2830_v5 = vadd.f32 %v8128_v39, %v10033_v32  ;;  %v2821_v20 = vpop.f32.mrb[117].mxu0  ;;  %v3340_v32 = vpop.f32.mrb[117].mxu1 }
 0x26f   : > { %v2822_v18 = vadd.f32 %v2821_v20, %v10020_v6  ;;  %v8129_v2 = vpop.f32.mrb[118].mxu0  ;;  %v10206_v27 = vpop.f32.mrb[118].mxu1 }
 0x270   : > { %v10191_v16 = vadd.f32 %v2830_v5, %v9987_v26  ;;  %v2833_v55 = vadd.f32 %v8129_v2, %v10035_v51  ;;  %v2824_v30 = vpop.f32.mrb[119].mxu0  ;;  %v3343_v26 = vpop.f32.mrb[119].mxu1  ;;  %v11274_v5 = vld [vmem:[#allocation18_spill] sm:$0xff] }
 0x271   : > { %v10195_v13 = vadd.f32 %v2822_v18, %v9972_v61  ;;  %v2825_v60 = vadd.f32 %v2824_v30, %v10024_v54  ;;  %v11270_v54 = vld [vmem:[#allocation17_spill] sm:$0xff]  ;;  %v10218_v39 = vpop.f32.mrb[120].mxu1  ;;  %v11276_v18 = vld [vmem:[#allocation16_spill] sm:$0xff] }
 0x272   : > { %v10201_v40 = vadd.f32 %v2833_v55, %v9991_v56 }
 0x273   : > { %v10204_v6 = vadd.f32 %v2825_v60, %v9977_v11  ;;  %v11273_v11 = vld [vmem:[#allocation23_spill] sm:$0xff] }
 0x274   : > { %v11278_v60 = vld [vmem:[#allocation31_spill] sm:$0xff] }
 0x275   : > { %v8132_v45 = vpop.f32.mrb[120].mxu0 }
 0x276   : > { %v2846_v51 = vadd.f32 %v8132_v45, %v10053_v36  ;;  %v2837_v21 = vpop.f32.mrb[121].mxu0  ;;  %v3348_v36 = vpop.f32.mrb[121].mxu1  ;;  %v11279_v45 = vld [vmem:[#allocation29_spill] sm:$0xff] }
 0x277   : > { %v2838_v61 = vadd.f32 %v2837_v21, %v10043_v53  ;;  %v8133_v29 = vpop.f32.mrb[122].mxu0  ;;  %v10226_v2 = vpop.f32.mrb[122].mxu1  ;;  %v11286_v36 = vld [vmem:[#allocation22_spill] sm:$0xff] }
 0x278   : > { %v10211_v1 = vadd.f32 %v2846_v51, %v11270_v54  ;;  %v2849_v56 = vadd.f32 %v8133_v29, %v11271_v37  ;;  %v2840_v0 = vpop.f32.mrb[123].mxu0  ;;  %v3351_v55 = vpop.f32.mrb[123].mxu1  ;;  %v11282_v54 = vld [vmem:[#allocation32_spill] sm:$0xff] }
 0x279   : > { %v10215_v22 = vadd.f32 %v2838_v61, %v11272_v63  ;;  %v2841_v31 = vadd.f32 %v2840_v0, %v11273_v11  ;;  %v11280_v61 = vld [vmem:[#allocation21_spill] sm:$0xff]  ;;  %v11283_v0 = vld [vmem:[#allocation19_spill] sm:$0xff]  ;;  %v11285_v11 = vld [vmem:[#allocation30_spill] sm:$0xff] }
 0x27a   : > { %v10221_v20 = vadd.f32 %v2849_v56, %v11274_v5  ;;  %v10238_v5 = vpop.f32.mrb[124].mxu1 }
 0x27b   : > { %v10224_v53 = vadd.f32 %v2841_v31, %v11276_v18  ;;  %v3356_v55 = vpop.f32.mrb[125].mxu1 }
 0x27c   : > { %11275 = vst [vmem:[#allocation17_spill] sm:$0xff] %v10221_v20  ;;  %v11295_v55 = vld [vmem:[#allocation24_spill] sm:$0xff] }
 0x27d   : > { %11277 = vst [vmem:[#allocation26_spill] sm:$0xff] %v10224_v53  ;;  %v8136_v30 = vpop.f32.mrb[124].mxu0 }
 0x27e   : > { %v2862_v32 = vadd.f32 %v8136_v30, %v11278_v60  ;;  %v2853_v26 = vpop.f32.mrb[125].mxu0  ;;  %v11288_v30 = vld [vmem:[#allocation20_spill] sm:$0xff] }
 0x27f   : > { %v2854_v51 = vadd.f32 %v2853_v26, %v11279_v45  ;;  %v8137_v21 = vpop.f32.mrb[126].mxu0  ;;  %v10246_v26 = vpop.f32.mrb[126].mxu1 }
 0x280   : > { %v10231_v29 = vadd.f32 %v2862_v32, %v11280_v61  ;;  %v2865_v37 = vadd.f32 %v8137_v21, %v11282_v54  ;;  %v2856_v56 = vpop.f32.mrb[127].mxu0  ;;  %v3359_v32 = vpop.f32.mrb[127].mxu1  ;;  %v11290_v21 = vld [vmem:[#allocation35_spill] sm:$0xff] }
 0x281   : > { %v10235_v63 = vadd.f32 %v2854_v51, %v11283_v0  ;;  %v2857_v31 = vadd.f32 %v2856_v56, %v11285_v11  ;;  %v11291_v51 = vld [vmem:[#allocation33_spill] sm:$0xff]  ;;  %v11292_v56 = vld [vmem:[#allocation27_spill] sm:$0xff]  ;;  %v11298_v32 = vld [vmem:[#allocation28_spill] sm:$0xff] }
 0x282   : > { %11281 = vst [vmem:[#allocation15_spill] sm:$0xff] %v10231_v29  ;;  %v10241_v18 = vadd.f32 %v2865_v37, %v11286_v36  ;;  %v11294_v29 = vld [vmem:[#allocation36_spill] sm:$0xff] }
 0x283   : > { %11284 = vst [vmem:[#allocation23_spill] sm:$0xff] %v10235_v63  ;;  %v10244_v60 = vadd.f32 %v2857_v31, %v11288_v30  ;;  %v11297_v31 = vld [vmem:[#allocation34_spill] sm:$0xff] }
 0x284   : > { %11287 = vst [vmem:[#allocation18_spill] sm:$0xff] %v10241_v18 }
 0x285   : > { %11289 = vst [vmem:[#allocation16_spill] sm:$0xff] %v10244_v60  ;;  %v8140_v45 = vpop.f32.mrb[128].mxu0  ;;  %v10258_v60 = vpop.f32.mrb[128].mxu1 }
 0x286   : > { %v2878_v61 = vadd.f32 %v8140_v45, %v11290_v21  ;;  %v2869_v54 = vpop.f32.mrb[129].mxu0  ;;  %v3364_v45 = vpop.f32.mrb[129].mxu1  ;;  %v11300_v21 = vld [vmem:[#allocation25_spill] sm:$0xff] }
 0x287   : > { %v2870_v0 = vadd.f32 %v2869_v54, %v11291_v51  ;;  %v8141_v63 = vpop.f32.mrb[130].mxu0  ;;  %v10266_v51 = vpop.f32.mrb[130].mxu1 }
 0x288   : > { %v10251_v11 = vadd.f32 %v2878_v61, %v11292_v56  ;;  %v2881_v37 = vadd.f32 %v8141_v63, %v11294_v29  ;;  %v2872_v36 = vpop.f32.mrb[131].mxu0  ;;  %v3367_v61 = vpop.f32.mrb[131].mxu1  ;;  %v11302_v29 = vld [vmem:[#allocation39_spill] sm:$0xff] }
 0x289   : > { %v10255_v18 = vadd.f32 %v2870_v0, %v11295_v55  ;;  %v2873_v30 = vadd.f32 %v2872_v36, %v11297_v31  ;;  %v10272_v0 = vld [vmem:[%s11220_s2] ss:$0 sm:$0xff]  ;;  %v11303_v36 = vld [vmem:[#allocation37_spill] sm:$0xff]  ;;  %v11305_v61 = vld [vmem:[#allocation38_spill] sm:$0xff] }
 0x28a   : > { %11293 = vst [vmem:[#allocation31_spill] sm:$0xff] %v10251_v11  ;;  %v10261_v53 = vadd.f32 %v2881_v37, %v11298_v32  ;;  %v11304_v32 = vld [vmem:[#allocation40_spill] sm:$0xff] }
 0x28b   : > { %11296 = vst [vmem:[#allocation29_spill] sm:$0xff] %v10255_v18  ;;  %v10264_v54 = vadd.f32 %v2873_v30, %v11300_v21 }
 0x28c   : > { %11299 = vst [vmem:[#allocation21_spill] sm:$0xff] %v10261_v53  ;;  %v10279_v53 = vpop.f32.mrb[132].mxu1 }
 0x28d   : > { %11301 = vst [vmem:[#allocation32_spill] sm:$0xff] %v10264_v54  ;;  %v8160_v56 = vpop.f32.mrb[132].mxu0  ;;  %v3372_v18 = vpop.f32.mrb[133].mxu1 }
 0x28e   : > { %v3460_v63 = vadd.f32 %v8160_v56, %v11302_v29  ;;  %v3451_v11 = vpop.f32.mrb[133].mxu0 }
 0x28f   : > { %v3452_v55 = vadd.f32 %v3451_v11, %v11303_v36  ;;  %v8161_v37 = vpop.f32.mrb[134].mxu0  ;;  %v10285_v36 = vpop.f32.mrb[134].mxu1 }
 0x290   : > { %v3596_v31 = vadd.f32 %v3460_v63, %v10099_v35  ;;  %v3463_v30 = vadd.f32 %v8161_v37, %v11304_v32  ;;  %v3454_v45 = vpop.f32.mrb[135].mxu0  ;;  %11306 = vst [vmem:[#allocation19_spill] sm:$0xff] %v10285_v36  ;;  %v8833_v35 = vld [vmem:[#allocation10 + $0x1c0] sm:$0xff]   ;;  %v3375_v37 = vpop.f32.mrb[135].mxu1 }
 0x291   : > { %v3594_v21 = vadd.f32 %v3452_v55, %v10102_v8  ;;  %v3455_v54 = vadd.f32 %v3454_v45, %v11305_v61  ;;  %7902 = vmatprep.subr.bf16.mxu0 %v8833_v35  ;;  %v10295_v35 = vpop.f32.mrb[136].mxu1 }
 0x292   : > { %v3681_v56 = vadd.f32 %v10272_v0, %v3596_v31  ;;  %v3597_v29 = vadd.f32 %v3463_v30, %v10108_v57 }
 0x293   : > { %v3679_v20 = vadd.f32 %v10272_v0, %v3594_v21  ;;  %v3595_v11 = vadd.f32 %v3455_v54, %v10111_v50 }
 0x294   : > { %v3682_v63 = vadd.f32 %v10272_v0, %v3597_v29  ;;  %v3685_v32 = vmax.f32 %v3681_v56, 0.0 }
 0x295   : > { %v3680_v8 = vadd.f32 %v10272_v0, %v3595_v11  ;;  %v8164_v55 = vpop.f32.mrb[136].mxu0  ;;  %v3683_v18 = vmax.f32 %v3679_v20, 0.0 }
 0x296   : > { %v3686_v45 = vmax.f32 %v3682_v63, 0.0  ;;  %v3476_v31 = vadd.f32 %v8164_v55, %v10105_v42  ;;  %v3467_v57 = vpop.f32.mrb[137].mxu0 }
 0x297   : > { %v3684_v30 = vmax.f32 %v3680_v8, 0.0  ;;  %v3468_v21 = vadd.f32 %v3467_v57, %v10093_v10  ;;  %v8165_v50 = vpop.f32.mrb[138].mxu0  ;;  %v3380_v10 = vpop.f32.mrb[137].mxu1 }
 0x298   : > { %v3688_v54 = vpack.c.bf16 %v3686_v45, %v3685_v32  ;;  %v3600_v61 = vadd.f32 %v3476_v31, %v10116_v44  ;;  %v3479_v29 = vadd.f32 %v8165_v50, %v10113_v46  ;;  %v3470_v37 = vpop.f32.mrb[139].mxu0  ;;  %v10301_v46 = vpop.f32.mrb[138].mxu1  ;;  %v11307_v31 = vmov 0  }
 0x299   : > { %v3687_v36 = vpack.c.bf16 %v3684_v30, %v3683_v18  ;;  %v3598_v11 = vadd.f32 %v3468_v21, %v10119_v48  ;;  %v3471_v56 = vadd.f32 %v3470_v37, %v10095_v58  ;;  %v3383_v32 = vpop.f32.mrb[139].mxu1 }
 0x29a   : > { %v3692_v42 = vrot.slane %v3688_v54, 4  ;;  %v3710_v20 = vadd.f32 %v10272_v0, %v3600_v61  ;;  %v3601_v63 = vadd.f32 %v3479_v29, %v10125_v47 }
 0x29b   : > { %v3691_v8 = vrot.slane %v3687_v36, 4  ;;  %v3708_v55 = vadd.f32 %v10272_v0, %v3598_v11  ;;  %v3599_v44 = vadd.f32 %v3471_v56, %v10128_v23 }
 0x29c   : > { %3700 = vst [vmem:[#allocation2 + $0x18] ss:$-4 sps:$4 sm:$0xff] %v3692_v42   ;;  %v3711_v48 = vadd.f32 %v10272_v0, %v3601_v63  ;;  %v3714_v47 = vmax.f32 %v3710_v20, 0.0  ;;  %v10313_v20 = vpop.f32.mrb[140].mxu1 }
 0x29d   : > { %3698 = vst [vmem:[#allocation2 + $0x8] ss:$-4 sps:$4 sm:$0xff] %v3691_v8   ;;  %v3709_v58 = vadd.f32 %v10272_v0, %v3599_v44  ;;  %v8168_v45 = vpop.f32.mrb[140].mxu0  ;;  %v3712_v23 = vmax.f32 %v3708_v55, 0.0 }
 0x29e   : > { %3938 = vst [vmem:[#allocation2] sm:$0xf0] %v11307_v31  ;;  %3939 = vst [vmem:[#allocation2 + $0x8] sm:$0xf] %v11307_v31  ;;  %v3715_v36 = vmax.f32 %v3711_v48, 0.0  ;;  %v3492_v57 = vadd.f32 %v8168_v45, %v10138_v28  ;;  %v3483_v18 = vpop.f32.mrb[141].mxu0 }
 0x29f   : > { %v3713_v30 = vmax.f32 %v3709_v58, 0.0  ;;  %v3484_v21 = vadd.f32 %v3483_v18, %v10122_v12  ;;  %v8169_v50 = vpop.f32.mrb[142].mxu0  ;;  %v3388_v12 = vpop.f32.mrb[141].mxu1 }
 0x2a0   : > { %v3717_v54 = vpack.c.bf16 %v3715_v36, %v3714_v47  ;;  %v3604_v61 = vadd.f32 %v3492_v57, %v10133_v4  ;;  %v3495_v29 = vadd.f32 %v8169_v50, %v10146_v7  ;;  %v3486_v37 = vpop.f32.mrb[143].mxu0 }
 0x2a1   : > { %v3716_v11 = vpack.c.bf16 %v3713_v30, %v3712_v23  ;;  %v3602_v56 = vadd.f32 %v3484_v21, %v10136_v24  ;;  %v3487_v42 = vadd.f32 %v3486_v37, %v10130_v15  ;;  %v10323_v24 = vpop.f32.mrb[142].mxu1 }
 0x2a2   : > { %v3721_v28 = vrot.slane %v3717_v54, 4  ;;  %v3739_v63 = vadd.f32 %v10272_v0, %v3604_v61  ;;  %v3605_v10 = vadd.f32 %v3495_v29, %v10141_v52  ;;  %v3391_v58 = vpop.f32.mrb[143].mxu1 }
 0x2a3   : > { %v3720_v8 = vrot.slane %v3716_v11, 4  ;;  %v3737_v4 = vadd.f32 %v10272_v0, %v3602_v56  ;;  %v3603_v7 = vadd.f32 %v3487_v42, %v10144_v9  ;;  %v10319_v55 = vld [vmem:[#allocation2 + $0x10] sm:$0xf0]  ;;  %v10321_v44 = vld [vmem:[#allocation2 + $0x18] sm:$0xf] }
 0x2a4   : > { %3729 = vst [vmem:[#allocation2 + $0x38] ss:$-4 sps:$4 sm:$0xff] %v3721_v28   ;;  %v3743_v15 = vmax.f32 %v3739_v63, 0.0  ;;  %v3740_v48 = vadd.f32 %v10272_v0, %v3605_v10  ;;  %v4402_v32 = vrot.slane %v10319_v55, 4  ;;  %v4403_v52 = vrot.slane %v10321_v44, 4 }
 0x2a5   : > { %3727 = vst [vmem:[#allocation2 + $0x28] ss:$-4 sps:$4 sm:$0xff] %v3720_v8   ;;  %v3741_v45 = vmax.f32 %v3737_v4, 0.0  ;;  %v3738_v47 = vadd.f32 %v10272_v0, %v3603_v7  ;;  %v8172_v9 = vpop.f32.mrb[144].mxu0  ;;  %v4326_v36 = vld [vmem:[#allocation2] sm:$0xf0] }
 0x2a6   : > { %v4327_v57 = vld [vmem:[#allocation2 + $0x8] sm:$0xf]  ;;  %v3744_v18 = vmax.f32 %v3740_v48, 0.0  ;;  %v3508_v23 = vadd.f32 %v8172_v9, %v10178_v41  ;;  %v3499_v30 = vpop.f32.mrb[145].mxu0  ;;  %v4399_v21 = vrot.slane %v4326_v36, 4 }
 0x2a7   : > { %v4400_v50 = vrot.slane %v4327_v57, 4  ;;  %v3948_v54 = vld [vmem:[#allocation2] sm:$0xf8]  ;;  %v3742_v61 = vmax.f32 %v3738_v47, 0.0  ;;  %v3500_v29 = vadd.f32 %v3499_v30, %v10158_v3  ;;  %v8173_v37 = vpop.f32.mrb[146].mxu0  ;;  %v10336_v3 = vpop.f32.mrb[144].mxu1 }
 0x2a8   : > { %v3985_v11 = vshrl.u32 %v3948_v54, 16  ;;  %v3988_v56 = vshll.u32 %v3948_v54, 16  ;;  %v3746_v42 = vpack.c.bf16 %v3744_v18, %v3743_v15  ;;  %v3608_v28 = vadd.f32 %v3508_v23, %v10151_v14  ;;  %v3502_v10 = vpop.f32.mrb[147].mxu0  ;;  %v3949_v8 = vld [vmem:[#allocation2 + $0x8] sm:$0xf]  ;;  %v3396_v9 = vpop.f32.mrb[145].mxu1 }
 0x2a9   : > { %v3511_v63 = vadd.f32 %v8173_v37, %v10186_v38  ;;  %v4401_v12 = vsel %vm4398_vm2, %v4399_v21, %v4400_v50  ;;  %v3745_v41 = vpack.c.bf16 %v3742_v61, %v3741_v45  ;;  %v3606_v4 = vadd.f32 %v3500_v29, %v10155_v25  ;;  %v4489_v38 = vld [vmem:[#allocation2] sm:$0xf0]  ;;  %v4490_v21 = vld [vmem:[#allocation2 + $0x8] sm:$0x1f] }
 0x2aa   : > { %v3503_v7 = vadd.f32 %v3502_v10, %v10166_v43  ;;  %5140 = vmatprep.mubr.bf16.mxu0 %v4401_v12  ;;  %v3987_v48 = vrot.slane %v3985_v11, 3  ;;  %v3750_v58 = vrot.slane %v3746_v42, 4  ;;  %v3768_v15 = vadd.f32 %v10272_v0, %v3608_v28 }
 0x2ab   : > { %v3609_v14 = vadd.f32 %v3511_v63, %v10161_v33  ;;  %v3990_v47 = vrot.slane %v3988_v56, 4  ;;  %v3749_v36 = vrot.slane %v3745_v41, 4  ;;  %v3766_v57 = vadd.f32 %v10272_v0, %v3606_v4  ;;  %v10345_v41 = vpop.f32.mrb[146].mxu1 }
 0x2ac   : > { %v3607_v45 = vadd.f32 %v3503_v7, %v10164_v49  ;;  %v3993_v25 = vshrl.u32 %v3949_v8, 16  ;;  %3758 = vst [vmem:[#allocation2 + $0x58] ss:$-4 sps:$4 sm:$0xff] %v3750_v58   ;;  %v3772_v43 = vmax.f32 %v3768_v15, 0.0  ;;  %v3996_v30 = vshll.u32 %v3949_v8, 16 }
 0x2ad   : > { %v3769_v18 = vadd.f32 %v10272_v0, %v3609_v14  ;;  %v3991_v23 = vor.u32 %v3990_v47, %v3987_v48  ;;  %3756 = vst [vmem:[#allocation2 + $0x48] ss:$-4 sps:$4 sm:$0xff] %v3749_v36   ;;  %v3770_v50 = vmax.f32 %v3766_v57, 0.0  ;;  %v8176_v54 = vpop.f32.mrb[148].mxu0  ;;  %v4527_v29 = vshrl.u32 %v4489_v38, 16  ;;  %v8834_v47 = vld [vmem:[#allocation10 + $0x180] sm:$0xff]  }
 0x2ae   : > { %v3767_v33 = vadd.f32 %v10272_v0, %v3607_v45  ;;  %v3995_v61 = vrot.slane %v3993_v25, 3  ;;  %v3524_v11 = vadd.f32 %v8176_v54, %v10218_v39  ;;  %v3998_v49 = vrot.slane %v3996_v30, 4  ;;  %v3515_v42 = vpop.f32.mrb[149].mxu0  ;;  %v4491_v15 = vld [vmem:[#allocation2 + $0x10] sm:$0xf0]  ;;  %v8836_v45 = vld [vmem:[#allocation10 + $0x1c8] sm:$0xff]  }
 0x2af   : > { %v3773_v37 = vmax.f32 %v3769_v18, 0.0  ;;  %v4530_v56 = vshll.u32 %v4489_v38, 16  ;;  %v4529_v63 = vrot.slane %v4527_v29, 4  ;;  %v4535_v10 = vshrl.u32 %v4490_v21, 16  ;;  %v8177_v8 = vpop.f32.mrb[150].mxu0 }
 0x2b0   : > { %v3771_v28 = vmax.f32 %v3767_v33, 0.0  ;;  %v4538_v12 = vshll.u32 %v4490_v21, 16  ;;  %v3612_v7 = vadd.f32 %v3524_v11, %v10171_v17  ;;  %v3999_v48 = vor.u32 %v3998_v49, %v3995_v61  ;;  %v3518_v14 = vpop.f32.mrb[151].mxu0  ;;  %v4492_v57 = vld [vmem:[#allocation2 + $0x18] sm:$0x1f]  ;;  %v3399_v17 = vpop.f32.mrb[147].mxu1 }
 0x2b1   : > { %v3775_v4 = vpack.c.bf16 %v3773_v37, %v3772_v43  ;;  %v4532_v58 = vrot.slane %v4530_v56, 5  ;;  %v4537_v39 = vrot.slane %v4535_v10, 4  ;;  %v3516_v38 = vadd.f32 %v3515_v42, %v10198_v19  ;;  %v8837_v61 = vld [vmem:[#allocation10 + $0x188] sm:$0xff]   ;;  %v4493_v49 = vld [vmem:[#allocation2 + $0x20] sm:$0xf0]  ;;  %v8839_v17 = vld [vmem:[#allocation10 + $0x1d0] sm:$0xff]  }
 0x2b2   : > { %v3774_v9 = vpack.c.bf16 %v3771_v28, %v3770_v50  ;;  %v4540_v36 = vrot.slane %v4538_v12, 5  ;;  %v10350_v18 = vadd.f32 %v10272_v0, %v3612_v7  ;;  %v4000_v43 = vsel %vm548_vm1, %v3991_v23, %v3999_v48  ;;  %v10361_v50 = vpop.f32.mrb[148].mxu1 }
 0x2b3   : > { %v3779_v25 = vrot.slane %v3775_v4, 4  ;;  %v4533_v30 = vor.u32 %v4532_v58, %v4529_v63  ;;  %5141 = vmatmul.mubr.bf16.vlgmr.msra.gmra.mrb[168].mxu0 %v4000_v43  ;;  %v3610_v54 = vadd.f32 %v3516_v38, %v10175_v34  ;;  %v10359_v19 = vsel %vm4398_vm2, %v4402_v32, %v4403_v52  ;;  %v4494_v52 = vld [vmem:[#allocation2 + $0x28] sm:$0x1f] }
 0x2b4   : > { %v3778_v21 = vrot.slane %v3774_v9, 4  ;;  %v4541_v33 = vor.u32 %v4540_v36, %v4537_v39  ;;  %v3801_v23 = vmax.f32 %v10350_v18, 0.0  ;;  %5148 = vmatprep.mubr.bf16.mxu0 %v10359_v19  ;;  %v4544_v29 = vshrl.u32 %v4491_v15, 16  ;;  %7903 = vmatpush3.bf16.msra.mxu0 %v8834_v47  ;;  %v3950_v36 = vld [vmem:[#allocation2 + $0x10] sm:$0xf8]  ;;  %v8819_v43 = vld [vmem:[#allocation10 + $0x108] sm:$0xff]  }
 0x2b5   : > { %3787 = vst [vmem:[#allocation2 + $0x78] ss:$-4 sps:$4 sm:$0xff] %v3779_v25   ;;  %v4547_v37 = vshll.u32 %v4491_v15, 16  ;;  %v4552_v11 = vshrl.u32 %v4492_v57, 16  ;;  %v10367_v55 = vadd.f32 %v10272_v0, %v3610_v54  ;;  %v4555_v44 = vshll.u32 %v4492_v57, 16  ;;  %v8180_v56 = vpop.f32.mrb[152].mxu0  ;;  %7904 = vmatprep.subr.bf16.mxu0 %v8836_v45 }
 0x2b6   : > { %3785 = vst [vmem:[#allocation2 + $0x68] ss:$-4 sps:$4 sm:$0xff] %v3778_v21   ;;  %v4542_v34 = vsel %vm4525_vm3, %v4533_v30, %v4541_v33  ;;  %v3527_v32 = vadd.f32 %v8177_v8, %v10226_v2  ;;  %v4546_v42 = vrot.slane %v4544_v29, 4  ;;  %v3519_v10 = vadd.f32 %v3518_v14, %v10206_v27  ;;  %v10371_v12 = vpop.f32.mrb[153].mxu0  ;;  %v3404_v2 = vpop.f32.mrb[149].mxu1  ;;  %v8818_v45 = vld [vmem:[#allocation10 + $0xc0] sm:$0xff]  }
 0x2b7   : > { %8210 = vmatprep.mubr.bf16.mxu1 %v4542_v34  ;;  %v4549_v28 = vrot.slane %v4547_v37, 5  ;;  %v4554_v63 = vrot.slane %v4552_v11, 4  ;;  %v3799_v4 = vmax.f32 %v10367_v55, 0.0  ;;  %v4557_v7 = vrot.slane %v4555_v44, 5  ;;  %v10375_v15 = vpop.f32.mrb[154].mxu0  ;;  %v10380_v27 = vpop.f32.mrb[150].mxu1 }
 0x2b8   : > { %v3613_v48 = vadd.f32 %v3527_v32, %v10181_v62  ;;  %v4561_v58 = vshrl.u32 %v4493_v49, 16  ;;  %v3611_v47 = vadd.f32 %v3519_v10, %v10184_v59  ;;  %v4564_v9 = vshll.u32 %v4493_v49, 16  ;;  %v10378_v38 = vpop.f32.mrb[155].mxu0  ;;  %7905 = vmatpush3.bf16.msra.mxu0 %v8837_v61  ;;  %v3407_v30 = vpop.f32.mrb[151].mxu1  ;;  %v3951_v29 = vld [vmem:[#allocation2 + $0x18] sm:$0xf] }
 0x2b9   : > { %v4550_v8 = vor.u32 %v4549_v28, %v4546_v42  ;;  %v4569_v39 = vshrl.u32 %v4494_v52, 16  ;;  %v4558_v14 = vor.u32 %v4557_v7, %v4554_v63  ;;  %v4572_v25 = vshll.u32 %v4494_v52, 16  ;;  %v10385_v37 = vpop.f32.mrb[152].mxu1  ;;  %v8840_v11 = vld [vmem:[#allocation10 + $0x190] sm:$0xff]   ;;  %7906 = vmatprep.subr.bf16.mxu0 %v8839_v17 }
 0x2ba   : > { %v3798_v57 = vadd.f32 %v10272_v0, %v3613_v48  ;;  %v4563_v62 = vrot.slane %v4561_v58, 4  ;;  %v3796_v21 = vadd.f32 %v10272_v0, %v3611_v47  ;;  %v4566_v59 = vrot.slane %v4564_v9, 5  ;;  %v3412_v44 = vpop.f32.mrb[153].mxu1  ;;  %v4330_v58 = vld [vmem:[#allocation2 + $0x20] sm:$0xf0]  ;;  %v8821_v18 = vld [vmem:[#allocation10 + $0x110] sm:$0xff]  }
 0x2bb   : > { %v4571_v33 = vrot.slane %v4569_v39, 4  ;;  %v3540_v54 = vadd.f32 %v8180_v56, %v10258_v60  ;;  %v10388_v61 = vsel %vm4525_vm3, %v4550_v8, %v4558_v14  ;;  %v4574_v34 = vrot.slane %v4572_v25, 5  ;;  %v4495_v60 = vld [vmem:[#allocation2 + $0x30] sm:$0xf0]  ;;  %v8820_v56 = vld [vmem:[#allocation10 + $0xc8] sm:$0xff]   ;;  %v10396_v8 = vpop.f32.mrb[154].mxu1 }
 0x2bc   : > { %v3802_v49 = vmax.f32 %v3798_v57, 0.0  ;;  %v4002_v55 = vshrl.u32 %v3950_v36, 16  ;;  %8211 = vmatmul.mubr.bf16.vlgmr.msra.gmra.mrb[156].mxu1 %v10388_v61  ;;  %v3800_v32 = vmax.f32 %v3796_v21, 0.0  ;;  %v4567_v52 = vor.u32 %v4566_v59, %v4563_v62  ;;  %7907 = vmatpush3.bf16.msra.mxu0 %v8840_v11  ;;  %v4496_v25 = vld [vmem:[#allocation2 + $0x38] sm:$0x1f]  ;;  %v3415_v30 = vpop.f32.mrb[155].mxu1 }
 0x2bd   : > { %v3616_v42 = vadd.f32 %v3540_v54, %v10191_v16  ;;  %v4005_v28 = vshll.u32 %v3950_v36, 16  ;;  %7767 = vmatpush3.bf16.msra.mxu1 %v8818_v45  ;;  %v4575_v10 = vor.u32 %v4574_v34, %v4571_v33  ;;  %v4010_v48 = vshrl.u32 %v3951_v29, 16  ;;  %v10394_v2 = vpop.f32.mrb[156].mxu0  ;;  %v4331_v36 = vld [vmem:[#allocation2 + $0x28] sm:$0xf] }
 0x2be   : > { %v3804_v63 = vpack.c.bf16 %v3802_v49, %v3801_v23  ;;  %v4004_v7 = vrot.slane %v4002_v55, 3  ;;  %v3803_v47 = vpack.c.bf16 %v3800_v32, %v3799_v4  ;;  %v4013_v39 = vshll.u32 %v3951_v29, 16  ;;  %7768 = vmatprep.subr.bf16.mxu1 %v8819_v43  ;;  %v10401_v14 = vpop.f32.mrb[157].mxu0  ;;  %v4497_v32 = vld [vmem:[#allocation2 + $0x40] sm:$0xf0] }
 0x2bf   : > { %v10399_v9 = vadd.f32 %v10272_v0, %v3616_v42  ;;  %v4007_v16 = vrot.slane %v4005_v28, 4  ;;  %v10404_v57 = vsel %vm4525_vm3, %v4567_v52, %v4575_v10  ;;  %v4012_v45 = vrot.slane %v4010_v48, 3  ;;  %v10408_v4 = vpop.f32.mrb[158].mxu0  ;;  %v8823_v52 = vld [vmem:[#allocation10 + $0x118] sm:$0xff]   ;;  %v3952_v30 = vld [vmem:[#allocation2 + $0x20] sm:$0xf8] }
 0x2c0   : > { %v3808_v23 = vrot.slane %v3804_v63, 4  ;;  %v3532_v62 = vadd.f32 %v10371_v12, %v10238_v5  ;;  %v3807_v17 = vrot.slane %v3803_v47, 4  ;;  %8214 = vmatprep.mubr.bf16.mxu1 %v10404_v57  ;;  %v4015_v59 = vrot.slane %v4013_v39, 4  ;;  %v10412_v33 = vpop.f32.mrb[159].mxu0  ;;  %v8822_v5 = vld [vmem:[#allocation10 + $0xd0] sm:$0xff]   ;;  %v8842_v10 = vld [vmem:[#allocation10 + $0x1d8] sm:$0xff]  }
 0x2c1   : > { %v3830_v43 = vmax.f32 %v10399_v9, 0.0  ;;  %v4008_v21 = vor.u32 %v4007_v16, %v4004_v7  ;;  %v4405_v29 = vrot.slane %v4330_v58, 4  ;;  %v4406_v11 = vrot.slane %v4331_v36, 4  ;;  %7769 = vmatpush3.bf16.msra.mxu1 %v8820_v56  ;;  %v4498_v56 = vld [vmem:[#allocation2 + $0x48] sm:$0x1f]  ;;  %v8843_v47 = vld [vmem:[#allocation10 + $0x198] sm:$0xff]   ;;  %7908 = vmatprep.subr.bf16.mxu0 %v8842_v10 }
 0x2c2   : > { %3816 = vst [vmem:[#allocation2 + $0x98] ss:$-4 sps:$4 sm:$0xff] %v3808_v23   ;;  %v3614_v54 = vadd.f32 %v3532_v62, %v10195_v13  ;;  %v4578_v49 = vshrl.u32 %v4495_v60, 16  ;;  %3814 = vst [vmem:[#allocation2 + $0x88] ss:$-4 sps:$4 sm:$0xff] %v3807_v17   ;;  %v4016_v12 = vor.u32 %v4015_v59, %v4012_v45  ;;  %v4581_v34 = vshll.u32 %v4495_v60, 16  ;;  %7770 = vmatprep.subr.bf16.mxu1 %v8821_v18 }
 0x2c3   : > { %v4586_v55 = vshrl.u32 %v4496_v25, 16  ;;  %v4589_v44 = vshll.u32 %v4496_v25, 16  ;;  %v10419_v28 = vsel %vm4398_vm2, %v4405_v29, %v4406_v11  ;;  %v3543_v63 = vadd.f32 %v10375_v15, %v10266_v51  ;;  %v8824_v15 = vld [vmem:[#allocation10 + $0xd8] sm:$0xff]   ;;  %v8825_v11 = vld [vmem:[#allocation10 + $0x120] sm:$0xff]   ;;  %7909 = vmatpush3.bf16.msra.mxu0 %v8843_v47  ;;  %v4332_v47 = vld [vmem:[#allocation2 + $0x30] sm:$0xf0] }
 0x2c4   : > { %v10416_v42 = vadd.f32 %v10272_v0, %v3614_v54  ;;  %v4580_v13 = vrot.slane %v4578_v49, 4  ;;  %v10424_v7 = vsel %vm548_vm1, %v4008_v21, %v4016_v12  ;;  %v4583_v60 = vrot.slane %v4581_v34, 5  ;;  %v8844_v21 = vld [vmem:[#allocation10 + $0x1e0] sm:$0xff]   ;;  %v3953_v54 = vld [vmem:[#allocation2 + $0x28] sm:$0xf] }
 0x2c5   : > { %v4588_v48 = vrot.slane %v4586_v55, 4  ;;  %v4591_v58 = vrot.slane %v4589_v44, 5  ;;  %5149 = vmatmul.mubr.bf16.gmra.mrb[172].mxu0 %v10424_v7  ;;  %v3617_v39 = vadd.f32 %v3543_v63, %v10201_v40  ;;  %v3535_v36 = vadd.f32 %v10378_v38, %v10246_v26  ;;  %7771 = vmatpush3.bf16.msra.mxu1 %v8822_v5  ;;  %v10431_v51 = vpop.f32.mrb[160].mxu0  ;;  %v8826_v10 = vld [vmem:[#allocation10 + $0xe0] sm:$0xff]  }
 0x2c6   : > { %v3828_v16 = vmax.f32 %v10416_v42, 0.0  ;;  %v4595_v18 = vshrl.u32 %v4497_v32, 16  ;;  %5156 = vmatprep.mubr.bf16.mxu0 %v10419_v28  ;;  %v4584_v23 = vor.u32 %v4583_v60, %v4580_v13  ;;  %v4598_v62 = vshll.u32 %v4497_v32, 16  ;;  %v10434_v17 = vpop.f32.mrb[161].mxu0  ;;  %7772 = vmatprep.subr.bf16.mxu1 %v8823_v52  ;;  %v8827_v60 = vld [vmem:[#allocation10 + $0x128] sm:$0xff]  }
 0x2c7   : > { %v4592_v45 = vor.u32 %v4591_v58, %v4588_v48  ;;  %v4603_v25 = vshrl.u32 %v4498_v56, 16  ;;  %v3827_v40 = vadd.f32 %v10272_v0, %v3617_v39  ;;  %v3615_v26 = vadd.f32 %v3535_v36, %v10204_v6  ;;  %v10438_v29 = vpop.f32.mrb[162].mxu0  ;;  %7910 = vmatprep.subr.bf16.mxu0 %v8844_v21  ;;  %v4333_v39 = vld [vmem:[#allocation2 + $0x38] sm:$0xf] }
 0x2c8   : > { %v4597_v38 = vrot.slane %v4595_v18, 4  ;;  %v4606_v59 = vshll.u32 %v4498_v56, 16  ;;  %v4600_v5 = vrot.slane %v4598_v62, 5  ;;  %v3556_v34 = vadd.f32 %v10394_v2, %v10295_v35  ;;  %v10445_v55 = vpop.f32.mrb[163].mxu0 }
 0x2c9   : > { %v10441_v49 = vsel %vm4525_vm3, %v4584_v23, %v4592_v45  ;;  %v4605_v12 = vrot.slane %v4603_v25, 4  ;;  %v3831_v6 = vmax.f32 %v3827_v40, 0.0  ;;  %v3825_v44 = vadd.f32 %v10272_v0, %v3615_v26  ;;  %7773 = vmatpush3.bf16.msra.mxu1 %v8824_v15  ;;  %v4499_v45 = vld [vmem:[#allocation2 + $0x50] sm:$0xf0] }
 0x2ca   : > { %8215 = vmatmul.mubr.bf16.gmra.mrb[160].mxu1 %v10441_v49  ;;  %v4608_v32 = vrot.slane %v4606_v59, 5  ;;  %v4019_v52 = vshrl.u32 %v3952_v30, 16  ;;  %v4601_v42 = vor.u32 %v4600_v5, %v4597_v38  ;;  %v3620_v13 = vadd.f32 %v3556_v34, %v10211_v1  ;;  %7774 = vmatprep.subr.bf16.mxu1 %v8825_v11 }
 0x2cb   : > { %v4022_v63 = vshll.u32 %v3952_v30, 16  ;;  %v4027_v56 = vshrl.u32 %v3953_v54, 16  ;;  %v3833_v35 = vpack.c.bf16 %v3831_v6, %v3830_v43  ;;  %v3829_v2 = vmax.f32 %v3825_v44, 0.0  ;;  %v4500_v43 = vld [vmem:[#allocation2 + $0x58] sm:$0x1f] }
 0x2cc   : > { %v4609_v48 = vor.u32 %v4608_v32, %v4605_v12  ;;  %v4021_v58 = vrot.slane %v4019_v52, 3  ;;  %v10453_v36 = vadd.f32 %v10272_v0, %v3620_v13  ;;  %v4030_v1 = vshll.u32 %v3953_v54, 16  ;;  %v8829_v12 = vld [vmem:[#allocation10 + $0x130] sm:$0xff]   ;;  %v4501_v52 = vld [vmem:[#allocation2 + $0x60] sm:$0xf0] }
 0x2cd   : > { %v4024_v18 = vrot.slane %v4022_v63, 4  ;;  %v4029_v23 = vrot.slane %v4027_v56, 3  ;;  %v3837_v62 = vrot.slane %v3833_v35, 4  ;;  %v3832_v15 = vpack.c.bf16 %v3829_v2, %v3828_v16  ;;  %v10460_v30 = vpop.f32.mrb[164].mxu0  ;;  %7775 = vmatpush3.bf16.msra.mxu1 %v8826_v10  ;;  %v8828_v16 = vld [vmem:[#allocation10 + $0xe8] sm:$0xff]  }
 0x2ce   : > { %v10456_v25 = vsel %vm4525_vm3, %v4601_v42, %v4609_v48  ;;  %v3548_v9 = vadd.f32 %v10401_v14, %v10279_v53  ;;  %v3859_v21 = vmax.f32 %v10453_v36, 0.0  ;;  %v4032_v26 = vrot.slane %v4030_v1, 4  ;;  %v10464_v59 = vpop.f32.mrb[165].mxu0  ;;  %7776 = vmatprep.subr.bf16.mxu1 %v8827_v60  ;;  %v4502_v10 = vld [vmem:[#allocation2 + $0x68] sm:$0x1f]  ;;  %v8846_v60 = vld [vmem:[#allocation10 + $0x1a0] sm:$0xff]  }
 0x2cf   : > { %8218 = vmatprep.mubr.bf16.mxu1 %v10456_v25  ;;  %v4025_v40 = vor.u32 %v4024_v18, %v4021_v58  ;;  %v4408_v38 = vrot.slane %v4332_v47, 4  ;;  %3845 = vst [vmem:[#allocation2 + $0xb8] ss:$-4 sps:$4 sm:$0xff] %v3837_v62   ;;  %v3836_v54 = vrot.slane %v3832_v15, 4  ;;  %v4409_v5 = vrot.slane %v4333_v39, 4  ;;  %v10467_v14 = vpop.f32.mrb[166].mxu0  ;;  %7911 = vmatpush3.bf16.msra.mxu0 %v8846_v60 }
 0x2d0   : > { %v3618_v11 = vadd.f32 %v3548_v9, %v10215_v22  ;;  %v4612_v53 = vshrl.u32 %v4499_v45, 16  ;;  %v4033_v34 = vor.u32 %v4032_v26, %v4029_v23  ;;  %v4615_v6 = vshll.u32 %v4499_v45, 16  ;;  %v10469_v42 = vpop.f32.mrb[167].mxu0  ;;  %v8847_v35 = vld [vmem:[#allocation10 + $0x1e8] sm:$0xff]   ;;  %v8830_v39 = vld [vmem:[#allocation10 + $0xf0] sm:$0xff]   ;;  %v11309_v45 = vld [vmem:[#allocation19_spill] sm:$0xff] }
 0x2d1   : > { %v4620_v44 = vshrl.u32 %v4500_v43, 16  ;;  %v4623_v32 = vshll.u32 %v4500_v43, 16  ;;  %3843 = vst [vmem:[#allocation2 + $0xa8] ss:$-4 sps:$4 sm:$0xff] %v3836_v54   ;;  %v10475_v63 = vsel %vm4398_vm2, %v4408_v38, %v4409_v5  ;;  %v3559_v56 = vadd.f32 %v10408_v4, %v10301_v46  ;;  %7777 = vmatpush3.bf16.msra.mxu1 %v8828_v16  ;;  %v11308_v23 = vld [vmem:[#allocation17_spill] sm:$0xff]  ;;  %v8831_v62 = vld [vmem:[#allocation10 + $0x138] sm:$0xff]   ;;  %7912 = vmatprep.subr.bf16.mxu0 %v8847_v35 }
 0x2d2   : > { %v10472_v13 = vadd.f32 %v10272_v0, %v3618_v11  ;;  %v4614_v22 = vrot.slane %v4612_v53, 4  ;;  %v10480_v2 = vsel %vm548_vm1, %v4025_v40, %v4033_v34  ;;  %v4617_v48 = vrot.slane %v4615_v6, 5  ;;  %7778 = vmatprep.subr.bf16.mxu1 %v8829_v12  ;;  %v3954_v26 = vld [vmem:[#allocation2 + $0x30] sm:$0xf8]  ;;  %v8848_v38 = vld [vmem:[#allocation10 + $0x1a8] sm:$0xff]   ;;  %v11310_v54 = vld [vmem:[#allocation26_spill] sm:$0xff] }
 0x2d3   : > { %v4622_v58 = vrot.slane %v4620_v44, 4  ;;  %v4625_v47 = vrot.slane %v4623_v32, 5  ;;  %5157 = vmatmul.mubr.bf16.gmra.mrb[176].mxu0 %v10480_v2  ;;  %v3621_v1 = vadd.f32 %v3559_v56, %v11308_v23  ;;  %v3551_v46 = vadd.f32 %v10412_v33, %v11309_v45  ;;  %v3955_v34 = vld [vmem:[#allocation2 + $0x38] sm:$0xf]  ;;  %v8849_v33 = vld [vmem:[#allocation10 + $0x1f0] sm:$0xff]   ;;  %v10497_v60 = vld [vmem:[#allocation10 + $0x140] sm:$0xff]  }
 0x2d4   : > { %v3857_v18 = vmax.f32 %v10472_v13, 0.0  ;;  %v4629_v4 = vshrl.u32 %v4501_v52, 16  ;;  %5164 = vmatprep.mubr.bf16.mxu0 %v10475_v63  ;;  %v4618_v15 = vor.u32 %v4617_v48, %v4614_v22  ;;  %v4632_v43 = vshll.u32 %v4501_v52, 16  ;;  %v8832_v52 = vld [vmem:[#allocation10 + $0xf8] sm:$0xff]   ;;  %v11311_v48 = vld [vmem:[#allocation15_spill] sm:$0xff]  ;;  %7913 = vmatpush3.bf16.msra.mxu0 %v8848_v38 }
 0x2d5   : > { %v4626_v9 = vor.u32 %v4625_v47, %v4622_v58  ;;  %v4637_v40 = vshrl.u32 %v4502_v10, 16  ;;  %v3856_v16 = vadd.f32 %v10272_v0, %v3621_v1  ;;  %v3619_v11 = vadd.f32 %v3551_v46, %v11310_v54  ;;  %7779 = vmatpush3.bf16.msra.mxu1 %v8830_v39  ;;  %v4334_v1 = vld [vmem:[#allocation2 + $0x40] sm:$0xf0]  ;;  %7914 = vmatprep.subr.bf16.mxu0 %v8849_v33  ;;  %v8852_v33 = vld [vmem:[#allocation10 + $0x1b8] sm:$0xff]  }
 0x2d6   : > { %v4631_v5 = vrot.slane %v4629_v4, 4  ;;  %v4640_v53 = vshll.u32 %v4502_v10, 16  ;;  %v4634_v6 = vrot.slane %v4632_v43, 5  ;;  %v3572_v32 = vadd.f32 %v10431_v51, %v10336_v3  ;;  %7780 = vmatprep.subr.bf16.mxu1 %v8831_v62  ;;  %v8850_v3 = vld [vmem:[#allocation10 + $0x1b0] sm:$0xff]   ;;  %v4335_v4 = vld [vmem:[#allocation2 + $0x48] sm:$0xf] }
 0x2d7   : > { %v10491_v12 = vsel %vm4525_vm3, %v4618_v15, %v4626_v9  ;;  %v4639_v44 = vrot.slane %v4637_v40, 4  ;;  %v3860_v13 = vmax.f32 %v3856_v16, 0.0  ;;  %v3854_v22 = vadd.f32 %v10272_v0, %v3619_v11  ;;  %v8851_v15 = vld [vmem:[#allocation10 + $0x1f8] sm:$0xff]  }
 0x2d8   : > { %8219 = vmatmul.mubr.bf16.gmra.mrb[164].mxu1 %v10491_v12  ;;  %v4642_v56 = vrot.slane %v4640_v53, 5  ;;  %v4036_v10 = vshrl.u32 %v3954_v26, 16  ;;  %v4635_v35 = vor.u32 %v4634_v6, %v4631_v5  ;;  %v3624_v58 = vadd.f32 %v3572_v32, %v11311_v48  ;;  %7915 = vmatpush3.bf16.msra.mxu0 %v8850_v3  ;;  %v11312_v6 = vld [vmem:[#allocation23_spill] sm:$0xff] }
 0x2d9   : > { %v4039_v47 = vshll.u32 %v3954_v26, 16  ;;  %v4044_v23 = vshrl.u32 %v3955_v34, 16  ;;  %v3862_v51 = vpack.c.bf16 %v3860_v13, %v3859_v21  ;;  %v3858_v39 = vmax.f32 %v3854_v22, 0.0  ;;  %v4503_v26 = vld [vmem:[#allocation2 + $0x70] sm:$0xf0]  ;;  %7781 = vmatpush3.bf16.msra.mxu1 %v8832_v52  ;;  %7916 = vmatprep.subr.bf16.mxu0 %v8851_v15 }
 0x2da   : > { %v4643_v45 = vor.u32 %v4642_v56, %v4639_v44  ;;  %v4038_v46 = vrot.slane %v4036_v10, 3  ;;  %v10503_v62 = vadd.f32 %v10272_v0, %v3624_v58  ;;  %v4047_v40 = vshll.u32 %v3955_v34, 16  ;;  %v4504_v21 = vld [vmem:[#allocation2 + $0x78] sm:$0x1f]  ;;  %8242 = vmatprep.subr.bf16.mxu1 %v10497_v60  ;;  %v4505_v56 = vld [vmem:[#allocation2 + $0x80] sm:$0xf0] }
 0x2db   : > { %v4041_v9 = vrot.slane %v4039_v47, 4  ;;  %v4046_v43 = vrot.slane %v4044_v23, 3  ;;  %v3866_v16 = vrot.slane %v3862_v51, 4  ;;  %v3861_v38 = vpack.c.bf16 %v3858_v39, %v3857_v18  ;;  %v4506_v47 = vld [vmem:[#allocation2 + $0x88] sm:$0x1f] }
 0x2dc   : > { %v10506_v54 = vsel %vm4525_vm3, %v4635_v35, %v4643_v45  ;;  %v3564_v36 = vadd.f32 %v10434_v17, %v10313_v20  ;;  %v3888_v11 = vmax.f32 %v10503_v62, 0.0  ;;  %v4049_v53 = vrot.slane %v4047_v40, 4  ;;  %7917 = vmatpush3.bf16.msra.mxu0 %v8852_v33  ;;  %v11313_v45 = vld [vmem:[#allocation18_spill] sm:$0xff] }
 0x2dd   : > { %8222 = vmatprep.mubr.bf16.mxu1 %v10506_v54  ;;  %v4042_v5 = vor.u32 %v4041_v9, %v4038_v46  ;;  %v4411_v34 = vrot.slane %v4334_v1, 4  ;;  %3874 = vst [vmem:[#allocation2 + $0xd8] ss:$-4 sps:$4 sm:$0xff] %v3866_v16   ;;  %v3865_v18 = vrot.slane %v3861_v38, 4  ;;  %v4412_v32 = vrot.slane %v4335_v4, 4 }
 0x2de   : > { %v3622_v44 = vadd.f32 %v3564_v36, %v11312_v6  ;;  %v4646_v52 = vshrl.u32 %v4503_v26, 16  ;;  %v4050_v20 = vor.u32 %v4049_v53, %v4046_v43  ;;  %v4649_v17 = vshll.u32 %v4503_v26, 16  ;;  %v3956_v43 = vld [vmem:[#allocation2 + $0x40] sm:$0xf8]  ;;  %v11314_v26 = vld [vmem:[#allocation16_spill] sm:$0xff] }
 0x2df   : > { %v4654_v13 = vshrl.u32 %v4504_v21, 16  ;;  %v4657_v22 = vshll.u32 %v4504_v21, 16  ;;  %3872 = vst [vmem:[#allocation2 + $0xc8] ss:$-4 sps:$4 sm:$0xff] %v3865_v18   ;;  %v10516_v35 = vsel %vm4398_vm2, %v4411_v34, %v4412_v32  ;;  %v3575_v58 = vadd.f32 %v10438_v29, %v10345_v41  ;;  %v3957_v21 = vld [vmem:[#allocation2 + $0x48] sm:$0xf] }
 0x2e0   : > { %v3882_v10 = vadd.f32 %v10272_v0, %v3622_v44  ;;  %v4648_v48 = vrot.slane %v4646_v52, 4  ;;  %v10521_v23 = vsel %vm548_vm1, %v4042_v5, %v4050_v20  ;;  %v4651_v1 = vrot.slane %v4649_v17, 5  ;;  %v11315_v32 = vld [vmem:[#allocation31_spill] sm:$0xff] }
 0x2e1   : > { %v4656_v3 = vrot.slane %v4654_v13, 4  ;;  %v4659_v51 = vrot.slane %v4657_v22, 5  ;;  %5165 = vmatmul.mubr.bf16.gmra.mrb[180].mxu0 %v10521_v23  ;;  %v3625_v46 = vadd.f32 %v3575_v58, %v11313_v45  ;;  %v3567_v4 = vadd.f32 %v10445_v55, %v10323_v24  ;;  %v4337_v58 = vld [vmem:[#allocation2 + $0x58] sm:$0xf] }
 0x2e2   : > { %v3886_v39 = vmax.f32 %v3882_v10, 0.0  ;;  %v4663_v15 = vshrl.u32 %v4505_v56, 16  ;;  %5172 = vmatprep.mubr.bf16.mxu0 %v10516_v35  ;;  %v4652_v41 = vor.u32 %v4651_v1, %v4648_v48  ;;  %v4666_v62 = vshll.u32 %v4505_v56, 16  ;;  %v4336_v48 = vld [vmem:[#allocation2 + $0x50] sm:$0xf0] }
 0x2e3   : > { %v4660_v29 = vor.u32 %v4659_v51, %v4656_v3  ;;  %v4671_v9 = vshrl.u32 %v4506_v47, 16  ;;  %v3885_v40 = vadd.f32 %v10272_v0, %v3625_v46  ;;  %v3623_v16 = vadd.f32 %v3567_v4, %v11314_v26  ;;  %v4507_v3 = vld [vmem:[#allocation2 + $0x90] sm:$0xf0]  ;;  %v4508_v4 = vld [vmem:[#allocation2 + $0x98] sm:$0x1f] }
 0x2e4   : > { %v4665_v38 = vrot.slane %v4663_v15, 4  ;;  %v4674_v36 = vshll.u32 %v4506_v47, 16  ;;  %v4668_v53 = vrot.slane %v4666_v62, 5  ;;  %v3588_v55 = vadd.f32 %v10460_v30, %v10385_v37  ;;  %v8878_v37 = vld [vmem:[%s11220_s2] ss:$0 sm:$0xff] }
 0x2e5   : > { %v10531_v5 = vsel %vm4525_vm3, %v4652_v41, %v4660_v29  ;;  %v4673_v24 = vrot.slane %v4671_v9, 4  ;;  %v3889_v34 = vmax.f32 %v3885_v40, 0.0  ;;  %v3883_v33 = vadd.f32 %v10272_v0, %v3623_v16 }
 0x2e6   : > { %8223 = vmatmul.mubr.bf16.gmra.mrb[168].mxu1 %v10531_v5  ;;  %v4676_v18 = vrot.slane %v4674_v36, 5  ;;  %v4053_v6 = vshrl.u32 %v3956_v43, 16  ;;  %v4669_v44 = vor.u32 %v4668_v53, %v4665_v38  ;;  %v3628_v52 = vadd.f32 %v3588_v55, %v11315_v32  ;;  %v4509_v53 = vld [vmem:[#allocation2 + $0xa0] sm:$0xf0] }
 0x2e7   : > { %v4056_v20 = vshll.u32 %v3956_v43, 16  ;;  %v4061_v17 = vshrl.u32 %v3957_v21, 16  ;;  %v3891_v13 = vpack.c.bf16 %v3889_v34, %v3888_v11  ;;  %v3887_v22 = vmax.f32 %v3883_v33, 0.0  ;;  %v11316_v43 = vld [vmem:[#allocation29_spill] sm:$0xff]  ;;  %v4510_v34 = vld [vmem:[#allocation2 + $0xa8] sm:$0x1f] }
 0x2e8   : > { %v4677_v56 = vor.u32 %v4676_v18, %v4673_v24  ;;  %v4055_v10 = vrot.slane %v4053_v6, 3  ;;  %v10541_v30 = vadd.f32 %v8878_v37, %v3628_v52  ;;  %v4064_v1 = vshll.u32 %v3957_v21, 16  ;;  %v11317_v52 = vld [vmem:[#allocation21_spill] sm:$0xff] }
 0x2e9   : > { %v4058_v0 = vrot.slane %v4056_v20, 4  ;;  %v4063_v47 = vrot.slane %v4061_v17, 3  ;;  %v3895_v51 = vrot.slane %v3891_v13, 4  ;;  %v3890_v45 = vpack.c.bf16 %v3887_v22, %v3886_v39  ;;  %v3958_v22 = vld [vmem:[#allocation2 + $0x50] sm:$0xf8] }
 0x2ea   : > { %v10544_v46 = vsel %vm4525_vm3, %v4669_v44, %v4677_v56  ;;  %v3580_v11 = vadd.f32 %v10464_v59, %v10361_v50  ;;  %v3917_v15 = vmax.f32 %v10541_v30, 0.0  ;;  %v4066_v29 = vrot.slane %v4064_v1, 4  ;;  %v3959_v1 = vld [vmem:[#allocation2 + $0x58] sm:$0xf] }
 0x2eb   : > { %8226 = vmatprep.mubr.bf16.mxu1 %v10544_v46  ;;  %v4059_v41 = vor.u32 %v4058_v0, %v4055_v10  ;;  %v4414_v62 = vrot.slane %v4336_v48, 4  ;;  %3903 = vst [vmem:[#allocation2 + $0xf8] ss:$-4 sps:$4 sm:$0xff] %v3895_v51   ;;  %v3894_v9 = vrot.slane %v3890_v45, 4  ;;  %v4415_v26 = vrot.slane %v4337_v58, 4  ;;  %v11318_v58 = vld [vmem:[#allocation32_spill] sm:$0xff] }
 0x2ec   : > { %v3626_v40 = vadd.f32 %v3580_v11, %v11316_v43  ;;  %v4680_v39 = vshrl.u32 %v4507_v3, 16  ;;  %v4067_v16 = vor.u32 %v4066_v29, %v4063_v47  ;;  %v4683_v38 = vshll.u32 %v4507_v3, 16 }
 0x2ed   : > { %v4688_v36 = vshrl.u32 %v4508_v4, 16  ;;  %v4691_v21 = vshll.u32 %v4508_v4, 16  ;;  %3901 = vst [vmem:[#allocation2 + $0xe8] ss:$-4 sps:$4 sm:$0xff] %v3894_v9   ;;  %v10552_v59 = vsel %vm4398_vm2, %v4414_v62, %v4415_v26  ;;  %v3591_v55 = vadd.f32 %v10467_v14, %v10396_v8  ;;  %v4339_v62 = vld [vmem:[#allocation2 + $0x68] sm:$0xf] }
 0x2ee   : > { %v3911_v50 = vadd.f32 %v8878_v37, %v3626_v40  ;;  %v4682_v24 = vrot.slane %v4680_v39, 4  ;;  %v10557_v33 = vsel %vm548_vm1, %v4059_v41, %v4067_v16  ;;  %v4685_v18 = vrot.slane %v4683_v38, 5 }
 0x2ef   : > { %v4690_v6 = vrot.slane %v4688_v36, 4  ;;  %v4693_v44 = vrot.slane %v4691_v21, 5  ;;  %5173 = vmatmul.mubr.bf16.gmra.mrb[184].mxu0 %v10557_v33  ;;  %v3629_v20 = vadd.f32 %v3591_v55, %v11317_v52  ;;  %v3583_v17 = vadd.f32 %v10469_v42, %v10380_v27  ;;  %v4338_v42 = vld [vmem:[#allocation2 + $0x60] sm:$0xf0]  ;;  %v4511_v21 = vld [vmem:[#allocation2 + $0xb0] sm:$0xf0] }
 0x2f0   : > { %v3915_v32 = vmax.f32 %v3911_v50, 0.0  ;;  %v4697_v13 = vshrl.u32 %v4509_v53, 16  ;;  %5180 = vmatprep.mubr.bf16.mxu0 %v10552_v59  ;;  %v4686_v8 = vor.u32 %v4685_v18, %v4682_v24  ;;  %v4700_v56 = vshll.u32 %v4509_v53, 16  ;;  %v4512_v53 = vld [vmem:[#allocation2 + $0xb8] sm:$0x1f] }
 0x2f1   : > { %v4694_v14 = vor.u32 %v4693_v44, %v4690_v6  ;;  %v4705_v10 = vshrl.u32 %v4510_v34, 16  ;;  %v3914_v48 = vadd.f32 %v8878_v37, %v3629_v20  ;;  %v3627_v30 = vadd.f32 %v3583_v17, %v11318_v58  ;;  %v4513_v18 = vld [vmem:[#allocation2 + $0xc0] sm:$0xf0] }
 0x2f2   : > { %v4699_v0 = vrot.slane %v4697_v13, 4  ;;  %v4708_v47 = vshll.u32 %v4510_v34, 16  ;;  %v4702_v51 = vrot.slane %v4700_v56, 5  ;;  %v4070_v27 = vshrl.u32 %v3958_v22, 16 }
 0x2f3   : > { %v10566_v3 = vsel %vm4525_vm3, %v4686_v8, %v4694_v14  ;;  %v4707_v45 = vrot.slane %v4705_v10, 4  ;;  %v3918_v11 = vmax.f32 %v3914_v48, 0.0  ;;  %v3912_v4 = vadd.f32 %v8878_v37, %v3627_v30  ;;  %v3960_v48 = vld [vmem:[#allocation2 + $0x60] sm:$0xf8] }
 0x2f4   : > { %8227 = vmatmul.mubr.bf16.gmra.mrb[172].mxu1 %v10566_v3  ;;  %v4710_v41 = vrot.slane %v4708_v47, 5  ;;  %v4073_v29 = vshll.u32 %v3958_v22, 16  ;;  %v4703_v9 = vor.u32 %v4702_v51, %v4699_v0  ;;  %v4072_v43 = vrot.slane %v4070_v27, 3  ;;  %v4514_v22 = vld [vmem:[#allocation2 + $0xc8] sm:$0x1f] }
 0x2f5   : > { %v4078_v40 = vshrl.u32 %v3959_v1, 16  ;;  %v4081_v26 = vshll.u32 %v3959_v1, 16  ;;  %v3920_v39 = vpack.c.bf16 %v3918_v11, %v3917_v15  ;;  %v3916_v16 = vmax.f32 %v3912_v4, 0.0  ;;  %v3961_v47 = vld [vmem:[#allocation2 + $0x68] sm:$0xf] }
 0x2f6   : > { %v4711_v38 = vor.u32 %v4710_v41, %v4707_v45  ;;  %v4075_v36 = vrot.slane %v4073_v29, 4  ;;  %v4417_v55 = vrot.slane %v4338_v42, 4  ;;  %v4418_v34 = vrot.slane %v4339_v62, 4  ;;  %v4340_v42 = vld [vmem:[#allocation2 + $0x70] sm:$0xf0] }
 0x2f7   : > { %v4080_v50 = vrot.slane %v4078_v40, 3  ;;  %v4083_v24 = vrot.slane %v4081_v26, 4  ;;  %v3924_v6 = vrot.slane %v3920_v39, 4  ;;  %v3919_v37 = vpack.c.bf16 %v3916_v16, %v3915_v32  ;;  %v4341_v29 = vld [vmem:[#allocation2 + $0x78] sm:$0xf] }
 0x2f8   : > { %v10570_v44 = vsel %vm4525_vm3, %v4703_v9, %v4711_v38  ;;  %v4076_v52 = vor.u32 %v4075_v36, %v4072_v43  ;;  %v10574_v15 = vsel %vm4398_vm2, %v4417_v55, %v4418_v34  ;;  %v4714_v17 = vshrl.u32 %v4511_v21, 16  ;;  %v4515_v26 = vld [vmem:[#allocation2 + $0xd0] sm:$0xf0] }
 0x2f9   : > { %8230 = vmatprep.mubr.bf16.mxu1 %v10570_v44  ;;  %v4084_v20 = vor.u32 %v4083_v24, %v4080_v50  ;;  %v4717_v13 = vshll.u32 %v4511_v21, 16  ;;  %3932 = vst [vmem:[#allocation2 + $0x118] ss:$-4 sps:$4 sm:$0xff] %v3924_v6   ;;  %v3923_v8 = vrot.slane %v3919_v37, 4  ;;  %v4722_v14 = vshrl.u32 %v4512_v53, 16 }
 0x2fa   : > { %v4725_v56 = vshll.u32 %v4512_v53, 16  ;;  %v4731_v10 = vshrl.u32 %v4513_v18, 16  ;;  %3946 = vst [vmem:[#allocation2 + $0x110] sm:$0xf0] %v11307_v31  ;;  %3947 = vst [vmem:[#allocation2 + $0x118] sm:$0xf] %v11307_v31 }
 0x2fb   : > { %v10579_v32 = vsel %vm548_vm1, %v4076_v52, %v4084_v20  ;;  %v4716_v58 = vrot.slane %v4714_v17, 4  ;;  %v4719_v30 = vrot.slane %v4717_v13, 5  ;;  %v4734_v0 = vshll.u32 %v4513_v18, 16  ;;  %3930 = vst [vmem:[#allocation2 + $0x108] ss:$-4 sps:$4 sm:$0xff] %v3923_v8  }
 0x2fc   : > { %5181 = vmatmul.mubr.bf16.gmra.mrb[188].mxu0 %v10579_v32  ;;  %v4724_v1 = vrot.slane %v4722_v14, 4  ;;  %v4727_v51 = vrot.slane %v4725_v56, 5  ;;  %v4733_v45 = vrot.slane %v4731_v10, 4  ;;  %v4739_v27 = vshrl.u32 %v4514_v22, 16  ;;  %v4516_v21 = vld [vmem:[#allocation2 + $0xd8] sm:$0x1f] }
 0x2fd   : > { %5188 = vmatprep.mubr.bf16.mxu0 %v10574_v15  ;;  %v4720_v11 = vor.u32 %v4719_v30, %v4716_v58  ;;  %v4736_v4 = vrot.slane %v4734_v0, 5  ;;  %v4742_v31 = vshll.u32 %v4514_v22, 16  ;;  %v4087_v41 = vshrl.u32 %v3960_v48, 16  ;;  %v4517_v52 = vld [vmem:[#allocation2 + $0xe0] sm:$0xf0] }
 0x2fe   : > { %v4728_v62 = vor.u32 %v4727_v51, %v4724_v1  ;;  %v4741_v9 = vrot.slane %v4739_v27, 4  ;;  %v4090_v43 = vshll.u32 %v3960_v48, 16  ;;  %v4095_v40 = vshrl.u32 %v3961_v47, 16  ;;  %v4518_v8 = vld [vmem:[#allocation2 + $0xe8] sm:$0x1f] }
 0x2ff   : > { %v4737_v39 = vor.u32 %v4736_v4, %v4733_v45  ;;  %v4744_v16 = vrot.slane %v4742_v31, 5  ;;  %v4089_v38 = vrot.slane %v4087_v41, 3  ;;  %v4098_v36 = vshll.u32 %v3961_v47, 16  ;;  %v3962_v58 = vld [vmem:[#allocation2 + $0x70] sm:$0xf8] }
 0x300   : > { %v10584_v53 = vsel %vm4525_vm3, %v4720_v11, %v4728_v62  ;;  %v4092_v50 = vrot.slane %v4090_v43, 4  ;;  %v4097_v24 = vrot.slane %v4095_v40, 3  ;;  %v4420_v55 = vrot.slane %v4340_v42, 4  ;;  %v3963_v11 = vld [vmem:[#allocation2 + $0x78] sm:$0xf] }
 0x301   : > { %8231 = vmatmul.mubr.bf16.gmra.mrb[176].mxu1 %v10584_v53  ;;  %v4745_v34 = vor.u32 %v4744_v16, %v4741_v9  ;;  %v4100_v18 = vrot.slane %v4098_v36, 4  ;;  %v4421_v6 = vrot.slane %v4341_v29, 4  ;;  %v4748_v37 = vshrl.u32 %v4515_v26, 16  ;;  %v4342_v62 = vld [vmem:[#allocation2 + $0x80] sm:$0xf0] }
 0x302   : > { %v4093_v20 = vor.u32 %v4092_v50, %v4089_v38  ;;  %v4751_v17 = vshll.u32 %v4515_v26, 16  ;;  %v4756_v13 = vshrl.u32 %v4516_v21, 16  ;;  %v4759_v22 = vshll.u32 %v4516_v21, 16  ;;  %v4343_v9 = vld [vmem:[#allocation2 + $0x88] sm:$0xf] }
 0x303   : > { %v10588_v14 = vsel %vm4525_vm3, %v4737_v39, %v4745_v34  ;;  %v4101_v56 = vor.u32 %v4100_v18, %v4097_v24  ;;  %v10591_v10 = vsel %vm4398_vm2, %v4420_v55, %v4421_v6  ;;  %v4750_v48 = vrot.slane %v4748_v37, 4  ;;  %v4519_v16 = vld [vmem:[#allocation2 + $0xf0] sm:$0xf0]  ;;  %v4520_v24 = vld [vmem:[#allocation2 + $0xf8] sm:$0x1f] }
 0x304   : > { %8234 = vmatprep.mubr.bf16.mxu1 %v10588_v14  ;;  %v4753_v30 = vrot.slane %v4751_v17, 5  ;;  %v4758_v0 = vrot.slane %v4756_v13, 4  ;;  %v4761_v47 = vrot.slane %v4759_v22, 5  ;;  %v4765_v1 = vshrl.u32 %v4517_v52, 16  ;;  %v3964_v13 = vld [vmem:[#allocation2 + $0x80] sm:$0xf8] }
 0x305   : > { %v10595_v51 = vsel %vm548_vm1, %v4093_v20, %v4101_v56  ;;  %v4768_v45 = vshll.u32 %v4517_v52, 16  ;;  %v4773_v27 = vshrl.u32 %v4518_v8, 16  ;;  %v4776_v42 = vshll.u32 %v4518_v8, 16 }
 0x306   : > { %5189 = vmatmul.mubr.bf16.gmra.mrb[192].mxu0 %v10595_v51  ;;  %v4754_v4 = vor.u32 %v4753_v30, %v4750_v48  ;;  %v4762_v31 = vor.u32 %v4761_v47, %v4758_v0  ;;  %v4767_v41 = vrot.slane %v4765_v1, 4  ;;  %v4104_v29 = vshrl.u32 %v3962_v58, 16 }
 0x307   : > { %5196 = vmatprep.mubr.bf16.mxu0 %v10591_v10  ;;  %v4770_v43 = vrot.slane %v4768_v45, 5  ;;  %v4775_v40 = vrot.slane %v4773_v27, 4  ;;  %v4778_v26 = vrot.slane %v4776_v42, 5  ;;  %v4107_v39 = vshll.u32 %v3962_v58, 16  ;;  %v3965_v58 = vld [vmem:[#allocation2 + $0x88] sm:$0xf] }
 0x308   : > { %v10600_v38 = vsel %vm4525_vm3, %v4754_v4, %v4762_v31  ;;  %v4106_v36 = vrot.slane %v4104_v29, 3  ;;  %v4112_v21 = vshrl.u32 %v3963_v11, 16  ;;  %v4115_v50 = vshll.u32 %v3963_v11, 16  ;;  %v3966_v29 = vld [vmem:[#allocation2 + $0x90] sm:$0xf8] }
 0x309   : > { %8235 = vmatmul.mubr.bf16.gmra.mrb[180].mxu1 %v10600_v38  ;;  %v4771_v55 = vor.u32 %v4770_v43, %v4767_v41  ;;  %v4779_v34 = vor.u32 %v4778_v26, %v4775_v40  ;;  %v4109_v18 = vrot.slane %v4107_v39, 4  ;;  %v4423_v6 = vrot.slane %v4342_v62, 4  ;;  %v3967_v26 = vld [vmem:[#allocation2 + $0x98] sm:$0xf] }
 0x30a   : > { %v4114_v37 = vrot.slane %v4112_v21, 3  ;;  %v4117_v52 = vrot.slane %v4115_v50, 4  ;;  %v4424_v20 = vrot.slane %v4343_v9, 4  ;;  %v4782_v17 = vshrl.u32 %v4519_v16, 16  ;;  %v4344_v21 = vld [vmem:[#allocation2 + $0x90] sm:$0xf0] }
 0x30b   : > { %v10604_v22 = vsel %vm4525_vm3, %v4771_v55, %v4779_v34  ;;  %v4110_v8 = vor.u32 %v4109_v18, %v4106_v36  ;;  %v4785_v56 = vshll.u32 %v4519_v16, 16  ;;  %v4790_v48 = vshrl.u32 %v4520_v24, 16  ;;  %v4345_v50 = vld [vmem:[#allocation2 + $0x98] sm:$0xf] }
 0x30c   : > { %8238 = vmatprep.mubr.bf16.mxu1 %v10604_v22  ;;  %v4118_v30 = vor.u32 %v4117_v52, %v4114_v37  ;;  %v4784_v0 = vrot.slane %v4782_v17, 4  ;;  %v4793_v47 = vshll.u32 %v4520_v24, 16  ;;  %v4121_v27 = vshrl.u32 %v3964_v13, 16 }
 0x30d   : > { %v4787_v1 = vrot.slane %v4785_v56, 5  ;;  %v4792_v45 = vrot.slane %v4790_v48, 4  ;;  %v4124_v42 = vshll.u32 %v3964_v13, 16  ;;  %v4129_v31 = vshrl.u32 %v3965_v58, 16 }
 0x30e   : > { %v10608_v11 = vsel %vm548_vm1, %v4110_v8, %v4118_v30  ;;  %v4795_v4 = vrot.slane %v4793_v47, 5  ;;  %v4132_v41 = vshll.u32 %v3965_v58, 16  ;;  %v10612_v62 = vsel %vm4398_vm2, %v4423_v6, %v4424_v20  ;;  %v3968_v30 = vld [vmem:[#allocation2 + $0xa0] sm:$0xf8]  ;;  %v3969_v47 = vld [vmem:[#allocation2 + $0xa8] sm:$0xf] }
 0x30f   : > { %5197 = vmatmul.mubr.bf16.gmra.mrb[196].mxu0 %v10608_v11  ;;  %v4788_v9 = vor.u32 %v4787_v1, %v4784_v0  ;;  %v4123_v43 = vrot.slane %v4121_v27, 3  ;;  %v4126_v40 = vrot.slane %v4124_v42, 4  ;;  %v4131_v16 = vrot.slane %v4129_v31, 3  ;;  %v4346_v1 = vld [vmem:[#allocation2 + $0xa0] sm:$0xf0]  ;;  %v8838_v42 = vld [vmem:[#allocation10 + $0x148] sm:$0xff]  }
 0x310   : > { %5204 = vmatprep.mubr.bf16.mxu0 %v10612_v62  ;;  %v4796_v39 = vor.u32 %v4795_v4, %v4792_v45  ;;  %v4134_v36 = vrot.slane %v4132_v41, 4  ;;  %v4138_v55 = vshrl.u32 %v3966_v29, 16  ;;  %v4141_v34 = vshll.u32 %v3966_v29, 16  ;;  %v4347_v45 = vld [vmem:[#allocation2 + $0xa8] sm:$0xf] }
 0x311   : > { %v4127_v24 = vor.u32 %v4126_v40, %v4123_v43  ;;  %v4146_v6 = vshrl.u32 %v3967_v26, 16  ;;  %v4149_v52 = vshll.u32 %v3967_v26, 16  ;;  %v4426_v20 = vrot.slane %v4344_v21, 4  ;;  %v8841_v26 = vld [vmem:[#allocation10 + $0x150] sm:$0xff]  }
 0x312   : > { %v10616_v18 = vsel %vm4525_vm3, %v4788_v9, %v4796_v39  ;;  %v4135_v37 = vor.u32 %v4134_v36, %v4131_v16  ;;  %v4427_v17 = vrot.slane %v4345_v50, 4  ;;  %v4140_v13 = vrot.slane %v4138_v55, 3  ;;  %v3970_v50 = vld [vmem:[#allocation2 + $0xb0] sm:$0xf8] }
 0x313   : > { %8239 = vmatmul.mubr.bf16.gmra.mrb[184].mxu1 %v10616_v18  ;;  %v4143_v8 = vrot.slane %v4141_v34, 4  ;;  %v4148_v48 = vrot.slane %v4146_v6, 3  ;;  %v4151_v58 = vrot.slane %v4149_v52, 4  ;;  %v4158_v31 = vshll.u32 %v3968_v30, 16  ;;  %v4348_v55 = vld [vmem:[#allocation2 + $0xb0] sm:$0xf0] }
 0x314   : > { %5767 = vmatprep.mubr.bf16.mxu1 %v10359_v19  ;;  %v10621_v56 = vsel %vm548_vm1, %v4127_v24, %v4135_v37  ;;  %v10625_v0 = vsel %vm4398_vm2, %v4426_v20, %v4427_v17  ;;  %v4155_v19 = vshrl.u32 %v3968_v30, 16  ;;  %v4163_v41 = vshrl.u32 %v3969_v47, 16  ;;  %v3971_v24 = vld [vmem:[#allocation2 + $0xb8] sm:$0xf] }
 0x315   : > { %v4144_v27 = vor.u32 %v4143_v8, %v4140_v13  ;;  %v4152_v4 = vor.u32 %v4151_v58, %v4148_v48  ;;  %v4166_v29 = vshll.u32 %v3969_v47, 16  ;;  %v4429_v9 = vrot.slane %v4346_v1, 4  ;;  %v8845_v6 = vld [vmem:[#allocation10 + $0x158] sm:$0xff]   ;;  %v8853_v47 = vld [vmem:[#allocation10 + $0x160] sm:$0xff]  }
 0x316   : > { %v4430_v43 = vrot.slane %v4347_v45, 4  ;;  %v4157_v40 = vrot.slane %v4155_v19, 3  ;;  %v4160_v16 = vrot.slane %v4158_v31, 4  ;;  %v4165_v36 = vrot.slane %v4163_v41, 3  ;;  %v3972_v19 = vld [vmem:[#allocation2 + $0xc0] sm:$0xf8] }
 0x317   : > { %5205 = vmatmul.mubr.bf16.gmra.mrb[200].mxu0 %v10621_v56  ;;  %v10632_v39 = vsel %vm548_vm1, %v4144_v27, %v4152_v4  ;;  %v4168_v21 = vrot.slane %v4166_v29, 4  ;;  %v4172_v34 = vshrl.u32 %v3970_v50, 16  ;;  %v4175_v37 = vshll.u32 %v3970_v50, 16  ;;  %v3973_v4 = vld [vmem:[#allocation2 + $0xc8] sm:$0xf] }
 0x318   : > { %5212 = vmatprep.mubr.bf16.mxu0 %v10625_v0  ;;  %v4161_v52 = vor.u32 %v4160_v16, %v4157_v40  ;;  %v4180_v17 = vshrl.u32 %v3971_v24, 16  ;;  %v4183_v13 = vshll.u32 %v3971_v24, 16  ;;  %v4432_v8 = vrot.slane %v4348_v55, 4  ;;  %v4350_v31 = vld [vmem:[#allocation2 + $0xc0] sm:$0xf0]  ;;  %v8855_v55 = vld [vmem:[#allocation10 + $0x170] sm:$0xff]  }
 0x319   : > { %v4169_v20 = vor.u32 %v4168_v21, %v4165_v36  ;;  %v4174_v58 = vrot.slane %v4172_v34, 3  ;;  %v4177_v30 = vrot.slane %v4175_v37, 4  ;;  %v4351_v41 = vld [vmem:[#allocation2 + $0xc8] sm:$0xf]  ;;  %v4197_v16 = vshrl.u32 %v3973_v4, 16 }
 0x31a   : > { %v4182_v45 = vrot.slane %v4180_v17, 3  ;;  %v4185_v27 = vrot.slane %v4183_v13, 4  ;;  %v4200_v36 = vshll.u32 %v3973_v4, 16  ;;  %v4435_v21 = vrot.slane %v4350_v31, 4  ;;  %v3975_v17 = vld [vmem:[#allocation2 + $0xd8] sm:$0xf] }
 0x31b   : > { %5768 = vmatmul.mubr.bf16.vlgmr.msra.gmra.mrb[188].mxu1 %v10424_v7  ;;  %v10636_v7 = vsel %vm4398_vm2, %v4429_v9, %v4430_v43  ;;  %v10642_v1 = vsel %vm548_vm1, %v4161_v52, %v4169_v20  ;;  %v4178_v29 = vor.u32 %v4177_v30, %v4174_v58  ;;  %v4189_v9 = vshrl.u32 %v3972_v19, 16  ;;  %v8854_v43 = vld [vmem:[#allocation10 + $0x168] sm:$0xff]   ;;  %v3974_v52 = vld [vmem:[#allocation2 + $0xd0] sm:$0xf8]  ;;  %v8856_v30 = vld [vmem:[#allocation10 + $0x178] sm:$0xff]  }
 0x31c   : > { %5775 = vmatprep.mubr.bf16.mxu1 %v10419_v28  ;;  %8243 = vmatpush3.bf16.msra.mxu1 %v10497_v60  ;;  %v4349_v60 = vld [vmem:[#allocation2 + $0xb8] sm:$0xf]  ;;  %v4186_v40 = vor.u32 %v4185_v27, %v4182_v45  ;;  %v4436_v50 = vrot.slane %v4351_v41, 4  ;;  %v4199_v37 = vrot.slane %v4197_v16, 3  ;;  %v4352_v13 = vld [vmem:[#allocation2 + $0xd0] sm:$0xf0] }
 0x31d   : > { %8244 = vmatprep.subr.bf16.mxu1 %v8838_v42  ;;  %v4433_v48 = vrot.slane %v4349_v60, 4  ;;  %v4191_v24 = vrot.slane %v4189_v9, 3  ;;  %v4209_v58 = vshll.u32 %v3974_v52, 16  ;;  %v4214_v27 = vshrl.u32 %v3975_v17, 16  ;;  %v10661_v9 = vld [vmem:[#allocation10 + $0x200] sm:$0xff]  }
 0x31e   : > { %v10652_v60 = vsel %vm548_vm1, %v4178_v29, %v4186_v40  ;;  %v10656_v20 = vsel %vm4398_vm2, %v4435_v21, %v4436_v50  ;;  %v4438_v4 = vrot.slane %v4352_v13, 4  ;;  %v3976_v16 = vld [vmem:[#allocation2 + $0xe0] sm:$0xf8]  ;;  %v3977_v21 = vld [vmem:[#allocation2 + $0xe8] sm:$0xf] }
 0x31f   : > { %5213 = vmatmul.mubr.bf16.gmra.mrb[204].mxu0 %v10632_v39  ;;  %v4211_v29 = vrot.slane %v4209_v58, 4  ;;  %v4216_v40 = vrot.slane %v4214_v27, 3  ;;  %v4354_v50 = vld [vmem:[#allocation2 + $0xe0] sm:$0xf0]  ;;  %v3978_v27 = vld [vmem:[#allocation2 + $0xf0] sm:$0xf8] }
 0x320   : > { %5220 = vmatprep.mubr.bf16.mxu0 %v10636_v7  ;;  %8245 = vmatpush3.bf16.msra.mxu1 %v8838_v42  ;;  %v10646_v42 = vsel %vm4398_vm2, %v4432_v8, %v4433_v48  ;;  %v4353_v8 = vld [vmem:[#allocation2 + $0xd8] sm:$0xf]  ;;  %v4206_v48 = vshrl.u32 %v3974_v52, 16  ;;  %v4231_v52 = vshrl.u32 %v3977_v21, 16  ;;  %v4441_v13 = vrot.slane %v4354_v50, 4 }
 0x321   : > { %8246 = vmatprep.subr.bf16.mxu1 %v8841_v26  ;;  %v4439_v31 = vrot.slane %v4353_v8, 4 }
 0x322   : > { %v4208_v41 = vrot.slane %v4206_v48, 3 }
 0x323   : > { %5776 = vmatmul.mubr.bf16.gmra.mrb[192].mxu1 %v10480_v2 }
 0x324   : > { %5783 = vmatprep.mubr.bf16.mxu1 %v10475_v63  ;;  %8247 = vmatpush3.bf16.msra.mxu1 %v8841_v26  ;;  %v4192_v26 = vshll.u32 %v3972_v19, 16  ;;  %v4217_v19 = vshll.u32 %v3975_v17, 16  ;;  %v4234_v17 = vshll.u32 %v3977_v21, 16 }
 0x325   : > { %8248 = vmatprep.subr.bf16.mxu1 %v8845_v6 }
 0x326   : > { %v4194_v34 = vrot.slane %v4192_v26, 4  ;;  %v4219_v26 = vrot.slane %v4217_v19, 4 }
 0x327   : > { %5221 = vmatmul.mubr.bf16.gmra.mrb[208].mxu0 %v10642_v1 }
 0x328   : > { %5228 = vmatprep.mubr.bf16.mxu0 %v10646_v42  ;;  %8249 = vmatpush3.bf16.msra.mxu1 %v8845_v6  ;;  %v4202_v6 = vrot.slane %v4200_v36, 4  ;;  %v10668_v36 = vsel %vm4398_vm2, %v4438_v4, %v4439_v31  ;;  %v3979_v4 = vld [vmem:[#allocation2 + $0xf8] sm:$0xf]  ;;  %v4356_v31 = vld [vmem:[#allocation2 + $0xf0] sm:$0xf0] }
 0x329   : > { %8250 = vmatprep.subr.bf16.mxu1 %v8853_v47  ;;  %v4248_v21 = vshrl.u32 %v3979_v4, 16  ;;  %v4251_v50 = vshll.u32 %v3979_v4, 16 }
 0x32a   : > { %v4203_v45 = vor.u32 %v4202_v6, %v4199_v37  ;;  %v4220_v37 = vor.u32 %v4219_v26, %v4216_v40  ;;  %v4226_v6 = vshll.u32 %v3976_v16, 16  ;;  %v4243_v40 = vshll.u32 %v3978_v27, 16 }
 0x32b   : > { %5784 = vmatmul.mubr.bf16.gmra.mrb[196].mxu1 %v10521_v23 }
 0x32c   : > { %5791 = vmatprep.mubr.bf16.mxu1 %v10516_v35  ;;  %8251 = vmatpush3.bf16.msra.mxu1 %v8853_v47  ;;  %v4195_v47 = vor.u32 %v4194_v34, %v4191_v24  ;;  %v4355_v24 = vld [vmem:[#allocation2 + $0xe8] sm:$0xf]  ;;  %v4223_v34 = vshrl.u32 %v3976_v16, 16 }
 0x32d   : > { %8252 = vmatprep.subr.bf16.mxu1 %v8854_v43  ;;  %v4442_v8 = vrot.slane %v4355_v24, 4  ;;  %v4444_v24 = vrot.slane %v4356_v31, 4 }
 0x32e   : > { %v4225_v48 = vrot.slane %v4223_v34, 3 }
 0x32f   : > { %5229 = vmatmul.mubr.bf16.gmra.mrb[212].mxu0 %v10652_v60  ;;  %v10679_v19 = vsel %vm4398_vm2, %v4441_v13, %v4442_v8 }
 0x330   : > { %5236 = vmatprep.mubr.bf16.mxu0 %v10656_v20  ;;  %8253 = vmatpush3.bf16.msra.mxu1 %v8854_v43  ;;  %v10664_v43 = vsel %vm548_vm1, %v4195_v47, %v4203_v45  ;;  %v4228_v47 = vrot.slane %v4226_v6, 4  ;;  %v4236_v45 = vrot.slane %v4234_v17, 4  ;;  %v4245_v6 = vrot.slane %v4243_v40, 4 }
 0x331   : > { %8254 = vmatprep.subr.bf16.mxu1 %v8855_v55  ;;  %v4253_v17 = vrot.slane %v4251_v50, 4 }
 0x332   : > { %v4229_v26 = vor.u32 %v4228_v47, %v4225_v48 }
 0x333   : > { %5792 = vmatmul.mubr.bf16.gmra.mrb[200].mxu1 %v10557_v33 }
 0x334   : > { %5799 = vmatprep.mubr.bf16.mxu1 %v10552_v59  ;;  %8255 = vmatpush3.bf16.msra.mxu1 %v8855_v55  ;;  %v4212_v55 = vor.u32 %v4211_v29, %v4208_v41  ;;  %v4357_v41 = vld [vmem:[#allocation2 + $0xf8] sm:$0xf]  ;;  %v4240_v29 = vshrl.u32 %v3978_v27, 16 }
 0x335   : > { %8256 = vmatprep.subr.bf16.mxu1 %v8856_v30 }
 0x336   : > { %v10675_v58 = vsel %vm548_vm1, %v4212_v55, %v4220_v37  ;;  %v4445_v55 = vrot.slane %v4357_v41, 4  ;;  %v4242_v34 = vrot.slane %v4240_v29, 3 }
 0x337   : > { %5237 = vmatmul.mubr.bf16.gmra.mrb[216].mxu0 %v10664_v43 }
 0x338   : > { %5244 = vmatprep.mubr.bf16.mxu0 %v10668_v36  ;;  %8257 = vmatpush3.bf16.msra.mxu1 %v8856_v30  ;;  %v4233_v30 = vrot.slane %v4231_v52, 3  ;;  %v4250_v52 = vrot.slane %v4248_v21, 3  ;;  %v10689_v13 = vsel %vm4398_vm2, %v4444_v24, %v4445_v55  ;;  %v4246_v8 = vor.u32 %v4245_v6, %v4242_v34  ;;  %v8859_v55 = vld [vmem:[#allocation10 + $0x210] sm:$0xff]   ;;  %v8862_v6 = vld [vmem:[#allocation10 + $0x228] sm:$0xff]  }
 0x339   : > { %8290 = vmatprep.subr.bf16.mxu1 %v10661_v9 }
 0x33a   : > { %v4237_v16 = vor.u32 %v4236_v45, %v4233_v30  ;;  %v4254_v48 = vor.u32 %v4253_v17, %v4250_v52 }
 0x33b   : > { %5800 = vmatmul.mubr.bf16.gmra.mrb[204].mxu1 %v10579_v32 }
 0x33c   : > { %5807 = vmatprep.mubr.bf16.mxu1 %v10574_v15  ;;  %v10685_v37 = vsel %vm548_vm1, %v4229_v26, %v4237_v16  ;;  %v10695_v47 = vsel %vm548_vm1, %v4246_v8, %v4254_v48  ;;  %v8858_v16 = vld [vmem:[#allocation10 + $0x208] sm:$0xff]  }
 0x33f   : > { %5245 = vmatmul.mubr.bf16.gmra.mrb[220].mxu0 %v10675_v58 }
 0x340   : > { %5252 = vmatprep.mubr.bf16.mxu0 %v10679_v19 }
 0x343   : > { %5808 = vmatmul.mubr.bf16.gmra.mrb[208].mxu1 %v10595_v51 }
 0x344   : > { %5815 = vmatprep.mubr.bf16.mxu1 %v10591_v10 }
 0x347   : > { %5253 = vmatmul.mubr.bf16.gmra.mrb[224].mxu0 %v10685_v37 }
 0x348   : > { %5260 = vmatprep.mubr.bf16.mxu0 %v10689_v13 }
 0x34b   : > { %5816 = vmatmul.mubr.bf16.gmra.mrb[212].mxu1 %v10608_v11 }
 0x34c   : > { %5823 = vmatprep.mubr.bf16.mxu1 %v10612_v62 }
 0x34f   : > { %5261 = vmatmul.mubr.bf16.gmra.mrb[228].mxu0 %v10695_v47 }
 0x350   : > { %6426 = vmatprep.mubr.bf16.mxu0 %v10419_v28  ;;  %v3980_v28 = vld [vmem:[#allocation2 + $0x100] sm:$0xf8] }
 0x353   : > { %5824 = vmatmul.mubr.bf16.gmra.mrb[216].mxu1 %v10621_v56 }
 0x354   : > { %5831 = vmatprep.mubr.bf16.mxu1 %v10625_v0 }
 0x357   : > { %6427 = vmatmul.mubr.bf16.vlgmr.msra.gmra.mrb[232].mxu0 %v10480_v2  ;;  %v4358_v2 = vld [vmem:[#allocation2 + $0x100] sm:$0xf0] }
 0x358   : > { %6434 = vmatprep.mubr.bf16.mxu0 %v10475_v63  ;;  %v3981_v63 = vld [vmem:[#allocation2 + $0x108] sm:$0xf] }
 0x35b   : > { %5832 = vmatmul.mubr.bf16.gmra.mrb[220].mxu1 %v10632_v39 }
 0x35c   : > { %5839 = vmatprep.mubr.bf16.mxu1 %v10636_v7 }
 0x35f   : > { %6435 = vmatmul.mubr.bf16.gmra.mrb[236].mxu0 %v10521_v23  ;;  %v4257_v23 = vshrl.u32 %v3980_v28, 16 }
 0x360   : > { %6442 = vmatprep.mubr.bf16.mxu0 %v10516_v35  ;;  %v4359_v35 = vld [vmem:[#allocation2 + $0x108] sm:$0xf] }
 0x361   : > { %v4259_v45 = vrot.slane %v4257_v23, 3  ;;  %v4360_v23 = vld [vmem:[#allocation2 + $0x110] sm:$0xf0] }
 0x363   : > { %5840 = vmatmul.mubr.bf16.gmra.mrb[224].mxu1 %v10642_v1 }
 0x364   : > { %5847 = vmatprep.mubr.bf16.mxu1 %v10646_v42 }
 0x367   : > { %6443 = vmatmul.mubr.bf16.gmra.mrb[240].mxu0 %v10557_v33  ;;  %v4265_v33 = vshrl.u32 %v3981_v63, 16 }
 0x368   : > { %6450 = vmatprep.mubr.bf16.mxu0 %v10552_v59  ;;  %v4260_v59 = vshll.u32 %v3980_v28, 16 }
 0x369   : > { %v4267_v4 = vrot.slane %v4265_v33, 3 }
 0x36a   : > { %v4262_v27 = vrot.slane %v4260_v59, 4  ;;  %v4361_v59 = vld [vmem:[#allocation2 + $0x118] sm:$0xf] }
 0x36b   : > { %5848 = vmatmul.mubr.bf16.gmra.mrb[228].mxu1 %v10652_v60 }
 0x36c   : > { %5855 = vmatprep.mubr.bf16.mxu1 %v10656_v20  ;;  %v4263_v40 = vor.u32 %v4262_v27, %v4259_v45 }
 0x36f   : > { %6451 = vmatmul.mubr.bf16.gmra.mrb[244].mxu0 %v10579_v32  ;;  %v4447_v32 = vrot.slane %v4358_v2, 4  ;;  %v3982_v2 = vld [vmem:[#allocation2 + $0x110] sm:$0xf8] }
 0x370   : > { %6458 = vmatprep.mubr.bf16.mxu0 %v10574_v15  ;;  %v4268_v15 = vshll.u32 %v3981_v63, 16  ;;  %v4277_v33 = vshll.u32 %v3982_v2, 16 }
 0x372   : > { %v4270_v31 = vrot.slane %v4268_v15, 4 }
 0x373   : > { %5856 = vmatmul.mubr.bf16.gmra.mrb[232].mxu1 %v10664_v43 }
 0x374   : > { %5863 = vmatprep.mubr.bf16.mxu1 %v10668_v36 }
 0x377   : > { %6459 = vmatmul.mubr.bf16.gmra.mrb[248].mxu0 %v10595_v51 }
 0x378   : > { %6466 = vmatprep.mubr.bf16.mxu0 %v10591_v10  ;;  %v4448_v10 = vrot.slane %v4359_v35, 4  ;;  %v3983_v35 = vld [vmem:[#allocation2 + $0x118] sm:$0xf] }
 0x379   : > { %v4282_v15 = vshrl.u32 %v3983_v35, 16 }
 0x37a   : > { %v10731_v29 = vsel %vm4398_vm2, %v4447_v32, %v4448_v10  ;;  %v4450_v32 = vrot.slane %v4360_v23, 4  ;;  %v4451_v10 = vrot.slane %v4361_v59, 4 }
 0x37b   : > { %5864 = vmatmul.mubr.bf16.gmra.mrb[236].mxu1 %v10675_v58 }
 0x37c   : > { %5871 = vmatprep.mubr.bf16.mxu1 %v10679_v19 }
 0x37f   : > { %6467 = vmatmul.mubr.bf16.gmra.mrb[252].mxu0 %v10608_v11 }
 0x380   : > { %6474 = vmatprep.mubr.bf16.mxu0 %v10612_v62 }
 0x383   : > { %5872 = vmatmul.mubr.bf16.gmra.mrb[240].mxu1 %v10685_v37 }
 0x384   : > { %5879 = vmatprep.mubr.bf16.mxu1 %v10689_v13 }
 0x386   : > { %v7646_v51 = vpop.f32.mrb[168].mxu0 }
 0x387   : > { %6475 = vmatmul.mubr.bf16.gmra.mrb[0].mxu0 %v10621_v56  ;;  %v7647_v11 = vpop.f32.mrb[169].mxu0 }
 0x388   : > { %6482 = vmatprep.mubr.bf16.mxu0 %v10625_v0  ;;  %v10727_v62 = vadd.f32 %v7647_v11, %v7646_v51  ;;  %v7649_v30 = vpop.f32.mrb[170].mxu0  ;;  %v4271_v0 = vor.u32 %v4270_v31, %v4267_v4  ;;  %v4521_v11 = vld [vmem:[#allocation2 + $0x100] sm:$0xf0]  ;;  %v4279_v4 = vrot.slane %v4277_v33, 4  ;;  %v4284_v31 = vrot.slane %v4282_v15, 3 }
 0x389   : > { %v7650_v41 = vpop.f32.mrb[171].mxu0 }
 0x38a   : > { %v10733_v56 = vadd.f32 %v7650_v41, %v7649_v30  ;;  %v10739_v26 = vsel %vm548_vm1, %v4263_v40, %v4271_v0  ;;  %v4522_v30 = vld [vmem:[#allocation2 + $0x108] sm:$0x1f]  ;;  %v4452_v40 = vsel %vm4398_vm2, %v4450_v32, %v4451_v10 }
 0x38b   : > { %5880 = vmatmul.mubr.bf16.gmra.mrb[244].mxu1 %v10695_v47 }
 0x38c   : > { %5887 = vmatprep.mubr.bf16.mxu1 %v10731_v29 }
 0x38f   : > { %6483 = vmatmul.mubr.bf16.gmra.mrb[4].mxu0 %v10632_v39 }
 0x390   : > { %6490 = vmatprep.mubr.bf16.mxu0 %v10636_v7 }
 0x393   : > { %5888 = vmatmul.mubr.bf16.gmra.mrb[248].mxu1 %v10739_v26 }
 0x394   : > { %8258 = vmatprep.mubr.bf16.mxu1 %v10388_v61 }
 0x397   : > { %6491 = vmatmul.mubr.bf16.gmra.mrb[8].mxu0 %v10642_v1  ;;  %v8860_v1 = vld [vmem:[#allocation10 + $0x218] sm:$0xff]  }
 0x398   : > { %6498 = vmatprep.mubr.bf16.mxu0 %v10646_v42  ;;  %v7652_v21 = vpop.f32.mrb[172].mxu0  ;;  %v8861_v42 = vld [vmem:[#allocation10 + $0x220] sm:$0xff]  }
 0x399   : > { %v7653_v50 = vpop.f32.mrb[173].mxu0 }
 0x39a   : > { %v10746_v24 = vadd.f32 %v7653_v50, %v7652_v21  ;;  %v7655_v39 = vpop.f32.mrb[174].mxu0  ;;  %v4802_v21 = vshll.u32 %v4521_v11, 16  ;;  %v4807_v50 = vshrl.u32 %v4522_v30, 16 }
 0x39b   : > { %8259 = vmatmul.mubr.bf16.vlgmr.msra.gmra.mrb[156].mxu1 %v10404_v57  ;;  %v7656_v7 = vpop.f32.mrb[175].mxu0 }
 0x39c   : > { %8262 = vmatprep.mubr.bf16.mxu1 %v10441_v49  ;;  %8291 = vmatpush3.bf16.msra.mxu1 %v10661_v9  ;;  %v10750_v61 = vadd.f32 %v7656_v7, %v7655_v39  ;;  %v4810_v39 = vshll.u32 %v4522_v30, 16 }
 0x39d   : > { %8292 = vmatprep.subr.bf16.mxu1 %v8858_v16 }
 0x39f   : > { %6499 = vmatmul.mubr.bf16.gmra.mrb[12].mxu0 %v10652_v60 }
 0x3a0   : > { %6506 = vmatprep.mubr.bf16.mxu0 %v10656_v20  ;;  %8293 = vmatpush3.bf16.msra.mxu1 %v8858_v16  ;;  %v4799_v16 = vshrl.u32 %v4521_v11, 16 }
 0x3a1   : > { %8294 = vmatprep.subr.bf16.mxu1 %v8859_v55 }
 0x3a3   : > { %8263 = vmatmul.mubr.bf16.gmra.mrb[160].mxu1 %v10456_v25 }
 0x3a4   : > { %8266 = vmatprep.mubr.bf16.mxu1 %v10491_v12  ;;  %8295 = vmatpush3.bf16.msra.mxu1 %v8859_v55 }
 0x3a5   : > { %8296 = vmatprep.subr.bf16.mxu1 %v8860_v1 }
 0x3a6   : > { %v7658_v9 = vpop.f32.mrb[176].mxu0 }
 0x3a7   : > { %6507 = vmatmul.mubr.bf16.gmra.mrb[16].mxu0 %v10664_v43  ;;  %v7659_v34 = vpop.f32.mrb[177].mxu0  ;;  %v8863_v43 = vld [vmem:[#allocation10 + $0x230] sm:$0xff]  }
 0x3a8   : > { %6514 = vmatprep.mubr.bf16.mxu0 %v10668_v36  ;;  %8297 = vmatpush3.bf16.msra.mxu1 %v8860_v1  ;;  %v10758_v60 = vadd.f32 %v7659_v34, %v7658_v9  ;;  %v7661_v20 = vpop.f32.mrb[178].mxu0  ;;  %v8864_v36 = vld [vmem:[#allocation10 + $0x238] sm:$0xff]   ;;  %v4804_v9 = vrot.slane %v4802_v21, 5  ;;  %v4809_v34 = vrot.slane %v4807_v50, 4 }
 0x3a9   : > { %8298 = vmatprep.subr.bf16.mxu1 %v8861_v42  ;;  %v7662_v52 = vpop.f32.mrb[179].mxu0 }
 0x3aa   : > { %v10761_v17 = vadd.f32 %v7662_v52, %v7661_v20  ;;  %v4812_v20 = vrot.slane %v4810_v39, 5 }
 0x3ab   : > { %8267 = vmatmul.mubr.bf16.gmra.mrb[164].mxu1 %v10506_v54 }
 0x3ac   : > { %8270 = vmatprep.mubr.bf16.mxu1 %v10531_v5  ;;  %8299 = vmatpush3.bf16.msra.mxu1 %v8861_v42  ;;  %v4801_v42 = vrot.slane %v4799_v16, 4 }
 0x3ad   : > { %8300 = vmatprep.subr.bf16.mxu1 %v8862_v6 }
 0x3ae   : > { %v4805_v52 = vor.u32 %v4804_v9, %v4801_v42 }
 0x3af   : > { %6515 = vmatmul.mubr.bf16.gmra.mrb[20].mxu0 %v10675_v58 }
 0x3b0   : > { %6522 = vmatprep.mubr.bf16.mxu0 %v10679_v19  ;;  %8301 = vmatpush3.bf16.msra.mxu1 %v8862_v6 }
 0x3b1   : > { %8302 = vmatprep.subr.bf16.mxu1 %v8863_v43 }
 0x3b3   : > { %8271 = vmatmul.mubr.bf16.gmra.mrb[168].mxu1 %v10544_v46 }
 0x3b4   : > { %8274 = vmatprep.mubr.bf16.mxu1 %v10566_v3  ;;  %8303 = vmatpush3.bf16.msra.mxu1 %v8863_v43  ;;  %v7664_v8 = vpop.f32.mrb[180].mxu0  ;;  %v4813_v43 = vor.u32 %v4812_v20, %v4809_v34 }
 0x3b5   : > { %8304 = vmatprep.subr.bf16.mxu1 %v8864_v36  ;;  %v7665_v48 = vpop.f32.mrb[181].mxu0 }
 0x3b6   : > { %v10769_v28 = vadd.f32 %v7665_v48, %v7664_v8  ;;  %v7667_v63 = vpop.f32.mrb[182].mxu0 }
 0x3b7   : > { %6523 = vmatmul.mubr.bf16.gmra.mrb[24].mxu0 %v10685_v37  ;;  %v7668_v58 = vpop.f32.mrb[183].mxu0  ;;  %v4274_v37 = vshrl.u32 %v3982_v2, 16 }
 0x3b8   : > { %6530 = vmatprep.mubr.bf16.mxu0 %v10689_v13  ;;  %8305 = vmatpush3.bf16.msra.mxu1 %v8864_v36  ;;  %v10772_v19 = vadd.f32 %v7668_v58, %v7667_v63  ;;  %v4285_v13 = vshll.u32 %v3983_v35, 16  ;;  %v10792_v63 = vsel %vm4525_vm3, %v4805_v52, %v4813_v43 }
 0x3b9   : > { %v4276_v27 = vrot.slane %v4274_v37, 3 }
 0x3bb   : > { %8275 = vmatmul.mubr.bf16.gmra.mrb[172].mxu1 %v10570_v44  ;;  %v4280_v55 = vor.u32 %v4279_v4, %v4276_v27 }
 0x3bc   : > { %8278 = vmatprep.mubr.bf16.mxu1 %v10584_v53 }
 0x3bf   : > { %6531 = vmatmul.mubr.bf16.gmra.mrb[28].mxu0 %v10695_v47  ;;  %v4287_v47 = vrot.slane %v4285_v13, 4 }
 0x3c0   : > { %6538 = vmatprep.mubr.bf16.mxu0 %v10731_v29 }
 0x3c1   : > { %v4288_v1 = vor.u32 %v4287_v47, %v4284_v31 }
 0x3c2   : > { %v7670_v51 = vpop.f32.mrb[184].mxu0 }
 0x3c3   : > { %8279 = vmatmul.mubr.bf16.gmra.mrb[176].mxu1 %v10588_v14  ;;  %v7671_v45 = vpop.f32.mrb[185].mxu0  ;;  %v4289_v6 = vsel %vm548_vm1, %v4280_v55, %v4288_v1 }
 0x3c4   : > { %8282 = vmatprep.mubr.bf16.mxu1 %v10600_v38  ;;  %v10780_v41 = vadd.f32 %v7671_v45, %v7670_v51  ;;  %v7673_v29 = vpop.f32.mrb[186].mxu0 }
 0x3c5   : > { %v7674_v0 = vpop.f32.mrb[187].mxu0 }
 0x3c6   : > { %v10784_v7 = vadd.f32 %v7674_v0, %v7673_v29 }
 0x3c7   : > { %6539 = vmatmul.mubr.bf16.gmra.mrb[32].mxu0 %v10739_v26 }
 0x3c8   : > { %6546 = vmatprep.mubr.bf16.mxu0 %v4452_v40 }
 0x3cb   : > { %8283 = vmatmul.mubr.bf16.gmra.mrb[180].mxu1 %v10604_v22 }
 0x3cc   : > { %8286 = vmatprep.mubr.bf16.mxu1 %v10616_v18 }
 0x3cf   : > { %6547 = vmatmul.mubr.bf16.gmra.mrb[36].mxu0 %v4289_v6  ;;  %v7676_v36 = vpop.f32.mrb[188].mxu0 }
 0x3d0   : > { %v7677_v26 = vpop.f32.mrb[189].mxu0 }
 0x3d1   : > { %v10789_v8 = vadd.f32 %v7677_v26, %v7676_v36  ;;  %v7679_v48 = vpop.f32.mrb[190].mxu0 }
 0x3d2   : > { %v7680_v58 = vpop.f32.mrb[191].mxu0 }
 0x3d3   : > { %8287 = vmatmul.mubr.bf16.gmra.mrb[184].mxu1 %v10792_v63  ;;  %v10795_v2 = vadd.f32 %v7680_v58, %v7679_v48 }
 0x3d4   : > { %8306 = vmatprep.mubr.bf16.mxu1 %v10404_v57 }
 0x3d9   : > { %v7682_v35 = vpop.f32.mrb[192].mxu0 }
 0x3da   : > { %v7683_v23 = vpop.f32.mrb[193].mxu0 }
 0x3db   : > { %8307 = vmatmul.mubr.bf16.vlgmr.msra.gmra.mrb[156].mxu1 %v10441_v49  ;;  %v10799_v59 = vadd.f32 %v7683_v23, %v7682_v35  ;;  %v7685_v37 = vpop.f32.mrb[194].mxu0  ;;  %v4523_v23 = vld [vmem:[#allocation2 + $0x110] sm:$0xf0] }
 0x3dc   : > { %8310 = vmatprep.mubr.bf16.mxu1 %v10456_v25  ;;  %v7686_v33 = vpop.f32.mrb[195].mxu0 }
 0x3dd   : > { %v10802_v15 = vadd.f32 %v7686_v33, %v7685_v37  ;;  %v4524_v33 = vld [vmem:[#allocation2 + $0x118] sm:$0x1f] }
 0x3e2   : > { %v7688_v13 = vpop.f32.mrb[196].mxu0 }
 0x3e3   : > { %8311 = vmatmul.mubr.bf16.gmra.mrb[160].mxu1 %v10491_v12  ;;  %v7689_v32 = vpop.f32.mrb[197].mxu0 }
 0x3e4   : > { %8314 = vmatprep.mubr.bf16.mxu1 %v10506_v54  ;;  %v10806_v10 = vadd.f32 %v7689_v32, %v7688_v13  ;;  %v7691_v57 = vpop.f32.mrb[198].mxu0  ;;  %v4816_v32 = vshrl.u32 %v4523_v23, 16 }
 0x3e5   : > { %v7692_v51 = vpop.f32.mrb[199].mxu0 }
 0x3e6   : > { %v10808_v11 = vadd.f32 %v7692_v51, %v7691_v57  ;;  %v4819_v57 = vshll.u32 %v4523_v23, 16 }
 0x3ea   : > { %v7694_v49 = vpop.f32.mrb[200].mxu0 }
 0x3eb   : > { %8315 = vmatmul.mubr.bf16.gmra.mrb[164].mxu1 %v10531_v5  ;;  %v7695_v30 = vpop.f32.mrb[201].mxu0 }
 0x3ec   : > { %8318 = vmatprep.mubr.bf16.mxu1 %v10544_v46  ;;  %v10812_v25 = vadd.f32 %v7695_v30, %v7694_v49  ;;  %v7697_v45 = vpop.f32.mrb[202].mxu0 }
 0x3ed   : > { %v7698_v27 = vpop.f32.mrb[203].mxu0 }
 0x3ee   : > { %v7782_v12 = vpop.f32.mrb[188].mxu1  ;;  %v10814_v4 = vadd.f32 %v7698_v27, %v7697_v45  ;;  %v4824_v45 = vshrl.u32 %v4524_v33, 16  ;;  %v4827_v27 = vshll.u32 %v4524_v33, 16 }
 0x3ef   : > { %v7783_v54 = vpop.f32.mrb[189].mxu1 }
 0x3f0   : > { %v7784_v31 = vadd.f32 %v7783_v54, %v7782_v12  ;;  %v7785_v47 = vpop.f32.mrb[190].mxu1 }
 0x3f1   : > { %v7786_v29 = vpop.f32.mrb[191].mxu1 }
 0x3f2   : > { %v10817_v40 = vadd.f32 %v7784_v31, %v10727_v62  ;;  %v7787_v0 = vadd.f32 %v7786_v29, %v7785_v47  ;;  %v7700_v16 = vpop.f32.mrb[204].mxu0  ;;  %v4818_v47 = vrot.slane %v4816_v32, 4 }
 0x3f3   : > { %8319 = vmatmul.mubr.bf16.gmra.mrb[168].mxu1 %v10566_v3  ;;  %v7701_v5 = vpop.f32.mrb[205].mxu0 }
 0x3f4   : > { %v10821_v46 = vadd.f32 %v7787_v0, %v10733_v56  ;;  %8322 = vmatprep.mubr.bf16.mxu1 %v10570_v44  ;;  %v10824_v21 = vadd.f32 %v7701_v5, %v7700_v16  ;;  %v7703_v50 = vpop.f32.mrb[206].mxu0  ;;  %v4821_v0 = vrot.slane %v4819_v57, 5  ;;  %v4826_v16 = vrot.slane %v4824_v45, 4 }
 0x3f5   : > { %v7704_v39 = vpop.f32.mrb[207].mxu0  ;;  %v4829_v5 = vrot.slane %v4827_v27, 5 }
 0x3f6   : > { %v7788_v55 = vpop.f32.mrb[192].mxu1  ;;  %v10826_v1 = vadd.f32 %v7704_v39, %v7703_v50 }
 0x3f7   : > { %v7789_v42 = vpop.f32.mrb[193].mxu1 }
 0x3f8   : > { %v7790_v62 = vadd.f32 %v7789_v42, %v7788_v55  ;;  %v7791_v9 = vpop.f32.mrb[194].mxu1 }
 0x3f9   : > { %v7792_v34 = vpop.f32.mrb[195].mxu1 }
 0x3fa   : > { %v10829_v20 = vadd.f32 %v7790_v62, %v10746_v24  ;;  %v7793_v3 = vadd.f32 %v7792_v34, %v7791_v9  ;;  %v7706_v6 = vpop.f32.mrb[208].mxu0  ;;  %v4822_v34 = vor.u32 %v4821_v0, %v4818_v47 }
 0x3fb   : > { %8323 = vmatmul.mubr.bf16.gmra.mrb[172].mxu1 %v10584_v53  ;;  %v7707_v56 = vpop.f32.mrb[209].mxu0 }
 0x3fc   : > { %v10833_v44 = vadd.f32 %v7793_v3, %v10750_v61  ;;  %8326 = vmatprep.mubr.bf16.mxu1 %v10588_v14  ;;  %v10836_v52 = vadd.f32 %v7707_v56, %v7706_v6  ;;  %v7709_v43 = vpop.f32.mrb[210].mxu0  ;;  %v4830_v3 = vor.u32 %v4829_v5, %v4826_v16 }
 0x3fd   : > { %v7710_v36 = vpop.f32.mrb[211].mxu0 }
 0x3fe   : > { %v7794_v26 = vpop.f32.mrb[196].mxu1  ;;  %v10838_v48 = vadd.f32 %v7710_v36, %v7709_v43 }
 0x3ff   : > { %v7795_v58 = vpop.f32.mrb[197].mxu1 }
 0x400   : > { %v7796_v24 = vadd.f32 %v7795_v58, %v7794_v26  ;;  %v7797_v35 = vpop.f32.mrb[198].mxu1 }
 0x401   : > { %v7798_v37 = vpop.f32.mrb[199].mxu1 }
 0x402   : > { %v10841_v53 = vadd.f32 %v7796_v24, %v10758_v60  ;;  %v7799_v61 = vadd.f32 %v7798_v37, %v7797_v35  ;;  %v7712_v13 = vpop.f32.mrb[212].mxu0 }
 0x403   : > { %8327 = vmatmul.mubr.bf16.gmra.mrb[176].mxu1 %v10600_v38  ;;  %v7713_v14 = vpop.f32.mrb[213].mxu0 }
 0x404   : > { %v10845_v51 = vadd.f32 %v7799_v61, %v10761_v17  ;;  %8330 = vmatprep.mubr.bf16.mxu1 %v10604_v22  ;;  %v10848_v49 = vadd.f32 %v7713_v14, %v7712_v13  ;;  %v7715_v30 = vpop.f32.mrb[214].mxu0 }
 0x405   : > { %v7716_v12 = vpop.f32.mrb[215].mxu0 }
 0x406   : > { %v7800_v60 = vpop.f32.mrb[200].mxu1  ;;  %v10850_v54 = vadd.f32 %v7716_v12, %v7715_v30 }
 0x407   : > { %v7801_v31 = vpop.f32.mrb[201].mxu1 }
 0x408   : > { %v7802_v38 = vadd.f32 %v7801_v31, %v7800_v60  ;;  %v7803_v29 = vpop.f32.mrb[202].mxu1 }
 0x409   : > { %v7804_v17 = vpop.f32.mrb[203].mxu1 }
 0x40a   : > { %v10853_v50 = vadd.f32 %v7802_v38, %v10769_v28  ;;  %v7805_v22 = vadd.f32 %v7804_v17, %v7803_v29  ;;  %v7718_v39 = vpop.f32.mrb[216].mxu0 }
 0x40b   : > { %8331 = vmatmul.mubr.bf16.gmra.mrb[180].mxu1 %v10616_v18  ;;  %v7719_v55 = vpop.f32.mrb[217].mxu0  ;;  %v4831_v18 = vsel %vm4525_vm3, %v4822_v34, %v4830_v3 }
 0x40c   : > { %v10857_v42 = vadd.f32 %v7805_v22, %v10772_v19  ;;  %8334 = vmatprep.mubr.bf16.mxu1 %v10792_v63  ;;  %v10860_v62 = vadd.f32 %v7719_v55, %v7718_v39  ;;  %v7721_v9 = vpop.f32.mrb[218].mxu0 }
 0x40d   : > { %v7722_v6 = vpop.f32.mrb[219].mxu0 }
 0x40e   : > { %v7806_v56 = vpop.f32.mrb[204].mxu1  ;;  %v10862_v43 = vadd.f32 %v7722_v6, %v7721_v9 }
 0x40f   : > { %v7807_v28 = vpop.f32.mrb[205].mxu1 }
 0x410   : > { %v7808_v36 = vadd.f32 %v7807_v28, %v7806_v56  ;;  %v7809_v26 = vpop.f32.mrb[206].mxu1 }
 0x411   : > { %v7810_v58 = vpop.f32.mrb[207].mxu1 }
 0x412   : > { %v10866_v19 = vadd.f32 %v7808_v36, %v10780_v41  ;;  %v7811_v24 = vadd.f32 %v7810_v58, %v7809_v26  ;;  %v7724_v63 = vpop.f32.mrb[220].mxu0 }
 0x413   : > { %8335 = vmatmul.mubr.bf16.gmra.mrb[184].mxu1 %v4831_v18  ;;  %v7725_v35 = vpop.f32.mrb[221].mxu0 }
 0x414   : > { %v10869_v23 = vadd.f32 %v7811_v24, %v10784_v7  ;;  %v10871_v37 = vadd.f32 %v7725_v35, %v7724_v63  ;;  %v7727_v33 = vpop.f32.mrb[222].mxu0 }
 0x415   : > { %v7728_v61 = vpop.f32.mrb[223].mxu0 }
 0x416   : > { %v7812_v13 = vpop.f32.mrb[208].mxu1  ;;  %v10873_v14 = vadd.f32 %v7728_v61, %v7727_v33 }
 0x417   : > { %v7813_v32 = vpop.f32.mrb[209].mxu1 }
 0x418   : > { %v7814_v57 = vadd.f32 %v7813_v32, %v7812_v13  ;;  %v7815_v30 = vpop.f32.mrb[210].mxu1 }
 0x419   : > { %v7816_v45 = vpop.f32.mrb[211].mxu1 }
 0x41a   : > { %v10876_v41 = vadd.f32 %v7814_v57, %v10789_v8  ;;  %v7817_v27 = vadd.f32 %v7816_v45, %v7815_v30  ;;  %v7730_v12 = vpop.f32.mrb[224].mxu0 }
 0x41b   : > { %v7731_v60 = vpop.f32.mrb[225].mxu0 }
 0x41c   : > { %v10879_v7 = vadd.f32 %v7817_v27, %v10795_v2  ;;  %v10881_v31 = vadd.f32 %v7731_v60, %v7730_v12  ;;  %v7733_v47 = vpop.f32.mrb[226].mxu0 }
 0x41d   : > { %v7734_v38 = vpop.f32.mrb[227].mxu0 }
 0x41e   : > { %v7818_v29 = vpop.f32.mrb[212].mxu1  ;;  %v10883_v0 = vadd.f32 %v7734_v38, %v7733_v47 }
 0x41f   : > { %v7819_v16 = vpop.f32.mrb[213].mxu1 }
 0x420   : > { %v7820_v5 = vadd.f32 %v7819_v16, %v7818_v29  ;;  %v7821_v17 = vpop.f32.mrb[214].mxu1 }
 0x421   : > { %v7822_v22 = vpop.f32.mrb[215].mxu1 }
 0x422   : > { %v10886_v8 = vadd.f32 %v7820_v5, %v10799_v59  ;;  %v7823_v39 = vadd.f32 %v7822_v22, %v7821_v17  ;;  %v7736_v55 = vpop.f32.mrb[228].mxu0 }
 0x423   : > { %v7737_v9 = vpop.f32.mrb[229].mxu0 }
 0x424   : > { %v10889_v2 = vadd.f32 %v7823_v39, %v10802_v15  ;;  %v10891_v34 = vadd.f32 %v7737_v9, %v7736_v55  ;;  %v7739_v3 = vpop.f32.mrb[230].mxu0 }
 0x425   : > { %v7740_v6 = vpop.f32.mrb[231].mxu0 }
 0x426   : > { %v7824_v56 = vpop.f32.mrb[216].mxu1  ;;  %v10893_v28 = vadd.f32 %v7740_v6, %v7739_v3 }
 0x427   : > { %v7825_v36 = vpop.f32.mrb[217].mxu1 }
 0x428   : > { %v7826_v26 = vadd.f32 %v7825_v36, %v7824_v56  ;;  %v7827_v18 = vpop.f32.mrb[218].mxu1 }
 0x429   : > { %v7828_v58 = vpop.f32.mrb[219].mxu1 }
 0x42a   : > { %v10896_v59 = vadd.f32 %v7826_v26, %v10806_v10  ;;  %v7829_v24 = vadd.f32 %v7828_v58, %v7827_v18  ;;  %v7918_v63 = vpop.f32.mrb[232].mxu0 }
 0x42b   : > { %v7919_v35 = vpop.f32.mrb[233].mxu0 }
 0x42c   : > { %v10899_v15 = vadd.f32 %v7829_v24, %v10808_v11  ;;  %v7920_v33 = vadd.f32 %v7919_v35, %v7918_v63  ;;  %v7921_v61 = vpop.f32.mrb[234].mxu0 }
 0x42d   : > { %v7922_v13 = vpop.f32.mrb[235].mxu0 }
 0x42e   : > { %v7830_v32 = vpop.f32.mrb[220].mxu1  ;;  %v7923_v57 = vadd.f32 %v7922_v13, %v7921_v61  ;;  %v10902_v30 = vadd.f32 %v10817_v40, %v7920_v33 }
 0x42f   : > { %v7831_v45 = vpop.f32.mrb[221].mxu1 }
 0x430   : > { %v7832_v27 = vadd.f32 %v7831_v45, %v7830_v32  ;;  %v7833_v12 = vpop.f32.mrb[222].mxu1  ;;  %v10905_v10 = vadd.f32 %v10821_v46, %v7923_v57 }
 0x431   : > { %v7834_v60 = vpop.f32.mrb[223].mxu1 }
 0x432   : > { %v10908_v47 = vadd.f32 %v7832_v27, %v10812_v25  ;;  %v7835_v11 = vadd.f32 %v7834_v60, %v7833_v12  ;;  %v7924_v38 = vpop.f32.mrb[236].mxu0 }
 0x433   : > { %v7925_v29 = vpop.f32.mrb[237].mxu0 }
 0x434   : > { %v10911_v16 = vadd.f32 %v7835_v11, %v10814_v4  ;;  %v7926_v5 = vadd.f32 %v7925_v29, %v7924_v38  ;;  %v7927_v17 = vpop.f32.mrb[238].mxu0 }
 0x435   : > { %v7928_v40 = vpop.f32.mrb[239].mxu0 }
 0x436   : > { %v7836_v22 = vpop.f32.mrb[224].mxu1  ;;  %v7929_v39 = vadd.f32 %v7928_v40, %v7927_v17  ;;  %v10914_v55 = vadd.f32 %v10829_v20, %v7926_v5 }
 0x437   : > { %v7837_v46 = vpop.f32.mrb[225].mxu1 }
 0x438   : > { %v7838_v9 = vadd.f32 %v7837_v46, %v7836_v22  ;;  %v7839_v3 = vpop.f32.mrb[226].mxu1  ;;  %v10917_v25 = vadd.f32 %v10833_v44, %v7929_v39 }
 0x439   : > { %v7840_v6 = vpop.f32.mrb[227].mxu1 }
 0x43a   : > { %v10920_v56 = vadd.f32 %v7838_v9, %v10824_v21  ;;  %v7841_v4 = vadd.f32 %v7840_v6, %v7839_v3  ;;  %v7930_v36 = vpop.f32.mrb[240].mxu0 }
 0x43b   : > { %v7931_v26 = vpop.f32.mrb[241].mxu0 }
 0x43c   : > { %v10923_v18 = vadd.f32 %v7841_v4, %v10826_v1  ;;  %v7932_v58 = vadd.f32 %v7931_v26, %v7930_v36  ;;  %v7933_v24 = vpop.f32.mrb[242].mxu0 }
 0x43d   : > { %v7934_v20 = vpop.f32.mrb[243].mxu0 }
 0x43e   : > { %v7842_v63 = vpop.f32.mrb[228].mxu1  ;;  %v7935_v35 = vadd.f32 %v7934_v20, %v7933_v24  ;;  %v10926_v33 = vadd.f32 %v10841_v53, %v7932_v58 }
 0x43f   : > { %v7843_v44 = vpop.f32.mrb[229].mxu1 }
 0x440   : > { %v7844_v61 = vadd.f32 %v7843_v44, %v7842_v63  ;;  %v7845_v13 = vpop.f32.mrb[230].mxu1  ;;  %v10929_v21 = vadd.f32 %v10845_v51, %v7935_v35 }
 0x441   : > { %v7846_v32 = vpop.f32.mrb[231].mxu1 }
 0x442   : > { %v10932_v57 = vadd.f32 %v7844_v61, %v10836_v52  ;;  %v7847_v1 = vadd.f32 %v7846_v32, %v7845_v13  ;;  %v7936_v45 = vpop.f32.mrb[244].mxu0 }
 0x443   : > { %v7937_v27 = vpop.f32.mrb[245].mxu0 }
 0x444   : > { %v10935_v12 = vadd.f32 %v7847_v1, %v10838_v48  ;;  %v7938_v60 = vadd.f32 %v7937_v27, %v7936_v45  ;;  %v7939_v11 = vpop.f32.mrb[246].mxu0 }
 0x445   : > { %v7940_v53 = vpop.f32.mrb[247].mxu0 }
 0x446   : > { %v7848_v38 = vpop.f32.mrb[232].mxu1  ;;  %v7941_v29 = vadd.f32 %v7940_v53, %v7939_v11  ;;  %v10938_v5 = vadd.f32 %v10853_v50, %v7938_v60 }
 0x447   : > { %v7849_v51 = vpop.f32.mrb[233].mxu1 }
 0x448   : > { %v7850_v17 = vadd.f32 %v7849_v51, %v7848_v38  ;;  %v7851_v40 = vpop.f32.mrb[234].mxu1  ;;  %v10941_v52 = vadd.f32 %v10857_v42, %v7941_v29 }
 0x449   : > { %v7852_v22 = vpop.f32.mrb[235].mxu1 }
 0x44a   : > { %v10944_v39 = vadd.f32 %v7850_v17, %v10848_v49  ;;  %v7853_v48 = vadd.f32 %v7852_v22, %v7851_v40  ;;  %v7942_v46 = vpop.f32.mrb[248].mxu0 }
 0x44b   : > { %v7943_v9 = vpop.f32.mrb[249].mxu0 }
 0x44c   : > { %v10947_v3 = vadd.f32 %v7853_v48, %v10850_v54  ;;  %v7944_v6 = vadd.f32 %v7943_v9, %v7942_v46  ;;  %v7945_v4 = vpop.f32.mrb[250].mxu0 }
 0x44d   : > { %v7946_v50 = vpop.f32.mrb[251].mxu0 }
 0x44e   : > { %v7854_v36 = vpop.f32.mrb[236].mxu1  ;;  %v7947_v26 = vadd.f32 %v7946_v50, %v7945_v4  ;;  %v10950_v58 = vadd.f32 %v10866_v19, %v7944_v6 }
 0x44f   : > { %v7855_v42 = vpop.f32.mrb[237].mxu1 }
 0x450   : > { %v7856_v24 = vadd.f32 %v7855_v42, %v7854_v36  ;;  %v7857_v20 = vpop.f32.mrb[238].mxu1  ;;  %v10953_v49 = vadd.f32 %v10869_v23, %v7947_v26 }
 0x451   : > { %v7858_v63 = vpop.f32.mrb[239].mxu1 }
 0x452   : > { %v10956_v35 = vadd.f32 %v7856_v24, %v10860_v62  ;;  %v7859_v54 = vadd.f32 %v7858_v63, %v7857_v20  ;;  %v7948_v44 = vpop.f32.mrb[252].mxu0 }
 0x453   : > { %v7949_v61 = vpop.f32.mrb[253].mxu0 }
 0x454   : > { %v10959_v13 = vadd.f32 %v7859_v54, %v10862_v43  ;;  %v7950_v32 = vadd.f32 %v7949_v61, %v7948_v44  ;;  %v7951_v1 = vpop.f32.mrb[254].mxu0 }
 0x455   : > { %v7952_v19 = vpop.f32.mrb[255].mxu0 }
 0x456   : > { %v7860_v45 = vpop.f32.mrb[240].mxu1  ;;  %v7953_v27 = vadd.f32 %v7952_v19, %v7951_v1  ;;  %v10962_v60 = vadd.f32 %v10876_v41, %v7950_v32 }
 0x457   : > { %v7861_v23 = vpop.f32.mrb[241].mxu1 }
 0x458   : > { %v7862_v11 = vadd.f32 %v7861_v23, %v7860_v45  ;;  %v7863_v53 = vpop.f32.mrb[242].mxu1  ;;  %v10965_v62 = vadd.f32 %v10879_v7, %v7953_v27 }
 0x459   : > { %v7864_v38 = vpop.f32.mrb[243].mxu1 }
 0x45a   : > { %v10968_v29 = vadd.f32 %v7862_v11, %v10871_v37  ;;  %v7865_v43 = vadd.f32 %v7864_v38, %v7863_v53  ;;  %v7954_v51 = vpop.f32.mrb[0].mxu0 }
 0x45b   : > { %v7955_v17 = vpop.f32.mrb[1].mxu0 }
 0x45c   : > { %v10971_v40 = vadd.f32 %v7865_v43, %v10873_v14  ;;  %v7956_v22 = vadd.f32 %v7955_v17, %v7954_v51  ;;  %v7957_v48 = vpop.f32.mrb[2].mxu0 }
 0x45d   : > { %v7958_v41 = vpop.f32.mrb[3].mxu0 }
 0x45e   : > { %v7866_v46 = vpop.f32.mrb[244].mxu1  ;;  %v7959_v9 = vadd.f32 %v7958_v41, %v7957_v48  ;;  %v10974_v6 = vadd.f32 %v10886_v8, %v7956_v22 }
 0x45f   : > { %v7867_v7 = vpop.f32.mrb[245].mxu1 }
 0x460   : > { %v7868_v4 = vadd.f32 %v7867_v7, %v7866_v46  ;;  %v7869_v50 = vpop.f32.mrb[246].mxu1  ;;  %v10977_v37 = vadd.f32 %v10889_v2, %v7959_v9 }
 0x461   : > { %v7870_v36 = vpop.f32.mrb[247].mxu1 }
 0x462   : > { %v10980_v26 = vadd.f32 %v7868_v4, %v10881_v31  ;;  %v7871_v14 = vadd.f32 %v7870_v36, %v7869_v50  ;;  %v7960_v42 = vpop.f32.mrb[4].mxu0 }
 0x463   : > { %v7961_v24 = vpop.f32.mrb[5].mxu0 }
 0x464   : > { %v10983_v20 = vadd.f32 %v7871_v14, %v10883_v0  ;;  %v7962_v63 = vadd.f32 %v7961_v24, %v7960_v42  ;;  %v7963_v54 = vpop.f32.mrb[6].mxu0 }
 0x465   : > { %v7964_v8 = vpop.f32.mrb[7].mxu0 }
 0x466   : > { %v7872_v44 = vpop.f32.mrb[248].mxu1  ;;  %v7965_v61 = vadd.f32 %v7964_v8, %v7963_v54  ;;  %v10986_v32 = vadd.f32 %v10896_v59, %v7962_v63 }
 0x467   : > { %v7873_v2 = vpop.f32.mrb[249].mxu1 }
 0x468   : > { %v7874_v1 = vadd.f32 %v7873_v2, %v7872_v44  ;;  %v7875_v19 = vpop.f32.mrb[250].mxu1  ;;  %v10989_v31 = vadd.f32 %v10899_v15, %v7965_v61 }
 0x469   : > { %v7876_v45 = vpop.f32.mrb[251].mxu1 }
 0x46a   : > { %v10992_v27 = vadd.f32 %v7874_v1, %v10891_v34  ;;  %v7877_v0 = vadd.f32 %v7876_v45, %v7875_v19  ;;  %v7966_v23 = vpop.f32.mrb[8].mxu0 }
 0x46b   : > { %v7967_v11 = vpop.f32.mrb[9].mxu0 }
 0x46c   : > { %v8460_v53 = vadd.f32 %v7877_v0, %v10893_v28  ;;  %v7968_v38 = vadd.f32 %v7967_v11, %v7966_v23  ;;  %v7969_v43 = vpop.f32.mrb[10].mxu0 }
 0x46d   : > { %v7970_v51 = vpop.f32.mrb[11].mxu0 }
 0x46e   : > { %v7971_v59 = vadd.f32 %v7970_v51, %v7969_v43  ;;  %v10996_v17 = vadd.f32 %v10908_v47, %v7968_v38 }
 0x470   : > { %v10999_v22 = vadd.f32 %v10911_v16, %v7971_v59 }
 0x472   : > { %v7972_v15 = vpop.f32.mrb[12].mxu0 }
 0x473   : > { %v7973_v48 = vpop.f32.mrb[13].mxu0 }
 0x474   : > { %v7974_v41 = vadd.f32 %v7973_v48, %v7972_v15  ;;  %v7975_v34 = vpop.f32.mrb[14].mxu0 }
 0x475   : > { %v7976_v46 = vpop.f32.mrb[15].mxu0 }
 0x476   : > { %v7977_v9 = vadd.f32 %v7976_v46, %v7975_v34  ;;  %v11002_v7 = vadd.f32 %v10920_v56, %v7974_v41 }
 0x478   : > { %v11005_v28 = vadd.f32 %v10923_v18, %v7977_v9 }
 0x47a   : > { %v7978_v4 = vpop.f32.mrb[16].mxu0 }
 0x47b   : > { %v7979_v50 = vpop.f32.mrb[17].mxu0 }
 0x47c   : > { %v7980_v36 = vadd.f32 %v7979_v50, %v7978_v4  ;;  %v7981_v47 = vpop.f32.mrb[18].mxu0 }
 0x47d   : > { %v7982_v14 = vpop.f32.mrb[19].mxu0 }
 0x47e   : > { %v7983_v42 = vadd.f32 %v7982_v14, %v7981_v47  ;;  %v11008_v16 = vadd.f32 %v10932_v57, %v7980_v36 }
 0x480   : > { %v11011_v24 = vadd.f32 %v10935_v12, %v7983_v42 }
 0x482   : > { %v7984_v63 = vpop.f32.mrb[20].mxu0 }
 0x483   : > { %v7985_v54 = vpop.f32.mrb[21].mxu0 }
 0x484   : > { %v7986_v8 = vadd.f32 %v7985_v54, %v7984_v63  ;;  %v7987_v56 = vpop.f32.mrb[22].mxu0 }
 0x485   : > { %v7988_v44 = vpop.f32.mrb[23].mxu0 }
 0x486   : > { %v7989_v61 = vadd.f32 %v7988_v44, %v7987_v56  ;;  %v11014_v18 = vadd.f32 %v10944_v39, %v7986_v8  ;;  %v7488_v8 = vld [vmem:[%s9291_s11 + $0x34] sm:$0xff]   ;;  %v7486_v56 = vld [vmem:[%s9291_s11 + $0x24] sm:$0xff]  }
 0x488   : > { %v11017_v2 = vadd.f32 %v10947_v3, %v7989_v61  ;;  %v6806_v61 = vunpack.c.l.bf16 %v7488_v8 }
 0x48a   : > { %v7990_v1 = vpop.f32.mrb[24].mxu0 }
 0x48b   : > { %v7991_v19 = vpop.f32.mrb[25].mxu0 }
 0x48c   : > { %v7992_v45 = vadd.f32 %v7991_v19, %v7990_v1  ;;  %v7993_v57 = vpop.f32.mrb[26].mxu0 }
 0x48d   : > { %v7994_v0 = vpop.f32.mrb[27].mxu0 }
 0x48e   : > { %v7995_v23 = vadd.f32 %v7994_v0, %v7993_v57  ;;  %v11020_v12 = vadd.f32 %v10956_v35, %v7992_v45  ;;  %v6804_v45 = vunpack.c.l.bf16 %v7486_v56  ;;  %v6807_v0 = vunpack.c.h.bf16 %v7488_v8 }
 0x490   : > { %v11023_v11 = vadd.f32 %v10959_v13, %v7995_v23 }
 0x492   : > { %v7996_v38 = vpop.f32.mrb[28].mxu0 }
 0x493   : > { %v7997_v43 = vpop.f32.mrb[29].mxu0 }
 0x494   : > { %v7998_v51 = vadd.f32 %v7997_v43, %v7996_v38  ;;  %v7999_v39 = vpop.f32.mrb[30].mxu0 }
 0x495   : > { %v8000_v59 = vpop.f32.mrb[31].mxu0 }
 0x496   : > { %v8001_v15 = vadd.f32 %v8000_v59, %v7999_v39  ;;  %v11026_v3 = vadd.f32 %v10968_v29, %v7998_v51 }
 0x498   : > { %v11029_v48 = vadd.f32 %v10971_v40, %v8001_v15  ;;  %v7492_v15 = vld [vmem:[%s9291_s11 + $0x54] sm:$0xff]  }
 0x49a   : > { %v8002_v41 = vpop.f32.mrb[32].mxu0 }
 0x49b   : > { %v8003_v34 = vpop.f32.mrb[33].mxu0 }
 0x49c   : > { %v8004_v35 = vadd.f32 %v8003_v34, %v8002_v41  ;;  %v8005_v46 = vpop.f32.mrb[34].mxu0 }
 0x49d   : > { %v8006_v13 = vpop.f32.mrb[35].mxu0 }
 0x49e   : > { %v8007_v9 = vadd.f32 %v8006_v13, %v8005_v46  ;;  %v11032_v4 = vadd.f32 %v10980_v26, %v8004_v35  ;;  %v11047_v26 = vld [vmem:[%s11222_s4] ss:$0 sm:$0xff]  ;;  %v7490_v35 = vld [vmem:[%s9291_s11 + $0x44] sm:$0xff]  }
 0x4a0   : > { %v11035_v50 = vadd.f32 %v10983_v20, %v8007_v9 }
 0x4a2   : > { %v8008_v36 = vpop.f32.mrb[36].mxu0 }
 0x4a3   : > { %v8009_v29 = vpop.f32.mrb[37].mxu0 }
 0x4a4   : > { %v8010_v47 = vadd.f32 %v8009_v29, %v8008_v36  ;;  %v8011_v40 = vpop.f32.mrb[38].mxu0  ;;  %v6839_v36 = vunpack.c.l.bf16 %v7492_v15 }
 0x4a5   : > { %v8012_v14 = vpop.f32.mrb[39].mxu0 }
 0x4a6   : > { %v8013_v42 = vadd.f32 %v8012_v14, %v8011_v40  ;;  %v11038_v63 = vadd.f32 %v10992_v27, %v8010_v47  ;;  %v6837_v14 = vunpack.c.l.bf16 %v7490_v35 }
 0x4a8   : > { %v11040_v54 = vadd.f32 %v8460_v53, %v8013_v42 }
 0x4ae   : > { %v8308_v44 = vpop.f32.mrb[156].mxu1 }
 0x4af   : > { %v8372_v20 = vadd.f32 %v10914_v55, %v8308_v44  ;;  %v6589_v1 = vpop.f32.mrb[157].mxu1  ;;  %v6805_v55 = vunpack.c.h.bf16 %v7486_v56  ;;  %v6840_v44 = vunpack.c.h.bf16 %v7492_v15 }
 0x4b0   : > { %v8375_v19 = vadd.f32 %v10902_v30, %v6589_v1  ;;  %v8309_v27 = vpop.f32.mrb[158].mxu1  ;;  %v6838_v1 = vunpack.c.h.bf16 %v7490_v35 }
 0x4b1   : > { %v6793_v53 = vadd.f32 %v8372_v20, %v11047_v26  ;;  %v8378_v57 = vadd.f32 %v10917_v25, %v8309_v27  ;;  %v6592_v23 = vpop.f32.mrb[159].mxu1 }
 0x4b2   : > { %v6791_v38 = vadd.f32 %v8375_v19, %v11047_v26  ;;  %v8381_v43 = vadd.f32 %v10905_v10, %v6592_v23 }
 0x4b3   : > { %v6810_v51 = vadd.f32 %v6806_v61, %v6793_v53  ;;  %v6794_v39 = vadd.f32 %v8378_v57, %v11047_v26  ;;  %v7500_v53 = vld [vmem:[%s9291_s11 + $0x74] sm:$0xff]  }
 0x4b4   : > { %v6808_v59 = vadd.f32 %v6804_v45, %v6791_v38  ;;  %v6792_v30 = vadd.f32 %v8381_v43, %v11047_v26 }
 0x4b5   : > { %v6814_v41 = vmax.f32 %v6810_v51, 0.0  ;;  %v6811_v34 = vadd.f32 %v6807_v0, %v6794_v39  ;;  %v7498_v0 = vld [vmem:[%s9291_s11 + $0x64] sm:$0xff]   ;;  %v6872_v51 = vunpack.c.l.bf16 %v7500_v53 }
 0x4b6   : > { %v6812_v46 = vmax.f32 %v6808_v59, 0.0  ;;  %v6809_v13 = vadd.f32 %v6805_v55, %v6792_v30  ;;  %v8312_v25 = vpop.f32.mrb[160].mxu1  ;;  %v6870_v15 = vunpack.c.l.bf16 %v7498_v0 }
 0x4b7   : > { %6819 = vst [vmem:[%s11060_s12 + $0x10] sm:$0xff] %v6814_v41  ;;  %v6815_v10 = vmax.f32 %v6811_v34, 0.0  ;;  %v8384_v9 = vadd.f32 %v10938_v5, %v8312_v25  ;;  %v6605_v29 = vpop.f32.mrb[161].mxu1 }
 0x4b8   : > { %6817 = vst [vmem:[%s11060_s12] sm:$0xff] %v6812_v46  ;;  %v6813_v47 = vmax.f32 %v6809_v13, 0.0  ;;  %v8387_v40 = vadd.f32 %v10926_v33, %v6605_v29  ;;  %v8313_v42 = vpop.f32.mrb[162].mxu1  ;;  %v6873_v46 = vunpack.c.h.bf16 %v7500_v53 }
 0x4b9   : > { %6820 = vst [vmem:[%s11060_s12 + $0x18] sm:$0xff] %v6815_v10  ;;  %v6827_v8 = vadd.f32 %v8384_v9, %v11047_v26  ;;  %v8390_v56 = vadd.f32 %v10941_v52, %v8313_v42  ;;  %v6608_v20 = vpop.f32.mrb[163].mxu1  ;;  %v6871_v10 = vunpack.c.h.bf16 %v7498_v0 }
 0x4ba   : > { %6818 = vst [vmem:[%s11060_s12 + $0x8] sm:$0xff] %v6813_v47  ;;  %v6825_v5 = vadd.f32 %v8387_v40, %v11047_v26  ;;  %v8393_v61 = vadd.f32 %v10929_v21, %v6608_v20  ;;  %v7508_v47 = vld [vmem:[%s9291_s11 + $0x94] sm:$0xff]  }
 0x4bb   : > { %v6843_v19 = vadd.f32 %v6839_v36, %v6827_v8  ;;  %v6828_v33 = vadd.f32 %v8390_v56, %v11047_v26  ;;  %v6905_v20 = vunpack.c.l.bf16 %v7508_v47  ;;  %v6906_v53 = vunpack.c.h.bf16 %v7508_v47 }
 0x4bc   : > { %v6841_v45 = vadd.f32 %v6837_v14, %v6825_v5  ;;  %v6826_v27 = vadd.f32 %v8393_v61, %v11047_v26  ;;  %v7506_v14 = vld [vmem:[%s9291_s11 + $0x84] sm:$0xff]  }
 0x4bd   : > { %v6847_v57 = vmax.f32 %v6843_v19, 0.0  ;;  %v6844_v52 = vadd.f32 %v6840_v44, %v6828_v33  ;;  %v6903_v19 = vunpack.c.l.bf16 %v7506_v14  ;;  %v6904_v0 = vunpack.c.h.bf16 %v7506_v14  ;;  %v7524_v14 = vld [vmem:[%s9291_s11 + $0xd4] sm:$0xff]  }
 0x4be   : > { %v6845_v23 = vmax.f32 %v6841_v45, 0.0  ;;  %v6842_v38 = vadd.f32 %v6838_v1, %v6826_v27  ;;  %v8316_v43 = vpop.f32.mrb[164].mxu1 }
 0x4bf   : > { %7496 = vst [vmem:[%s11060_s12 + $0x30] sm:$0xff] %v6847_v57  ;;  %v6848_v55 = vmax.f32 %v6844_v52, 0.0  ;;  %v8396_v21 = vadd.f32 %v10962_v60, %v8316_v43  ;;  %v6621_v39 = vpop.f32.mrb[165].mxu1 }
 0x4c0   : > { %7494 = vst [vmem:[%s11060_s12 + $0x20] sm:$0xff] %v6845_v23  ;;  %v6846_v59 = vmax.f32 %v6842_v38, 0.0  ;;  %v8399_v30 = vadd.f32 %v10950_v58, %v6621_v39  ;;  %v8317_v41 = vpop.f32.mrb[166].mxu1 }
 0x4c1   : > { %7497 = vst [vmem:[%s11060_s12 + $0x38] sm:$0xff] %v6848_v55  ;;  %v6860_v34 = vadd.f32 %v8396_v21, %v11047_v26  ;;  %v8402_v35 = vadd.f32 %v10965_v62, %v8317_v41  ;;  %v6624_v13 = vpop.f32.mrb[167].mxu1  ;;  %v7516_v55 = vld [vmem:[%s9291_s11 + $0xb4] sm:$0xff]  }
 0x4c2   : > { %7495 = vst [vmem:[%s11060_s12 + $0x28] sm:$0xff] %v6846_v59  ;;  %v6858_v60 = vadd.f32 %v8399_v30, %v11047_v26  ;;  %v8405_v25 = vadd.f32 %v10953_v49, %v6624_v13  ;;  %v6938_v41 = vunpack.c.l.bf16 %v7516_v55 }
 0x4c3   : > { %v6876_v9 = vadd.f32 %v6872_v51, %v6860_v34  ;;  %v6861_v58 = vadd.f32 %v8402_v35, %v11047_v26  ;;  %v7514_v51 = vld [vmem:[%s9291_s11 + $0xa4] sm:$0xff]  }
 0x4c4   : > { %v6874_v36 = vadd.f32 %v6870_v15, %v6858_v60  ;;  %v6859_v29 = vadd.f32 %v8405_v25, %v11047_v26  ;;  %v6936_v13 = vunpack.c.l.bf16 %v7514_v51 }
 0x4c5   : > { %v6880_v40 = vmax.f32 %v6876_v9, 0.0  ;;  %v6877_v62 = vadd.f32 %v6873_v46, %v6861_v58  ;;  %v6939_v9 = vunpack.c.h.bf16 %v7516_v55 }
 0x4c6   : > { %v6878_v42 = vmax.f32 %v6874_v36, 0.0  ;;  %v6875_v8 = vadd.f32 %v6871_v10, %v6859_v29  ;;  %v8320_v56 = vpop.f32.mrb[168].mxu1  ;;  %v6937_v29 = vunpack.c.h.bf16 %v7514_v51 }
 0x4c7   : > { %7504 = vst [vmem:[%s11060_s12 + $0x50] sm:$0xff] %v6880_v40  ;;  %v6881_v44 = vmax.f32 %v6877_v62, 0.0  ;;  %v8408_v49 = vadd.f32 %v10986_v32, %v8320_v56  ;;  %v6637_v5 = vpop.f32.mrb[169].mxu1 }
 0x4c8   : > { %7502 = vst [vmem:[%s11060_s12 + $0x40] sm:$0xff] %v6878_v42  ;;  %v6879_v61 = vmax.f32 %v6875_v8, 0.0  ;;  %v8411_v1 = vadd.f32 %v10974_v6, %v6637_v5  ;;  %v8321_v33 = vpop.f32.mrb[170].mxu1  ;;  %v7522_v8 = vld [vmem:[%s9291_s11 + $0xc4] sm:$0xff]   ;;  %v6971_v5 = vunpack.c.l.bf16 %v7524_v14 }
 0x4c9   : > { %7505 = vst [vmem:[%s11060_s12 + $0x58] sm:$0xff] %v6881_v44  ;;  %v6893_v45 = vadd.f32 %v8408_v49, %v11047_v26  ;;  %v8414_v27 = vadd.f32 %v10989_v31, %v8321_v33  ;;  %v6640_v57 = vpop.f32.mrb[171].mxu1  ;;  %v6969_v33 = vunpack.c.l.bf16 %v7522_v8 }
 0x4ca   : > { %7503 = vst [vmem:[%s11060_s12 + $0x48] sm:$0xff] %v6879_v61  ;;  %v6891_v32 = vadd.f32 %v8411_v1, %v11047_v26  ;;  %v8417_v52 = vadd.f32 %v10977_v37, %v6640_v57  ;;  %v6972_v57 = vunpack.c.h.bf16 %v7524_v14 }
 0x4cb   : > { %v6909_v23 = vadd.f32 %v6905_v20, %v6893_v45  ;;  %v6894_v6 = vadd.f32 %v8414_v27, %v11047_v26 }
 0x4cc   : > { %v6907_v38 = vadd.f32 %v6903_v19, %v6891_v32  ;;  %v6892_v43 = vadd.f32 %v8417_v52, %v11047_v26 }
 0x4cd   : > { %v6913_v21 = vmax.f32 %v6909_v23, 0.0  ;;  %v6910_v31 = vadd.f32 %v6906_v53, %v6894_v6 }
 0x4ce   : > { %v6911_v39 = vmax.f32 %v6907_v38, 0.0  ;;  %v6908_v59 = vadd.f32 %v6904_v0, %v6892_v43  ;;  %v8324_v30 = vpop.f32.mrb[172].mxu1  ;;  %v6970_v0 = vunpack.c.h.bf16 %v7522_v8  ;;  %v7532_v43 = vld [vmem:[%s9291_s11 + $0xf4] sm:$0xff]  }
 0x4cf   : > { %7512 = vst [vmem:[%s11060_s12 + $0x70] sm:$0xff] %v6913_v21  ;;  %v6914_v15 = vmax.f32 %v6910_v31, 0.0  ;;  %v8420_v37 = vadd.f32 %v11002_v7, %v8324_v30  ;;  %v6653_v34 = vpop.f32.mrb[173].mxu1  ;;  %v7530_v21 = vld [vmem:[%s9291_s11 + $0xe4] sm:$0xff]   ;;  %v7004_v30 = vunpack.c.l.bf16 %v7532_v43 }
 0x4d0   : > { %7510 = vst [vmem:[%s11060_s12 + $0x60] sm:$0xff] %v6911_v39  ;;  %v6912_v35 = vmax.f32 %v6908_v59, 0.0  ;;  %v8423_v46 = vadd.f32 %v10996_v17, %v6653_v34  ;;  %v8325_v60 = vpop.f32.mrb[174].mxu1  ;;  %v7002_v34 = vunpack.c.l.bf16 %v7530_v21 }
 0x4d1   : > { %7513 = vst [vmem:[%s11060_s12 + $0x78] sm:$0xff] %v6914_v15  ;;  %v6926_v25 = vadd.f32 %v8420_v37, %v11047_v26  ;;  %v8426_v10 = vadd.f32 %v11005_v28, %v8325_v60  ;;  %v6656_v58 = vpop.f32.mrb[175].mxu1  ;;  %v7005_v60 = vunpack.c.h.bf16 %v7532_v43 }
 0x4d2   : > { %7511 = vst [vmem:[%s11060_s12 + $0x68] sm:$0xff] %v6912_v35  ;;  %v6924_v7 = vadd.f32 %v8423_v46, %v11047_v26  ;;  %v8429_v36 = vadd.f32 %v10999_v22, %v6656_v58 }
 0x4d3   : > { %v6942_v47 = vadd.f32 %v6938_v41, %v6926_v25  ;;  %v6927_v17 = vadd.f32 %v8426_v10, %v11047_v26 }
 0x4d4   : > { %v6940_v40 = vadd.f32 %v6936_v13, %v6924_v7  ;;  %v6925_v62 = vadd.f32 %v8429_v36, %v11047_v26 }
 0x4d5   : > { %v6946_v42 = vmax.f32 %v6942_v47, 0.0  ;;  %v6943_v28 = vadd.f32 %v6939_v9, %v6927_v17  ;;  %v7003_v9 = vunpack.c.h.bf16 %v7530_v21  ;;  %v7538_v17 = vld [vmem:[%s9291_s11 + $0x104] sm:$0xff]  }
 0x4d6   : > { %v6944_v56 = vmax.f32 %v6940_v40, 0.0  ;;  %v6941_v44 = vadd.f32 %v6937_v29, %v6925_v62  ;;  %v8328_v49 = vpop.f32.mrb[176].mxu1  ;;  %v7540_v29 = vld [vmem:[%s9291_s11 + $0x114] sm:$0xff]   ;;  %s8965_s11 = scalar_lea.vmem %s11166_s6, 4096 }
 0x4d7   : > { %7520 = vst [vmem:[%s11060_s12 + $0x90] sm:$0xff] %v6946_v42  ;;  %v6947_v20 = vmax.f32 %v6943_v28, 0.0  ;;  %v8432_v22 = vadd.f32 %v11014_v18, %v8328_v49  ;;  %v6669_v61 = vpop.f32.mrb[177].mxu1  ;;  %v7037_v28 = vunpack.c.l.bf16 %v7540_v29  ;;  %v7035_v49 = vunpack.c.l.bf16 %v7538_v17  ;;  %p8966_p8 = scmp.ne.s32.totalorder %s11166_s6, %s8965_s11  ;;  %p8973_p5 = scmp.lt.s32.totalorder %s8971_s30, %s8965_s11 }
 0x4d8   : > { %7518 = vst [vmem:[%s11060_s12 + $0x80] sm:$0xff] %v6944_v56  ;;  %v6945_v1 = vmax.f32 %v6941_v44, 0.0  ;;  %v8435_v19 = vadd.f32 %v11008_v16, %v6669_v61  ;;  %v8329_v45 = vpop.f32.mrb[178].mxu1  ;;  %v7038_v61 = vunpack.c.h.bf16 %v7540_v29 }
 0x4d9   : > { %7521 = vst [vmem:[%s11060_s12 + $0x98] sm:$0xff] %v6947_v20  ;;  %v6959_v27 = vadd.f32 %v8432_v22, %v11047_v26  ;;  %v8438_v53 = vadd.f32 %v11017_v2, %v8329_v45  ;;  %v6672_v32 = vpop.f32.mrb[179].mxu1  ;;  %p8967_p1 = pnand %p8966_p8, %p11319_p12  ;;  %p8974_p9 = por %p8973_p5, %p8972_p3 }
 0x4da   : > { %7519 = vst [vmem:[%s11060_s12 + $0x88] sm:$0xff] %v6945_v1  ;;  %v6957_v18 = vadd.f32 %v8435_v19, %v11047_v26  ;;  %v8441_v52 = vadd.f32 %v11011_v24, %v6672_v32 }
 0x4db   : > { %v6975_v23 = vadd.f32 %v6971_v5, %v6959_v27  ;;  %v6960_v16 = vadd.f32 %v8438_v53, %v11047_v26  ;;  %p8968_p10 = pneg %p8967_p1 }
 0x4dc   : > { %v6973_v6 = vadd.f32 %v6969_v33, %v6957_v18  ;;  %v6958_v38 = vadd.f32 %v8441_v52, %v11047_v26  ;;  %v7036_v33 = vunpack.c.h.bf16 %v7538_v17 }
 0x4dd   : > { %v6979_v55 = vmax.f32 %v6975_v23, 0.0  ;;  %v6976_v2 = vadd.f32 %v6972_v57, %v6960_v16  ;;  %p8975_p2 = pnand %p8974_p9, %p8968_p10 }
 0x4de   : > { %v6977_v31 = vmax.f32 %v6973_v6, 0.0  ;;  %v6974_v51 = vadd.f32 %v6970_v0, %v6958_v38  ;;  %v8332_v39 = vpop.f32.mrb[180].mxu1 }
 0x4df   : > { %7528 = vst [vmem:[%s11060_s12 + $0xb0] sm:$0xff] %v6979_v55  ;;  %v6980_v59 = vmax.f32 %v6976_v2, 0.0  ;;  %v8444_v24 = vadd.f32 %v11026_v3, %v8332_v39  ;;  %v6685_v15 = vpop.f32.mrb[181].mxu1 }
 0x4e0   : > { %7526 = vst [vmem:[%s11060_s12 + $0xa0] sm:$0xff] %v6977_v31  ;;  %v6978_v37 = vmax.f32 %v6974_v51, 0.0  ;;  %v8447_v41 = vadd.f32 %v11020_v12, %v6685_v15  ;;  %v8333_v35 = vpop.f32.mrb[182].mxu1 }
 0x4e1   : > { %7529 = vst [vmem:[%s11060_s12 + $0xb8] sm:$0xff] %v6980_v59  ;;  %v6992_v46 = vadd.f32 %v8444_v24, %v11047_v26  ;;  %v8450_v13 = vadd.f32 %v11029_v48, %v8333_v35  ;;  %v6688_v25 = vpop.f32.mrb[183].mxu1 }
 0x4e2   : > { %7527 = vst [vmem:[%s11060_s12 + $0xa8] sm:$0xff] %v6978_v37  ;;  %v6990_v3 = vadd.f32 %v8447_v41, %v11047_v26  ;;  %v8453_v10 = vadd.f32 %v11023_v11, %v6688_v25 }
 0x4e3   : > { %v7008_v58 = vadd.f32 %v7004_v30, %v6992_v46  ;;  %v6993_v12 = vadd.f32 %v8450_v13, %v11047_v26 }
 0x4e4   : > { %v7006_v7 = vadd.f32 %v7002_v34, %v6990_v3  ;;  %v6991_v36 = vadd.f32 %v8453_v10, %v11047_v26 }
 0x4e5   : > { %v7012_v47 = vmax.f32 %v7008_v58, 0.0  ;;  %v7009_v48 = vadd.f32 %v7005_v60, %v6993_v12 }
 0x4e6   : > { %v7010_v40 = vmax.f32 %v7006_v7, 0.0  ;;  %v7007_v62 = vadd.f32 %v7003_v9, %v6991_v36  ;;  %v8336_v14 = vpop.f32.mrb[184].mxu1 }
 0x4e7   : > { %7536 = vst [vmem:[%s11060_s12 + $0xd0] sm:$0xff] %v7012_v47  ;;  %v7013_v42 = vmax.f32 %v7009_v48, 0.0  ;;  %v8456_v11 = vadd.f32 %v11038_v63, %v8336_v14  ;;  %v6701_v8 = vpop.f32.mrb[185].mxu1 }
 0x4e8   : > { %7534 = vst [vmem:[%s11060_s12 + $0xc0] sm:$0xff] %v7010_v40  ;;  %v7011_v56 = vmax.f32 %v7007_v62, 0.0  ;;  %v8459_v44 = vadd.f32 %v11032_v4, %v6701_v8  ;;  %v8337_v20 = vpop.f32.mrb[186].mxu1 }
 0x4e9   : > { %7537 = vst [vmem:[%s11060_s12 + $0xd8] sm:$0xff] %v7013_v42  ;;  %v7025_v22 = vadd.f32 %v8456_v11, %v11047_v26  ;;  %v8462_v5 = vadd.f32 %v11040_v54, %v8337_v20  ;;  %v6704_v1 = vpop.f32.mrb[187].mxu1 }
 0x4ea   : > { %7535 = vst [vmem:[%s11060_s12 + $0xc8] sm:$0xff] %v7011_v56  ;;  %v7023_v63 = vadd.f32 %v8459_v44, %v11047_v26  ;;  %v8465_v19 = vadd.f32 %v11035_v50, %v6704_v1 }
 0x4eb   : > { %v7041_v4 = vadd.f32 %v7037_v28, %v7025_v22  ;;  %v7026_v45 = vadd.f32 %v8462_v5, %v11047_v26 }
 0x4ec   : > { %v7039_v27 = vadd.f32 %v7035_v49, %v7023_v63  ;;  %v7024_v53 = vadd.f32 %v8465_v19, %v11047_v26 }
 0x4ed   : > { %v7045_v54 = vmax.f32 %v7041_v4, 0.0  ;;  %v7042_v57 = vadd.f32 %v7038_v61, %v7026_v45 }
 0x4ee   : > { %v7043_v32 = vmax.f32 %v7039_v27, 0.0  ;;  %v7040_v18 = vadd.f32 %v7036_v33, %v7024_v53 }
 0x4ef   : > { %7544 = vst [vmem:[%s11060_s12 + $0xf0] sm:$0xff] %v7045_v54  ;;  %v7046_v50 = vmax.f32 %v7042_v57, 0.0 }
 0x4f0   : > { %7542 = vst [vmem:[%s11060_s12 + $0xe0] sm:$0xff] %v7043_v32  ;;  %v7044_v26 = vmax.f32 %v7040_v18, 0.0 }
 0x4f1   : > { %7545 = vst [vmem:[%s11060_s12 + $0xf8] sm:$0xff] %v7046_v50 }
 0x4f2   : > { %7543 = vst [vmem:[%s11060_s12 + $0xe8] sm:$0xff] %v7044_v26 }
 0x4f3   : > { %8978 = shalt.err (!%p8975_p2)
}
 0x4f4   : > { %s8979_s25 = scalar_lea.hbm %s11164_s15, 4096  ;;  %s8983_s14 = scalar_lea.hbm %s11223_s5, 8192 }
 0x4f5   : > { %p8980_p0 = scmp.ne.s32.totalorder %s11164_s15, %s8979_s25  ;;  %p8984_p6 = scmp.lt.u32.totalorder %s11164_s15, %s11223_s5 }
 0x4f6   : > { %p8985_p7 = scmp.lt.u32.totalorder %s8983_s14, %s8979_s25  ;;  %p8987_p8 = scmp.lt.u32.totalorder %s8979_s25, %s11164_s15 }
 0x4f7   : > { %p8981_p4 = pnand %p8980_p0, %p11319_p12 }
 0x4f8   : > { %p8986_p11 = por %p8985_p7, %p8984_p6 }
 0x4f9   : > { %p8982_p13 = pneg %p8981_p4 }
 0x4fa   : > { %p8988_p1 = por %p8987_p8, %p8986_p11 }
 0x4fc   : > { %p8989_p10 = pnand %p8988_p1, %p8982_p13 }
 0x4fe   : > { %8992 = shalt.err (!%p8989_p10)
}
 0x4ff   : > { %s9060_s24 = smov 128   ;;  %s9061_s27 = smov 8  }
 0x500   : > { %8543 = dma.vmem_to_hbm [thread:$0]  (%p11319_p12), %s11166_s6, 4096, %s11164_s15, %s7053_s21, %s9060_s24, %s9060_s24, %s9061_s27  }
 0x501 PF: > { %s7084_s11 = sand.u32 1, %s9031_s18   ;;  %p11320_p3 = scmp.ne.s32.totalorder %s11235_s29, 0 }
 0x502   : > { %p11321_p5 = scmp.ge.s32.totalorder %s9051_s23, 2  ;;  %s7085_s26 = scalar_lea.sflag [#allocation7], %s7084_s11 }
 0x504   : > { %p8557_p9 = pnand %p11321_p5, %p11320_p3 }
 0x506   : > { %9026 = dma.done.wait (!%p8557_p9), %s7085_s26, 4096  }
 0x507   : > { %9028 = vsyncadd (!%p8557_p9), %s7085_s26, 4294963200  ;;  %s22_s23 = sadd.s32 1, %s9051_s23   ;;  %s11322_s18 = smov %s9035_s19 }
 0x508   : > { %p19_p2 = scmp.ge.s32.totalorder %s22_s23, 4   ;;  %s11323_s19 = smov %s9039_s20 }
 0x509   : > { %s11324_s20 = smov %s9243_s17  ;;  %s11325_s21 = smov %s9047_s22 }
 0x50a   : > { %s11326_s22 = smov %s11328_s8  ;;  %21 = sbr.rel (!%p19_p2) target bundleno = 7 (0x7), region = 143 }
 0x511   :  { %7090 = vsyncpa [#allocation6], 1 }
 0x512   :  { %7092 = vsyncpa [#allocation6 + $0x1], 1 }
 0x513   :  { %7093 = vsyncpa [#allocation9], 1 }
 0x514   :  { %7094 = vsyncpa [#allocation7], 1 }
 0x515   :  { %7096 = vsyncpa [#allocation7 + $0x1], 1 }

</bundles_post_ra>
